<compile_context>
chip_gen: v7x
topology: tpu7x:2x2x1
jax: 0.10.0
libtpu: 0.0.40
codegen_flags: <defaults>
</compile_context>

<pallas_src>
import jax
import jax.numpy as jnp
from jax import lax
from jax.experimental import pallas as pl
from jax.experimental.pallas import tpu as pltpu


# ---------------------------------------------------------------------------
# Fused Pallas kernel
# ---------------------------------------------------------------------------

def fused_bilstm_kernel(x_ref, w0x_ref, w0h_ref, b0_ref,
                        w1p_ref, w1q_ref, w1h_ref, b1_ref,
                        fcwf_ref, fcwr_ref, fcb_ref,
                        out_ref, gx_scr, raw_scr):
    """Whole TabularBiLSTM forward for one batch tile.

    x_ref   : (T, Bt, D)     time-major input tile
    w0x_ref : (2, D, 4*GP)   layer-0 [fwd, rev] input->gate weights (gate blocks GP wide)
    w0h_ref : (GP, 4*GP)     layer-0 block-diagonal recurrent weights
    b0_ref  : (1, 4*GP)      layer-0 combined bias (b_ih + b_hh)
    w1p_ref, w1q_ref : (GP, 4*GP)  pre-mixed layer-1 input-projection matrices (P / Q)
    w1h_ref : (GP, 4*GP), b1_ref : (1, 4*GP)
    fcwf_ref, fcwr_ref : (GP, C)   FC weights with only fwd-rows / rev-rows nonzero
    fcb_ref : (1, C)
    out_ref : (Bt, C)
    gx_scr  : (T, Bt, 4*GP) VMEM  hoisted per-step gate pre-activations
    raw_scr : (T, Bt, GP)   VMEM  layer-0 per-step fused hidden [fwd | rev | pad]
    """
    T, B, D = x_ref.shape
    G4 = gx_scr.shape[-1]       # 4 * GP
    GP = raw_scr.shape[-1]      # per-gate block width (vreg aligned)

    def run_layer(wh_ref, store_seq):
        # Both directions fused; h/c hold [fwd | rev | zero-pad] along lanes.
        # One (B,GP)@(GP,4GP) recurrent matmul per step; gate slices vreg-aligned.
        h = None
        c = None
        h_step0 = None
        for s in range(T):
            if s == 0:
                gates = gx_scr[0]                       # h == c == 0 at step 0
            else:
                gates = jnp.dot(h, wh_ref[...],
                                preferred_element_type=jnp.float32) + gx_scr[s]
            i_g = jax.nn.sigmoid(gates[:, 0 * GP:1 * GP])
            f_g = jax.nn.sigmoid(gates[:, 1 * GP:2 * GP])
            g_g = jnp.tanh(gates[:, 2 * GP:3 * GP])
            o_g = jax.nn.sigmoid(gates[:, 3 * GP:4 * GP])
            c = (i_g * g_g) if s == 0 else (f_g * c + i_g * g_g)
            h = o_g * jnp.tanh(c)
            if s == 0:
                # reverse direction consumed time T-1 first -> its hidden at t=T-1
                h_step0 = h
            if store_seq:
                raw_scr[s] = h                          # full-width, unmasked store
        return h, h_step0

    # ---------------- layer 0: hoisted input projection ---------------------
    bias0 = b0_ref[...]
    if D == 1:
        # input_size == 1: skip the MXU entirely -> broadcast outer product (VPU only).
        wxf = w0x_ref[0]                                # (1, 4GP)
        wxr = w0x_ref[1]
        for s in range(T):
            gx_scr[s] = x_ref[s] * wxf + x_ref[T - 1 - s] * wxr + bias0
    else:
        # Batched over time: 2 matmuls of M = T*B instead of 2T matmuls of M = B.
        x_flat = x_ref[...].reshape(T * B, D)
        gf0 = jnp.dot(x_flat, w0x_ref[0], preferred_element_type=jnp.float32)
        gr0 = jnp.dot(x_flat, w0x_ref[1], preferred_element_type=jnp.float32)
        for s in range(T):
            gx_scr[s] = (gf0[s * B:(s + 1) * B]
                         + gr0[(T - 1 - s) * B:(T - s) * B]
                         + bias0)

    run_layer(w0h_ref, store_seq=True)

    # ---------------- layer 1: batched projection off raw layer-0 hiddens ----
    # raw_scr[s] = [fwd_h(t=s) | rev_h(t=T-1-s) | pad].  The pre-mixed P/Q matrices
    # route each half into the right direction's gate columns, so
    #   gx1[s] = P[s] + Q[T-1-s] + bias1   ==   x1[s]@Wx_f + x1[T-1-s]@Wx_r + bias1
    bias1 = b1_ref[...]
    raw_flat = raw_scr[...].reshape(T * B, GP)
    p_all = jnp.dot(raw_flat, w1p_ref[...], preferred_element_type=jnp.float32)
    q_all = jnp.dot(raw_flat, w1q_ref[...], preferred_element_type=jnp.float32)
    for s in range(T):
        gx_scr[s] = (p_all[s * B:(s + 1) * B]
                     + q_all[(T - 1 - s) * B:(T - s) * B]
                     + bias1)

    h_final, h_step0 = run_layer(w1h_ref, store_seq=False)

    # ---------------- FC: two padded-row dots, no lane slicing / concat ------
    out_ref[...] = (jnp.dot(h_final, fcwf_ref[...], preferred_element_type=jnp.float32)
                    + jnp.dot(h_step0, fcwr_ref[...], preferred_element_type=jnp.float32)
                    + fcb_ref[...])


# ---------------------------------------------------------------------------
# Wrapper
# ---------------------------------------------------------------------------

def tabular_bilstm_forward(x_btd, packed):
    """x_btd: (B, T, input_size) batch-first, like the PyTorch module."""
    x_tbd = jnp.transpose(x_btd, (1, 0, 2)).astype(jnp.float32)          # (T, B, D)
    T, B, D = x_tbd.shape
    GP = packed["w0h"].shape[0]
    G4 = packed["w0h"].shape[1]
    C = packed["fc_b"].shape[1]

    # Pad batch to a sublane multiple and tile it over a parallel grid axis.
    B8 = ((B + 7) // 8) * 8
    b_tile = min(B8, 128)
    b_pad = ((B8 + b_tile - 1) // b_tile) * b_tile
    if b_pad != B:
        x_tbd = jnp.pad(x_tbd, ((0, 0), (0, b_pad - B), (0, 0)))
    n_tiles = b_pad // b_tile

    def full(a):
        return pl.BlockSpec(a.shape, lambda b, nd=a.ndim: (0,) * nd)

    out = pl.pallas_call(
        fused_bilstm_kernel,
        out_shape=jax.ShapeDtypeStruct((b_pad, C), jnp.float32),
        grid=(n_tiles,),
        in_specs=[
            pl.BlockSpec((T, b_tile, D), lambda b: (0, b, 0)),
            full(packed["w0x"]), full(packed["w0h"]), full(packed["b0"]),
            full(packed["w1p"]), full(packed["w1q"]),
            full(packed["w1h"]), full(packed["b1"]),
            full(packed["fc_wf"]), full(packed["fc_wr"]), full(packed["fc_b"]),
        ],
        out_specs=pl.BlockSpec((b_tile, C), lambda b: (b, 0)),
        scratch_shapes=[
            pltpu.VMEM((T, b_tile, G4), jnp.float32),   # hoisted gate pre-activations
            pltpu.VMEM((T, b_tile, GP), jnp.float32),   # layer-0 per-step fused hidden
        ],
        compiler_params=pltpu.CompilerParams(
            dimension_semantics=("parallel",),
            vmem_limit_bytes=32 * 1024 * 1024),
    )(x_tbd, packed["w0x"], packed["w0h"], packed["b0"],
      packed["w1p"], packed["w1q"], packed["w1h"], packed["b1"],
      packed["fc_wf"], packed["fc_wr"], packed["fc_b"])
    return out[:B]


# ---------------------------------------------------------------------------
# Parameter init (PyTorch-style uniform) and fused-weight packing
# ---------------------------------------------------------------------------

def init_params(key, input_size, hidden, num_classes):
    bound = 1.0 / jnp.sqrt(hidden)

    def uni(k, shape):
        return jax.random.uniform(k, shape, jnp.float32, -bound, bound)

    def lstm_dir_params(k, d_in):
        k1, k2, k3, k4 = jax.random.split(k, 4)
        w_ih = uni(k1, (d_in, 4 * hidden))          # stored transposed vs. PyTorch
        w_hh = uni(k2, (hidden, 4 * hidden))
        b = uni(k3, (1, 4 * hidden)) + uni(k4, (1, 4 * hidden))   # b_ih + b_hh
        return (w_ih, w_hh, b)

    keys = jax.random.split(key, 6)
    return {
        "l0_fwd": lstm_dir_params(keys[0], input_size),
        "l0_rev": lstm_dir_params(keys[1], input_size),
        "l1_fwd": lstm_dir_params(keys[2], 2 * hidden),
        "l1_rev": lstm_dir_params(keys[3], 2 * hidden),
        "fc_w": uni(keys[4], (2 * hidden, num_classes)),
        "fc_b": uni(keys[5], (1, num_classes)),
    }


def pack_params(params, hidden):
    """Build direction-fused, vreg-aligned weights for the fused kernel.

    Gate column layout (width 4*GP): blocks [i | f | g | o], each GP = ceil(2H/128)*128
    lanes wide; within a block: [fwd(H) | rev(H) | zero-pad].  Hidden/cell lanes use the
    same [fwd | rev | pad] layout, so padded lanes stay exactly zero through the
    recurrence (zero pre-activation -> g=0 -> c=h=0).
    """
    H = hidden
    H2 = 2 * H
    GP = ((H2 + 127) // 128) * 128
    G4 = 4 * GP
    C = params["fc_w"].shape[1]

    def place(dst, src, row_sl, dir_off):
        # src: (rows, 4H) with gate blocks [i|f|g|o] each H wide.
        for b in range(4):
            dst = dst.at[row_sl, b * GP + dir_off: b * GP + dir_off + H].set(
                src[:, b * H:(b + 1) * H])
        return dst

    def pack_bias(b_f, b_r):
        b = jnp.zeros((1, G4), jnp.float32)
        b = place(b, b_f, slice(None), 0)
        b = place(b, b_r, slice(None), H)
        return b

    def pack_recurrent(w_hh_f, w_hh_r):
        wh = jnp.zeros((GP, G4), jnp.float32)
        wh = place(wh, w_hh_f, slice(0, H), 0)      # fwd hidden -> fwd gate cols
        wh = place(wh, w_hh_r, slice(H, H2), H)     # rev hidden -> rev gate cols
        return wh

    # ---- layer 0 ----
    w_ih_f0, w_hh_f0, b_f0 = params["l0_fwd"]
    w_ih_r0, w_hh_r0, b_r0 = params["l0_rev"]
    d_in = w_ih_f0.shape[0]
    wx_f = place(jnp.zeros((d_in, G4), jnp.float32), w_ih_f0, slice(None), 0)
    wx_r = place(jnp.zeros((d_in, G4), jnp.float32), w_ih_r0, slice(None), H)
    w0x = jnp.stack([wx_f, wx_r], axis=0)                       # (2, D, 4GP)
    w0h = pack_recurrent(w_hh_f0, w_hh_r0)
    b0 = pack_bias(b_f0, b_r0)

    # ---- layer 1: pre-mixed P / Q input-projection matrices ----
    # raw[s] = [fwd_h(t=s) | rev_h(t=T-1-s) | pad]
    # P := raw @ w1p = fwd_h(s)@Wf[0:H]      (fwd cols) + rev_h(T-1-s)@Wr[H:2H] (rev cols)
    # Q := raw @ w1q = fwd_h(s)@Wr[0:H]      (rev cols) + rev_h(T-1-s)@Wf[H:2H] (fwd cols)
    # gx1[s] = P[s] + Q[T-1-s] + bias1
    w_ih_f1, w_hh_f1, b_f1 = params["l1_fwd"]   # w_ih_*1: (2H, 4H), rows = [fwd-half; rev-half]
    w_ih_r1, w_hh_r1, b_r1 = params["l1_rev"]
    w1p = jnp.zeros((GP, G4), jnp.float32)
    w1p = place(w1p, w_ih_f1[:H], slice(0, H), 0)
    w1p = place(w1p, w_ih_r1[H:], slice(H, H2), H)
    w1q = jnp.zeros((GP, G4), jnp.float32)
    w1q = place(w1q, w_ih_r1[:H], slice(0, H), H)
    w1q = place(w1q, w_ih_f1[H:], slice(H, H2), 0)
    w1h = pack_recurrent(w_hh_f1, w_hh_r1)
    b1 = pack_bias(b_f1, b_r1)

    # ---- FC: split by hidden-lane rows so no in-kernel concat is needed ----
    fc_wf = jnp.zeros((GP, C), jnp.float32).at[0:H].set(params["fc_w"][0:H])
    fc_wr = jnp.zeros((GP, C), jnp.float32).at[H:H2].set(params["fc_w"][H:H2])

    return {"w0x": w0x, "w0h": w0h, "b0": b0,
            "w1p": w1p, "w1q": w1q, "w1h": w1h, "b1": b1,
            "fc_wf": fc_wf, "fc_wr": fc_wr, "fc_b": params["fc_b"]}


# ---------------------------------------------------------------------------
# Pure-JAX reference (same math) for a correctness check
# ---------------------------------------------------------------------------

def lstm_dir_ref(x_tbd, w_ih, w_hh, b):
    H = w_hh.shape[0]
    B = x_tbd.shape[1]

    def step(carry, x_t):
        h, c = carry
        gates = x_t @ w_ih + h @ w_hh + b
        i = jax.nn.sigmoid(gates[:, :H])
        f = jax.nn.sigmoid(gates[:, H:2 * H])
        g = jnp.tanh(gates[:, 2 * H:3 * H])
        o = jax.nn.sigmoid(gates[:, 3 * H:])
        c = f * c + i * g
        h = o * jnp.tanh(c)
        return (h, c), h

    init = (jnp.zeros((B, H), jnp.float32), jnp.zeros((B, H), jnp.float32))
    _, hs = lax.scan(step, init, x_tbd)
    return hs


def forward_ref(x_btd, params):
    x_tbd = jnp.transpose(x_btd, (1, 0, 2)).astype(jnp.float32)

    def bilayer(x, pf, pr):
        of = lstm_dir_ref(x, *pf)
        orv = lstm_dir_ref(x[::-1], *pr)[::-1]
        return jnp.concatenate([of, orv], axis=-1)

    h = bilayer(x_tbd, params["l0_fwd"], params["l0_rev"])
    h = bilayer(h, params["l1_fwd"], params["l1_rev"])
    return h[-1] @ params["fc_w"] + params["fc_b"]


# ---------------------------------------------------------------------------

if __name__ == "__main__":
    B, T = 2, 8
    INPUT_SIZE, HIDDEN, NUM_CLASSES = 1, 64, 2

    key = jax.random.PRNGKey(0)
    k_x, k_p = jax.random.split(key)
    x = jax.random.normal(k_x, (B, T, INPUT_SIZE), dtype=jnp.float32)
    params = init_params(k_p, INPUT_SIZE, HIDDEN, NUM_CLASSES)
    packed = pack_params(params, HIDDEN)

    fwd = jax.jit(tabular_bilstm_forward)
    out = jax.block_until_ready(fwd(x, packed))

    ref = jax.block_until_ready(forward_ref(x, params))
    assert out.shape == (B, NUM_CLASSES), out.shape
    assert jnp.allclose(out, ref, atol=1e-4, rtol=1e-4), (out, ref)

    print("KERNEL_OK")
</pallas_src>

<mosaic_0001>
module attributes {stable_mosaic.version = 11 : i64} {
  func.func @fused_bilstm_kernel(%arg0: i32, %arg1: memref<8x8x1xf32, #tpu.memory_space<vmem>>, %arg2: memref<2x1x512xf32, #tpu.memory_space<vmem>>, %arg3: memref<128x512xf32, #tpu.memory_space<vmem>>, %arg4: memref<1x512xf32, #tpu.memory_space<vmem>>, %arg5: memref<128x512xf32, #tpu.memory_space<vmem>>, %arg6: memref<128x512xf32, #tpu.memory_space<vmem>>, %arg7: memref<128x512xf32, #tpu.memory_space<vmem>>, %arg8: memref<1x512xf32, #tpu.memory_space<vmem>>, %arg9: memref<128x2xf32, #tpu.memory_space<vmem>>, %arg10: memref<128x2xf32, #tpu.memory_space<vmem>>, %arg11: memref<1x2xf32, #tpu.memory_space<vmem>>, %arg12: memref<8x2xf32, #tpu.memory_space<vmem>>, %arg13: memref<8x8x512xf32, #tpu.memory_space<vmem>>, %arg14: memref<8x8x128xf32, #tpu.memory_space<vmem>>) attributes {dimension_semantics = [#tpu.dimension_semantics<parallel>], iteration_bounds = array<i64: 1>, scalar_prefetch = 0 : i64, scratch_operands = 2 : i64, tpu.core_type = #tpu.core_type<tc>, window_params = [{transform_indices = @transform_0, window_bounds = array<i64: 8, 8, 1>}, {pipeline_mode = #tpu.pipeline_mode<synchronous>, transform_indices = @transform_1, window_bounds = array<i64: 2, 1, 512>}, {pipeline_mode = #tpu.pipeline_mode<synchronous>, transform_indices = @transform_2, window_bounds = array<i64: 128, 512>}, {pipeline_mode = #tpu.pipeline_mode<synchronous>, transform_indices = @transform_3, window_bounds = array<i64: 1, 512>}, {pipeline_mode = #tpu.pipeline_mode<synchronous>, transform_indices = @transform_4, window_bounds = array<i64: 128, 512>}, {pipeline_mode = #tpu.pipeline_mode<synchronous>, transform_indices = @transform_5, window_bounds = array<i64: 128, 512>}, {pipeline_mode = #tpu.pipeline_mode<synchronous>, transform_indices = @transform_6, window_bounds = array<i64: 128, 512>}, {pipeline_mode = #tpu.pipeline_mode<synchronous>, transform_indices = @transform_7, window_bounds = array<i64: 1, 512>}, {pipeline_mode = #tpu.pipeline_mode<synchronous>, transform_indices = @transform_8, window_bounds = array<i64: 128, 2>}, {pipeline_mode = #tpu.pipeline_mode<synchronous>, transform_indices = @transform_9, window_bounds = array<i64: 128, 2>}, {pipeline_mode = #tpu.pipeline_mode<synchronous>, transform_indices = @transform_10, window_bounds = array<i64: 1, 2>}, {transform_indices = @transform_11, window_bounds = array<i64: 8, 2>}]} {
    %c0 = arith.constant 0 : index
    %c0_0 = arith.constant 0 : index
    %0 = vector.load %arg4[%c0, %c0_0] : memref<1x512xf32, #tpu.memory_space<vmem>>, vector<1x512xf32>
    %c0_1 = arith.constant 0 : index
    %c0_2 = arith.constant 0 : index
    %c0_3 = arith.constant 0 : index
    %1 = vector.load %arg2[%c0_1, %c0_2, %c0_3] : memref<2x1x512xf32, #tpu.memory_space<vmem>>, vector<1x1x512xf32>
    %2 = vector.shape_cast %1 : vector<1x1x512xf32> to vector<1x512xf32>
    %c1 = arith.constant 1 : index
    %c0_4 = arith.constant 0 : index
    %c0_5 = arith.constant 0 : index
    %3 = vector.load %arg2[%c1, %c0_4, %c0_5] : memref<2x1x512xf32, #tpu.memory_space<vmem>>, vector<1x1x512xf32>
    %4 = vector.shape_cast %3 : vector<1x1x512xf32> to vector<1x512xf32>
    %c0_6 = arith.constant 0 : index
    %c0_7 = arith.constant 0 : index
    %c0_8 = arith.constant 0 : index
    %5 = vector.load %arg1[%c0_6, %c0_7, %c0_8] : memref<8x8x1xf32, #tpu.memory_space<vmem>>, vector<1x8x1xf32>
    %6 = vector.shape_cast %5 : vector<1x8x1xf32> to vector<8x1xf32>
    %7 = vector.broadcast %6 : vector<8x1xf32> to vector<8x512xf32>
    %8 = vector.broadcast %2 : vector<1x512xf32> to vector<8x512xf32>
    %9 = arith.mulf %7, %8 : vector<8x512xf32>
    %c7 = arith.constant 7 : index
    %c0_9 = arith.constant 0 : index
    %c0_10 = arith.constant 0 : index
    %10 = vector.load %arg1[%c7, %c0_9, %c0_10] : memref<8x8x1xf32, #tpu.memory_space<vmem>>, vector<1x8x1xf32>
    %11 = vector.shape_cast %10 : vector<1x8x1xf32> to vector<8x1xf32>
    %12 = vector.broadcast %11 : vector<8x1xf32> to vector<8x512xf32>
    %13 = vector.broadcast %4 : vector<1x512xf32> to vector<8x512xf32>
    %14 = arith.mulf %12, %13 : vector<8x512xf32>
    %15 = arith.addf %9, %14 : vector<8x512xf32>
    %16 = vector.broadcast %0 : vector<1x512xf32> to vector<8x512xf32>
    %17 = arith.addf %15, %16 : vector<8x512xf32>
    %c0_11 = arith.constant 0 : index
    %c0_12 = arith.constant 0 : index
    %c0_13 = arith.constant 0 : index
    %18 = vector.load %arg13[%c0_11, %c0_12, %c0_13] : memref<8x8x512xf32, #tpu.memory_space<vmem>>, vector<1x8x512xf32>
    %19 = vector.shape_cast %18 : vector<1x8x512xf32> to vector<8x512xf32>
    %20 = vector.shape_cast %17 : vector<8x512xf32> to vector<1x8x512xf32>
    tpu.vector_store %arg13[%c0_11, %c0_12, %c0_13], %20 {strides = array<i32>} : memref<8x8x512xf32, #tpu.memory_space<vmem>>, vector<1x8x512xf32>,
    %c1_14 = arith.constant 1 : index
    %c0_15 = arith.constant 0 : index
    %c0_16 = arith.constant 0 : index
    %21 = vector.load %arg1[%c1_14, %c0_15, %c0_16] : memref<8x8x1xf32, #tpu.memory_space<vmem>>, vector<1x8x1xf32>
    %22 = vector.shape_cast %21 : vector<1x8x1xf32> to vector<8x1xf32>
    %23 = vector.broadcast %22 : vector<8x1xf32> to vector<8x512xf32>
    %24 = vector.broadcast %2 : vector<1x512xf32> to vector<8x512xf32>
    %25 = arith.mulf %23, %24 : vector<8x512xf32>
    %c6 = arith.constant 6 : index
    %c0_17 = arith.constant 0 : index
    %c0_18 = arith.constant 0 : index
    %26 = vector.load %arg1[%c6, %c0_17, %c0_18] : memref<8x8x1xf32, #tpu.memory_space<vmem>>, vector<1x8x1xf32>
    %27 = vector.shape_cast %26 : vector<1x8x1xf32> to vector<8x1xf32>
    %28 = vector.broadcast %27 : vector<8x1xf32> to vector<8x512xf32>
    %29 = vector.broadcast %4 : vector<1x512xf32> to vector<8x512xf32>
    %30 = arith.mulf %28, %29 : vector<8x512xf32>
    %31 = arith.addf %25, %30 : vector<8x512xf32>
    %32 = vector.broadcast %0 : vector<1x512xf32> to vector<8x512xf32>
    %33 = arith.addf %31, %32 : vector<8x512xf32>
    %c1_19 = arith.constant 1 : index
    %c0_20 = arith.constant 0 : index
    %c0_21 = arith.constant 0 : index
    %34 = vector.load %arg13[%c1_19, %c0_20, %c0_21] : memref<8x8x512xf32, #tpu.memory_space<vmem>>, vector<1x8x512xf32>
    %35 = vector.shape_cast %34 : vector<1x8x512xf32> to vector<8x512xf32>
    %36 = vector.shape_cast %33 : vector<8x512xf32> to vector<1x8x512xf32>
    tpu.vector_store %arg13[%c1_19, %c0_20, %c0_21], %36 {strides = array<i32>} : memref<8x8x512xf32, #tpu.memory_space<vmem>>, vector<1x8x512xf32>,
    %c2 = arith.constant 2 : index
    %c0_22 = arith.constant 0 : index
    %c0_23 = arith.constant 0 : index
    %37 = vector.load %arg1[%c2, %c0_22, %c0_23] : memref<8x8x1xf32, #tpu.memory_space<vmem>>, vector<1x8x1xf32>
    %38 = vector.shape_cast %37 : vector<1x8x1xf32> to vector<8x1xf32>
    %39 = vector.broadcast %38 : vector<8x1xf32> to vector<8x512xf32>
    %40 = vector.broadcast %2 : vector<1x512xf32> to vector<8x512xf32>
    %41 = arith.mulf %39, %40 : vector<8x512xf32>
    %c5 = arith.constant 5 : index
    %c0_24 = arith.constant 0 : index
    %c0_25 = arith.constant 0 : index
    %42 = vector.load %arg1[%c5, %c0_24, %c0_25] : memref<8x8x1xf32, #tpu.memory_space<vmem>>, vector<1x8x1xf32>
    %43 = vector.shape_cast %42 : vector<1x8x1xf32> to vector<8x1xf32>
    %44 = vector.broadcast %43 : vector<8x1xf32> to vector<8x512xf32>
    %45 = vector.broadcast %4 : vector<1x512xf32> to vector<8x512xf32>
    %46 = arith.mulf %44, %45 : vector<8x512xf32>
    %47 = arith.addf %41, %46 : vector<8x512xf32>
    %48 = vector.broadcast %0 : vector<1x512xf32> to vector<8x512xf32>
    %49 = arith.addf %47, %48 : vector<8x512xf32>
    %c2_26 = arith.constant 2 : index
    %c0_27 = arith.constant 0 : index
    %c0_28 = arith.constant 0 : index
    %50 = vector.load %arg13[%c2_26, %c0_27, %c0_28] : memref<8x8x512xf32, #tpu.memory_space<vmem>>, vector<1x8x512xf32>
    %51 = vector.shape_cast %50 : vector<1x8x512xf32> to vector<8x512xf32>
    %52 = vector.shape_cast %49 : vector<8x512xf32> to vector<1x8x512xf32>
    tpu.vector_store %arg13[%c2_26, %c0_27, %c0_28], %52 {strides = array<i32>} : memref<8x8x512xf32, #tpu.memory_space<vmem>>, vector<1x8x512xf32>,
    %c3 = arith.constant 3 : index
    %c0_29 = arith.constant 0 : index
    %c0_30 = arith.constant 0 : index
    %53 = vector.load %arg1[%c3, %c0_29, %c0_30] : memref<8x8x1xf32, #tpu.memory_space<vmem>>, vector<1x8x1xf32>
    %54 = vector.shape_cast %53 : vector<1x8x1xf32> to vector<8x1xf32>
    %55 = vector.broadcast %54 : vector<8x1xf32> to vector<8x512xf32>
    %56 = vector.broadcast %2 : vector<1x512xf32> to vector<8x512xf32>
    %57 = arith.mulf %55, %56 : vector<8x512xf32>
    %c4 = arith.constant 4 : index
    %c0_31 = arith.constant 0 : index
    %c0_32 = arith.constant 0 : index
    %58 = vector.load %arg1[%c4, %c0_31, %c0_32] : memref<8x8x1xf32, #tpu.memory_space<vmem>>, vector<1x8x1xf32>
    %59 = vector.shape_cast %58 : vector<1x8x1xf32> to vector<8x1xf32>
    %60 = vector.broadcast %59 : vector<8x1xf32> to vector<8x512xf32>
    %61 = vector.broadcast %4 : vector<1x512xf32> to vector<8x512xf32>
    %62 = arith.mulf %60, %61 : vector<8x512xf32>
    %63 = arith.addf %57, %62 : vector<8x512xf32>
    %64 = vector.broadcast %0 : vector<1x512xf32> to vector<8x512xf32>
    %65 = arith.addf %63, %64 : vector<8x512xf32>
    %c3_33 = arith.constant 3 : index
    %c0_34 = arith.constant 0 : index
    %c0_35 = arith.constant 0 : index
    %66 = vector.load %arg13[%c3_33, %c0_34, %c0_35] : memref<8x8x512xf32, #tpu.memory_space<vmem>>, vector<1x8x512xf32>
    %67 = vector.shape_cast %66 : vector<1x8x512xf32> to vector<8x512xf32>
    %68 = vector.shape_cast %65 : vector<8x512xf32> to vector<1x8x512xf32>
    tpu.vector_store %arg13[%c3_33, %c0_34, %c0_35], %68 {strides = array<i32>} : memref<8x8x512xf32, #tpu.memory_space<vmem>>, vector<1x8x512xf32>,
    %c4_36 = arith.constant 4 : index
    %c0_37 = arith.constant 0 : index
    %c0_38 = arith.constant 0 : index
    %69 = vector.load %arg1[%c4_36, %c0_37, %c0_38] : memref<8x8x1xf32, #tpu.memory_space<vmem>>, vector<1x8x1xf32>
    %70 = vector.shape_cast %69 : vector<1x8x1xf32> to vector<8x1xf32>
    %71 = vector.broadcast %70 : vector<8x1xf32> to vector<8x512xf32>
    %72 = vector.broadcast %2 : vector<1x512xf32> to vector<8x512xf32>
    %73 = arith.mulf %71, %72 : vector<8x512xf32>
    %c3_39 = arith.constant 3 : index
    %c0_40 = arith.constant 0 : index
    %c0_41 = arith.constant 0 : index
    %74 = vector.load %arg1[%c3_39, %c0_40, %c0_41] : memref<8x8x1xf32, #tpu.memory_space<vmem>>, vector<1x8x1xf32>
    %75 = vector.shape_cast %74 : vector<1x8x1xf32> to vector<8x1xf32>
    %76 = vector.broadcast %75 : vector<8x1xf32> to vector<8x512xf32>
    %77 = vector.broadcast %4 : vector<1x512xf32> to vector<8x512xf32>
    %78 = arith.mulf %76, %77 : vector<8x512xf32>
    %79 = arith.addf %73, %78 : vector<8x512xf32>
    %80 = vector.broadcast %0 : vector<1x512xf32> to vector<8x512xf32>
    %81 = arith.addf %79, %80 : vector<8x512xf32>
    %c4_42 = arith.constant 4 : index
    %c0_43 = arith.constant 0 : index
    %c0_44 = arith.constant 0 : index
    %82 = vector.load %arg13[%c4_42, %c0_43, %c0_44] : memref<8x8x512xf32, #tpu.memory_space<vmem>>, vector<1x8x512xf32>
    %83 = vector.shape_cast %82 : vector<1x8x512xf32> to vector<8x512xf32>
    %84 = vector.shape_cast %81 : vector<8x512xf32> to vector<1x8x512xf32>
    tpu.vector_store %arg13[%c4_42, %c0_43, %c0_44], %84 {strides = array<i32>} : memref<8x8x512xf32, #tpu.memory_space<vmem>>, vector<1x8x512xf32>,
    %c5_45 = arith.constant 5 : index
    %c0_46 = arith.constant 0 : index
    %c0_47 = arith.constant 0 : index
    %85 = vector.load %arg1[%c5_45, %c0_46, %c0_47] : memref<8x8x1xf32, #tpu.memory_space<vmem>>, vector<1x8x1xf32>
    %86 = vector.shape_cast %85 : vector<1x8x1xf32> to vector<8x1xf32>
    %87 = vector.broadcast %86 : vector<8x1xf32> to vector<8x512xf32>
    %88 = vector.broadcast %2 : vector<1x512xf32> to vector<8x512xf32>
    %89 = arith.mulf %87, %88 : vector<8x512xf32>
    %c2_48 = arith.constant 2 : index
    %c0_49 = arith.constant 0 : index
    %c0_50 = arith.constant 0 : index
    %90 = vector.load %arg1[%c2_48, %c0_49, %c0_50] : memref<8x8x1xf32, #tpu.memory_space<vmem>>, vector<1x8x1xf32>
    %91 = vector.shape_cast %90 : vector<1x8x1xf32> to vector<8x1xf32>
    %92 = vector.broadcast %91 : vector<8x1xf32> to vector<8x512xf32>
    %93 = vector.broadcast %4 : vector<1x512xf32> to vector<8x512xf32>
    %94 = arith.mulf %92, %93 : vector<8x512xf32>
    %95 = arith.addf %89, %94 : vector<8x512xf32>
    %96 = vector.broadcast %0 : vector<1x512xf32> to vector<8x512xf32>
    %97 = arith.addf %95, %96 : vector<8x512xf32>
    %c5_51 = arith.constant 5 : index
    %c0_52 = arith.constant 0 : index
    %c0_53 = arith.constant 0 : index
    %98 = vector.load %arg13[%c5_51, %c0_52, %c0_53] : memref<8x8x512xf32, #tpu.memory_space<vmem>>, vector<1x8x512xf32>
    %99 = vector.shape_cast %98 : vector<1x8x512xf32> to vector<8x512xf32>
    %100 = vector.shape_cast %97 : vector<8x512xf32> to vector<1x8x512xf32>
    tpu.vector_store %arg13[%c5_51, %c0_52, %c0_53], %100 {strides = array<i32>} : memref<8x8x512xf32, #tpu.memory_space<vmem>>, vector<1x8x512xf32>,
    %c6_54 = arith.constant 6 : index
    %c0_55 = arith.constant 0 : index
    %c0_56 = arith.constant 0 : index
    %101 = vector.load %arg1[%c6_54, %c0_55, %c0_56] : memref<8x8x1xf32, #tpu.memory_space<vmem>>, vector<1x8x1xf32>
    %102 = vector.shape_cast %101 : vector<1x8x1xf32> to vector<8x1xf32>
    %103 = vector.broadcast %102 : vector<8x1xf32> to vector<8x512xf32>
    %104 = vector.broadcast %2 : vector<1x512xf32> to vector<8x512xf32>
    %105 = arith.mulf %103, %104 : vector<8x512xf32>
    %c1_57 = arith.constant 1 : index
    %c0_58 = arith.constant 0 : index
    %c0_59 = arith.constant 0 : index
    %106 = vector.load %arg1[%c1_57, %c0_58, %c0_59] : memref<8x8x1xf32, #tpu.memory_space<vmem>>, vector<1x8x1xf32>
    %107 = vector.shape_cast %106 : vector<1x8x1xf32> to vector<8x1xf32>
    %108 = vector.broadcast %107 : vector<8x1xf32> to vector<8x512xf32>
    %109 = vector.broadcast %4 : vector<1x512xf32> to vector<8x512xf32>
    %110 = arith.mulf %108, %109 : vector<8x512xf32>
    %111 = arith.addf %105, %110 : vector<8x512xf32>
    %112 = vector.broadcast %0 : vector<1x512xf32> to vector<8x512xf32>
    %113 = arith.addf %111, %112 : vector<8x512xf32>
    %c6_60 = arith.constant 6 : index
    %c0_61 = arith.constant 0 : index
    %c0_62 = arith.constant 0 : index
    %114 = vector.load %arg13[%c6_60, %c0_61, %c0_62] : memref<8x8x512xf32, #tpu.memory_space<vmem>>, vector<1x8x512xf32>
    %115 = vector.shape_cast %114 : vector<1x8x512xf32> to vector<8x512xf32>
    %116 = vector.shape_cast %113 : vector<8x512xf32> to vector<1x8x512xf32>
    tpu.vector_store %arg13[%c6_60, %c0_61, %c0_62], %116 {strides = array<i32>} : memref<8x8x512xf32, #tpu.memory_space<vmem>>, vector<1x8x512xf32>,
    %c7_63 = arith.constant 7 : index
    %c0_64 = arith.constant 0 : index
    %c0_65 = arith.constant 0 : index
    %117 = vector.load %arg1[%c7_63, %c0_64, %c0_65] : memref<8x8x1xf32, #tpu.memory_space<vmem>>, vector<1x8x1xf32>
    %118 = vector.shape_cast %117 : vector<1x8x1xf32> to vector<8x1xf32>
    %119 = vector.broadcast %118 : vector<8x1xf32> to vector<8x512xf32>
    %120 = vector.broadcast %2 : vector<1x512xf32> to vector<8x512xf32>
    %121 = arith.mulf %119, %120 : vector<8x512xf32>
    %c0_66 = arith.constant 0 : index
    %c0_67 = arith.constant 0 : index
    %c0_68 = arith.constant 0 : index
    %122 = vector.load %arg1[%c0_66, %c0_67, %c0_68] : memref<8x8x1xf32, #tpu.memory_space<vmem>>, vector<1x8x1xf32>
    %123 = vector.shape_cast %122 : vector<1x8x1xf32> to vector<8x1xf32>
    %124 = vector.broadcast %123 : vector<8x1xf32> to vector<8x512xf32>
    %125 = vector.broadcast %4 : vector<1x512xf32> to vector<8x512xf32>
    %126 = arith.mulf %124, %125 : vector<8x512xf32>
    %127 = arith.addf %121, %126 : vector<8x512xf32>
    %128 = vector.broadcast %0 : vector<1x512xf32> to vector<8x512xf32>
    %129 = arith.addf %127, %128 : vector<8x512xf32>
    %c7_69 = arith.constant 7 : index
    %c0_70 = arith.constant 0 : index
    %c0_71 = arith.constant 0 : index
    %130 = vector.load %arg13[%c7_69, %c0_70, %c0_71] : memref<8x8x512xf32, #tpu.memory_space<vmem>>, vector<1x8x512xf32>
    %131 = vector.shape_cast %130 : vector<1x8x512xf32> to vector<8x512xf32>
    %132 = vector.shape_cast %129 : vector<8x512xf32> to vector<1x8x512xf32>
    tpu.vector_store %arg13[%c7_69, %c0_70, %c0_71], %132 {strides = array<i32>} : memref<8x8x512xf32, #tpu.memory_space<vmem>>, vector<1x8x512xf32>,
    %c0_72 = arith.constant 0 : index
    %c0_73 = arith.constant 0 : index
    %c0_74 = arith.constant 0 : index
    %133 = vector.load %arg13[%c0_72, %c0_73, %c0_74] : memref<8x8x512xf32, #tpu.memory_space<vmem>>, vector<1x8x512xf32>
    %134 = vector.shape_cast %133 : vector<1x8x512xf32> to vector<8x512xf32>
    %135 = vector.extract_strided_slice %134 {offsets = [0, 0], sizes = [8, 128], strides = [1, 1]} : vector<8x512xf32> to vector<8x128xf32>
    %136 = arith.negf %135 : vector<8x128xf32>
    %137 = math.exp %136 : vector<8x128xf32>
    %cst = arith.constant 1.000000e+00 : f32
    %138 = vector.broadcast %cst : f32 to vector<8x128xf32>
    %139 = arith.addf %138, %137 : vector<8x128xf32>
    %140 = arith.divf %138, %139 : vector<8x128xf32>
    %141 = vector.extract_strided_slice %134 {offsets = [0, 256], sizes = [8, 128], strides = [1, 1]} : vector<8x512xf32> to vector<8x128xf32>
    %142 = math.tanh %141 : vector<8x128xf32>
    %143 = vector.extract_strided_slice %134 {offsets = [0, 384], sizes = [8, 128], strides = [1, 1]} : vector<8x512xf32> to vector<8x128xf32>
    %144 = arith.negf %143 : vector<8x128xf32>
    %145 = math.exp %144 : vector<8x128xf32>
    %cst_75 = arith.constant 1.000000e+00 : f32
    %146 = vector.broadcast %cst_75 : f32 to vector<8x128xf32>
    %147 = arith.addf %146, %145 : vector<8x128xf32>
    %148 = arith.divf %146, %147 : vector<8x128xf32>
    %149 = arith.mulf %140, %142 : vector<8x128xf32>
    %150 = math.tanh %149 : vector<8x128xf32>
    %151 = arith.mulf %148, %150 : vector<8x128xf32>
    %c0_76 = arith.constant 0 : index
    %c0_77 = arith.constant 0 : index
    %c0_78 = arith.constant 0 : index
    %152 = vector.load %arg14[%c0_76, %c0_77, %c0_78] : memref<8x8x128xf32, #tpu.memory_space<vmem>>, vector<1x8x128xf32>
    %153 = vector.shape_cast %152 : vector<1x8x128xf32> to vector<8x128xf32>
    %154 = vector.shape_cast %151 : vector<8x128xf32> to vector<1x8x128xf32>
    tpu.vector_store %arg14[%c0_76, %c0_77, %c0_78], %154 {strides = array<i32>} : memref<8x8x128xf32, #tpu.memory_space<vmem>>, vector<1x8x128xf32>,
    %c0_79 = arith.constant 0 : index
    %c0_80 = arith.constant 0 : index
    %155 = vector.load %arg3[%c0_79, %c0_80] : memref<128x512xf32, #tpu.memory_space<vmem>>, vector<128x512xf32>
    %cst_81 = arith.constant dense<0.000000e+00> : vector<8x512xf32>
    %156 = tpu.matmul %151, %155, %cst_81 {dimension_numbers = #tpu.dot_dimension_numbers<[1], [0], [0], [1], [0, 0, 1, 1], [], []>} : vector<8x128xf32>, vector<128x512xf32>, vector<8x512xf32> -> vector<8x512xf32>
    %c1_82 = arith.constant 1 : index
    %c0_83 = arith.constant 0 : index
    %c0_84 = arith.constant 0 : index
    %157 = vector.load %arg13[%c1_82, %c0_83, %c0_84] : memref<8x8x512xf32, #tpu.memory_space<vmem>>, vector<1x8x512xf32>
    %158 = vector.shape_cast %157 : vector<1x8x512xf32> to vector<8x512xf32>
    %159 = arith.addf %156, %158 : vector<8x512xf32>
    %160 = vector.extract_strided_slice %159 {offsets = [0, 0], sizes = [8, 128], strides = [1, 1]} : vector<8x512xf32> to vector<8x128xf32>
    %161 = arith.negf %160 : vector<8x128xf32>
    %162 = math.exp %161 : vector<8x128xf32>
    %cst_85 = arith.constant 1.000000e+00 : f32
    %163 = vector.broadcast %cst_85 : f32 to vector<8x128xf32>
    %164 = arith.addf %163, %162 : vector<8x128xf32>
    %165 = arith.divf %163, %164 : vector<8x128xf32>
    %166 = vector.extract_strided_slice %159 {offsets = [0, 128], sizes = [8, 128], strides = [1, 1]} : vector<8x512xf32> to vector<8x128xf32>
    %167 = arith.negf %166 : vector<8x128xf32>
    %168 = math.exp %167 : vector<8x128xf32>
    %cst_86 = arith.constant 1.000000e+00 : f32
    %169 = vector.broadcast %cst_86 : f32 to vector<8x128xf32>
    %170 = arith.addf %169, %168 : vector<8x128xf32>
    %171 = arith.divf %169, %170 : vector<8x128xf32>
    %172 = vector.extract_strided_slice %159 {offsets = [0, 256], sizes = [8, 128], strides = [1, 1]} : vector<8x512xf32> to vector<8x128xf32>
    %173 = math.tanh %172 : vector<8x128xf32>
    %174 = vector.extract_strided_slice %159 {offsets = [0, 384], sizes = [8, 128], strides = [1, 1]} : vector<8x512xf32> to vector<8x128xf32>
    %175 = arith.negf %174 : vector<8x128xf32>
    %176 = math.exp %175 : vector<8x128xf32>
    %cst_87 = arith.constant 1.000000e+00 : f32
    %177 = vector.broadcast %cst_87 : f32 to vector<8x128xf32>
    %178 = arith.addf %177, %176 : vector<8x128xf32>
    %179 = arith.divf %177, %178 : vector<8x128xf32>
    %180 = arith.mulf %171, %149 : vector<8x128xf32>
    %181 = arith.mulf %165, %173 : vector<8x128xf32>
    %182 = arith.addf %180, %181 : vector<8x128xf32>
    %183 = math.tanh %182 : vector<8x128xf32>
    %184 = arith.mulf %179, %183 : vector<8x128xf32>
    %c1_88 = arith.constant 1 : index
    %c0_89 = arith.constant 0 : index
    %c0_90 = arith.constant 0 : index
    %185 = vector.load %arg14[%c1_88, %c0_89, %c0_90] : memref<8x8x128xf32, #tpu.memory_space<vmem>>, vector<1x8x128xf32>
    %186 = vector.shape_cast %185 : vector<1x8x128xf32> to vector<8x128xf32>
    %187 = vector.shape_cast %184 : vector<8x128xf32> to vector<1x8x128xf32>
    tpu.vector_store %arg14[%c1_88, %c0_89, %c0_90], %187 {strides = array<i32>} : memref<8x8x128xf32, #tpu.memory_space<vmem>>, vector<1x8x128xf32>,
    %c0_91 = arith.constant 0 : index
    %c0_92 = arith.constant 0 : index
    %188 = vector.load %arg3[%c0_91, %c0_92] : memref<128x512xf32, #tpu.memory_space<vmem>>, vector<128x512xf32>
    %cst_93 = arith.constant dense<0.000000e+00> : vector<8x512xf32>
    %189 = tpu.matmul %184, %188, %cst_93 {dimension_numbers = #tpu.dot_dimension_numbers<[1], [0], [0], [1], [0, 0, 1, 1], [], []>} : vector<8x128xf32>, vector<128x512xf32>, vector<8x512xf32> -> vector<8x512xf32>
    %c2_94 = arith.constant 2 : index
    %c0_95 = arith.constant 0 : index
    %c0_96 = arith.constant 0 : index
    %190 = vector.load %arg13[%c2_94, %c0_95, %c0_96] : memref<8x8x512xf32, #tpu.memory_space<vmem>>, vector<1x8x512xf32>
    %191 = vector.shape_cast %190 : vector<1x8x512xf32> to vector<8x512xf32>
    %192 = arith.addf %189, %191 : vector<8x512xf32>
    %193 = vector.extract_strided_slice %192 {offsets = [0, 0], sizes = [8, 128], strides = [1, 1]} : vector<8x512xf32> to vector<8x128xf32>
    %194 = arith.negf %193 : vector<8x128xf32>
    %195 = math.exp %194 : vector<8x128xf32>
    %cst_97 = arith.constant 1.000000e+00 : f32
    %196 = vector.broadcast %cst_97 : f32 to vector<8x128xf32>
    %197 = arith.addf %196, %195 : vector<8x128xf32>
    %198 = arith.divf %196, %197 : vector<8x128xf32>
    %199 = vector.extract_strided_slice %192 {offsets = [0, 128], sizes = [8, 128], strides = [1, 1]} : vector<8x512xf32> to vector<8x128xf32>
    %200 = arith.negf %199 : vector<8x128xf32>
    %201 = math.exp %200 : vector<8x128xf32>
    %cst_98 = arith.constant 1.000000e+00 : f32
    %202 = vector.broadcast %cst_98 : f32 to vector<8x128xf32>
    %203 = arith.addf %202, %201 : vector<8x128xf32>
    %204 = arith.divf %202, %203 : vector<8x128xf32>
    %205 = vector.extract_strided_slice %192 {offsets = [0, 256], sizes = [8, 128], strides = [1, 1]} : vector<8x512xf32> to vector<8x128xf32>
    %206 = math.tanh %205 : vector<8x128xf32>
    %207 = vector.extract_strided_slice %192 {offsets = [0, 384], sizes = [8, 128], strides = [1, 1]} : vector<8x512xf32> to vector<8x128xf32>
    %208 = arith.negf %207 : vector<8x128xf32>
    %209 = math.exp %208 : vector<8x128xf32>
    %cst_99 = arith.constant 1.000000e+00 : f32
    %210 = vector.broadcast %cst_99 : f32 to vector<8x128xf32>
    %211 = arith.addf %210, %209 : vector<8x128xf32>
    %212 = arith.divf %210, %211 : vector<8x128xf32>
    %213 = arith.mulf %204, %182 : vector<8x128xf32>
    %214 = arith.mulf %198, %206 : vector<8x128xf32>
    %215 = arith.addf %213, %214 : vector<8x128xf32>
    %216 = math.tanh %215 : vector<8x128xf32>
    %217 = arith.mulf %212, %216 : vector<8x128xf32>
    %c2_100 = arith.constant 2 : index
    %c0_101 = arith.constant 0 : index
    %c0_102 = arith.constant 0 : index
    %218 = vector.load %arg14[%c2_100, %c0_101, %c0_102] : memref<8x8x128xf32, #tpu.memory_space<vmem>>, vector<1x8x128xf32>
    %219 = vector.shape_cast %218 : vector<1x8x128xf32> to vector<8x128xf32>
    %220 = vector.shape_cast %217 : vector<8x128xf32> to vector<1x8x128xf32>
    tpu.vector_store %arg14[%c2_100, %c0_101, %c0_102], %220 {strides = array<i32>} : memref<8x8x128xf32, #tpu.memory_space<vmem>>, vector<1x8x128xf32>,
    %c0_103 = arith.constant 0 : index
    %c0_104 = arith.constant 0 : index
    %221 = vector.load %arg3[%c0_103, %c0_104] : memref<128x512xf32, #tpu.memory_space<vmem>>, vector<128x512xf32>
    %cst_105 = arith.constant dense<0.000000e+00> : vector<8x512xf32>
    %222 = tpu.matmul %217, %221, %cst_105 {dimension_numbers = #tpu.dot_dimension_numbers<[1], [0], [0], [1], [0, 0, 1, 1], [], []>} : vector<8x128xf32>, vector<128x512xf32>, vector<8x512xf32> -> vector<8x512xf32>
    %c3_106 = arith.constant 3 : index
    %c0_107 = arith.constant 0 : index
    %c0_108 = arith.constant 0 : index
    %223 = vector.load %arg13[%c3_106, %c0_107, %c0_108] : memref<8x8x512xf32, #tpu.memory_space<vmem>>, vector<1x8x512xf32>
    %224 = vector.shape_cast %223 : vector<1x8x512xf32> to vector<8x512xf32>
    %225 = arith.addf %222, %224 : vector<8x512xf32>
    %226 = vector.extract_strided_slice %225 {offsets = [0, 0], sizes = [8, 128], strides = [1, 1]} : vector<8x512xf32> to vector<8x128xf32>
    %227 = arith.negf %226 : vector<8x128xf32>
    %228 = math.exp %227 : vector<8x128xf32>
    %cst_109 = arith.constant 1.000000e+00 : f32
    %229 = vector.broadcast %cst_109 : f32 to vector<8x128xf32>
    %230 = arith.addf %229, %228 : vector<8x128xf32>
    %231 = arith.divf %229, %230 : vector<8x128xf32>
    %232 = vector.extract_strided_slice %225 {offsets = [0, 128], sizes = [8, 128], strides = [1, 1]} : vector<8x512xf32> to vector<8x128xf32>
    %233 = arith.negf %232 : vector<8x128xf32>
    %234 = math.exp %233 : vector<8x128xf32>
    %cst_110 = arith.constant 1.000000e+00 : f32
    %235 = vector.broadcast %cst_110 : f32 to vector<8x128xf32>
    %236 = arith.addf %235, %234 : vector<8x128xf32>
    %237 = arith.divf %235, %236 : vector<8x128xf32>
    %238 = vector.extract_strided_slice %225 {offsets = [0, 256], sizes = [8, 128], strides = [1, 1]} : vector<8x512xf32> to vector<8x128xf32>
    %239 = math.tanh %238 : vector<8x128xf32>
    %240 = vector.extract_strided_slice %225 {offsets = [0, 384], sizes = [8, 128], strides = [1, 1]} : vector<8x512xf32> to vector<8x128xf32>
    %241 = arith.negf %240 : vector<8x128xf32>
    %242 = math.exp %241 : vector<8x128xf32>
    %cst_111 = arith.constant 1.000000e+00 : f32
    %243 = vector.broadcast %cst_111 : f32 to vector<8x128xf32>
    %244 = arith.addf %243, %242 : vector<8x128xf32>
    %245 = arith.divf %243, %244 : vector<8x128xf32>
    %246 = arith.mulf %237, %215 : vector<8x128xf32>
    %247 = arith.mulf %231, %239 : vector<8x128xf32>
    %248 = arith.addf %246, %247 : vector<8x128xf32>
    %249 = math.tanh %248 : vector<8x128xf32>
    %250 = arith.mulf %245, %249 : vector<8x128xf32>
    %c3_112 = arith.constant 3 : index
    %c0_113 = arith.constant 0 : index
    %c0_114 = arith.constant 0 : index
    %251 = vector.load %arg14[%c3_112, %c0_113, %c0_114] : memref<8x8x128xf32, #tpu.memory_space<vmem>>, vector<1x8x128xf32>
    %252 = vector.shape_cast %251 : vector<1x8x128xf32> to vector<8x128xf32>
    %253 = vector.shape_cast %250 : vector<8x128xf32> to vector<1x8x128xf32>
    tpu.vector_store %arg14[%c3_112, %c0_113, %c0_114], %253 {strides = array<i32>} : memref<8x8x128xf32, #tpu.memory_space<vmem>>, vector<1x8x128xf32>,
    %c0_115 = arith.constant 0 : index
    %c0_116 = arith.constant 0 : index
    %254 = vector.load %arg3[%c0_115, %c0_116] : memref<128x512xf32, #tpu.memory_space<vmem>>, vector<128x512xf32>
    %cst_117 = arith.constant dense<0.000000e+00> : vector<8x512xf32>
    %255 = tpu.matmul %250, %254, %cst_117 {dimension_numbers = #tpu.dot_dimension_numbers<[1], [0], [0], [1], [0, 0, 1, 1], [], []>} : vector<8x128xf32>, vector<128x512xf32>, vector<8x512xf32> -> vector<8x512xf32>
    %c4_118 = arith.constant 4 : index
    %c0_119 = arith.constant 0 : index
    %c0_120 = arith.constant 0 : index
    %256 = vector.load %arg13[%c4_118, %c0_119, %c0_120] : memref<8x8x512xf32, #tpu.memory_space<vmem>>, vector<1x8x512xf32>
    %257 = vector.shape_cast %256 : vector<1x8x512xf32> to vector<8x512xf32>
    %258 = arith.addf %255, %257 : vector<8x512xf32>
    %259 = vector.extract_strided_slice %258 {offsets = [0, 0], sizes = [8, 128], strides = [1, 1]} : vector<8x512xf32> to vector<8x128xf32>
    %260 = arith.negf %259 : vector<8x128xf32>
    %261 = math.exp %260 : vector<8x128xf32>
    %cst_121 = arith.constant 1.000000e+00 : f32
    %262 = vector.broadcast %cst_121 : f32 to vector<8x128xf32>
    %263 = arith.addf %262, %261 : vector<8x128xf32>
    %264 = arith.divf %262, %263 : vector<8x128xf32>
    %265 = vector.extract_strided_slice %258 {offsets = [0, 128], sizes = [8, 128], strides = [1, 1]} : vector<8x512xf32> to vector<8x128xf32>
    %266 = arith.negf %265 : vector<8x128xf32>
    %267 = math.exp %266 : vector<8x128xf32>
    %cst_122 = arith.constant 1.000000e+00 : f32
    %268 = vector.broadcast %cst_122 : f32 to vector<8x128xf32>
    %269 = arith.addf %268, %267 : vector<8x128xf32>
    %270 = arith.divf %268, %269 : vector<8x128xf32>
    %271 = vector.extract_strided_slice %258 {offsets = [0, 256], sizes = [8, 128], strides = [1, 1]} : vector<8x512xf32> to vector<8x128xf32>
    %272 = math.tanh %271 : vector<8x128xf32>
    %273 = vector.extract_strided_slice %258 {offsets = [0, 384], sizes = [8, 128], strides = [1, 1]} : vector<8x512xf32> to vector<8x128xf32>
    %274 = arith.negf %273 : vector<8x128xf32>
    %275 = math.exp %274 : vector<8x128xf32>
    %cst_123 = arith.constant 1.000000e+00 : f32
    %276 = vector.broadcast %cst_123 : f32 to vector<8x128xf32>
    %277 = arith.addf %276, %275 : vector<8x128xf32>
    %278 = arith.divf %276, %277 : vector<8x128xf32>
    %279 = arith.mulf %270, %248 : vector<8x128xf32>
    %280 = arith.mulf %264, %272 : vector<8x128xf32>
    %281 = arith.addf %279, %280 : vector<8x128xf32>
    %282 = math.tanh %281 : vector<8x128xf32>
    %283 = arith.mulf %278, %282 : vector<8x128xf32>
    %c4_124 = arith.constant 4 : index
    %c0_125 = arith.constant 0 : index
    %c0_126 = arith.constant 0 : index
    %284 = vector.load %arg14[%c4_124, %c0_125, %c0_126] : memref<8x8x128xf32, #tpu.memory_space<vmem>>, vector<1x8x128xf32>
    %285 = vector.shape_cast %284 : vector<1x8x128xf32> to vector<8x128xf32>
    %286 = vector.shape_cast %283 : vector<8x128xf32> to vector<1x8x128xf32>
    tpu.vector_store %arg14[%c4_124, %c0_125, %c0_126], %286 {strides = array<i32>} : memref<8x8x128xf32, #tpu.memory_space<vmem>>, vector<1x8x128xf32>,
    %c0_127 = arith.constant 0 : index
    %c0_128 = arith.constant 0 : index
    %287 = vector.load %arg3[%c0_127, %c0_128] : memref<128x512xf32, #tpu.memory_space<vmem>>, vector<128x512xf32>
    %cst_129 = arith.constant dense<0.000000e+00> : vector<8x512xf32>
    %288 = tpu.matmul %283, %287, %cst_129 {dimension_numbers = #tpu.dot_dimension_numbers<[1], [0], [0], [1], [0, 0, 1, 1], [], []>} : vector<8x128xf32>, vector<128x512xf32>, vector<8x512xf32> -> vector<8x512xf32>
    %c5_130 = arith.constant 5 : index
    %c0_131 = arith.constant 0 : index
    %c0_132 = arith.constant 0 : index
    %289 = vector.load %arg13[%c5_130, %c0_131, %c0_132] : memref<8x8x512xf32, #tpu.memory_space<vmem>>, vector<1x8x512xf32>
    %290 = vector.shape_cast %289 : vector<1x8x512xf32> to vector<8x512xf32>
    %291 = arith.addf %288, %290 : vector<8x512xf32>
    %292 = vector.extract_strided_slice %291 {offsets = [0, 0], sizes = [8, 128], strides = [1, 1]} : vector<8x512xf32> to vector<8x128xf32>
    %293 = arith.negf %292 : vector<8x128xf32>
    %294 = math.exp %293 : vector<8x128xf32>
    %cst_133 = arith.constant 1.000000e+00 : f32
    %295 = vector.broadcast %cst_133 : f32 to vector<8x128xf32>
    %296 = arith.addf %295, %294 : vector<8x128xf32>
    %297 = arith.divf %295, %296 : vector<8x128xf32>
    %298 = vector.extract_strided_slice %291 {offsets = [0, 128], sizes = [8, 128], strides = [1, 1]} : vector<8x512xf32> to vector<8x128xf32>
    %299 = arith.negf %298 : vector<8x128xf32>
    %300 = math.exp %299 : vector<8x128xf32>
    %cst_134 = arith.constant 1.000000e+00 : f32
    %301 = vector.broadcast %cst_134 : f32 to vector<8x128xf32>
    %302 = arith.addf %301, %300 : vector<8x128xf32>
    %303 = arith.divf %301, %302 : vector<8x128xf32>
    %304 = vector.extract_strided_slice %291 {offsets = [0, 256], sizes = [8, 128], strides = [1, 1]} : vector<8x512xf32> to vector<8x128xf32>
    %305 = math.tanh %304 : vector<8x128xf32>
    %306 = vector.extract_strided_slice %291 {offsets = [0, 384], sizes = [8, 128], strides = [1, 1]} : vector<8x512xf32> to vector<8x128xf32>
    %307 = arith.negf %306 : vector<8x128xf32>
    %308 = math.exp %307 : vector<8x128xf32>
    %cst_135 = arith.constant 1.000000e+00 : f32
    %309 = vector.broadcast %cst_135 : f32 to vector<8x128xf32>
    %310 = arith.addf %309, %308 : vector<8x128xf32>
    %311 = arith.divf %309, %310 : vector<8x128xf32>
    %312 = arith.mulf %303, %281 : vector<8x128xf32>
    %313 = arith.mulf %297, %305 : vector<8x128xf32>
    %314 = arith.addf %312, %313 : vector<8x128xf32>
    %315 = math.tanh %314 : vector<8x128xf32>
    %316 = arith.mulf %311, %315 : vector<8x128xf32>
    %c5_136 = arith.constant 5 : index
    %c0_137 = arith.constant 0 : index
    %c0_138 = arith.constant 0 : index
    %317 = vector.load %arg14[%c5_136, %c0_137, %c0_138] : memref<8x8x128xf32, #tpu.memory_space<vmem>>, vector<1x8x128xf32>
    %318 = vector.shape_cast %317 : vector<1x8x128xf32> to vector<8x128xf32>
    %319 = vector.shape_cast %316 : vector<8x128xf32> to vector<1x8x128xf32>
    tpu.vector_store %arg14[%c5_136, %c0_137, %c0_138], %319 {strides = array<i32>} : memref<8x8x128xf32, #tpu.memory_space<vmem>>, vector<1x8x128xf32>,
    %c0_139 = arith.constant 0 : index
    %c0_140 = arith.constant 0 : index
    %320 = vector.load %arg3[%c0_139, %c0_140] : memref<128x512xf32, #tpu.memory_space<vmem>>, vector<128x512xf32>
    %cst_141 = arith.constant dense<0.000000e+00> : vector<8x512xf32>
    %321 = tpu.matmul %316, %320, %cst_141 {dimension_numbers = #tpu.dot_dimension_numbers<[1], [0], [0], [1], [0, 0, 1, 1], [], []>} : vector<8x128xf32>, vector<128x512xf32>, vector<8x512xf32> -> vector<8x512xf32>
    %c6_142 = arith.constant 6 : index
    %c0_143 = arith.constant 0 : index
    %c0_144 = arith.constant 0 : index
    %322 = vector.load %arg13[%c6_142, %c0_143, %c0_144] : memref<8x8x512xf32, #tpu.memory_space<vmem>>, vector<1x8x512xf32>
    %323 = vector.shape_cast %322 : vector<1x8x512xf32> to vector<8x512xf32>
    %324 = arith.addf %321, %323 : vector<8x512xf32>
    %325 = vector.extract_strided_slice %324 {offsets = [0, 0], sizes = [8, 128], strides = [1, 1]} : vector<8x512xf32> to vector<8x128xf32>
    %326 = arith.negf %325 : vector<8x128xf32>
    %327 = math.exp %326 : vector<8x128xf32>
    %cst_145 = arith.constant 1.000000e+00 : f32
    %328 = vector.broadcast %cst_145 : f32 to vector<8x128xf32>
    %329 = arith.addf %328, %327 : vector<8x128xf32>
    %330 = arith.divf %328, %329 : vector<8x128xf32>
    %331 = vector.extract_strided_slice %324 {offsets = [0, 128], sizes = [8, 128], strides = [1, 1]} : vector<8x512xf32> to vector<8x128xf32>
    %332 = arith.negf %331 : vector<8x128xf32>
    %333 = math.exp %332 : vector<8x128xf32>
    %cst_146 = arith.constant 1.000000e+00 : f32
    %334 = vector.broadcast %cst_146 : f32 to vector<8x128xf32>
    %335 = arith.addf %334, %333 : vector<8x128xf32>
    %336 = arith.divf %334, %335 : vector<8x128xf32>
    %337 = vector.extract_strided_slice %324 {offsets = [0, 256], sizes = [8, 128], strides = [1, 1]} : vector<8x512xf32> to vector<8x128xf32>
    %338 = math.tanh %337 : vector<8x128xf32>
    %339 = vector.extract_strided_slice %324 {offsets = [0, 384], sizes = [8, 128], strides = [1, 1]} : vector<8x512xf32> to vector<8x128xf32>
    %340 = arith.negf %339 : vector<8x128xf32>
    %341 = math.exp %340 : vector<8x128xf32>
    %cst_147 = arith.constant 1.000000e+00 : f32
    %342 = vector.broadcast %cst_147 : f32 to vector<8x128xf32>
    %343 = arith.addf %342, %341 : vector<8x128xf32>
    %344 = arith.divf %342, %343 : vector<8x128xf32>
    %345 = arith.mulf %336, %314 : vector<8x128xf32>
    %346 = arith.mulf %330, %338 : vector<8x128xf32>
    %347 = arith.addf %345, %346 : vector<8x128xf32>
    %348 = math.tanh %347 : vector<8x128xf32>
    %349 = arith.mulf %344, %348 : vector<8x128xf32>
    %c6_148 = arith.constant 6 : index
    %c0_149 = arith.constant 0 : index
    %c0_150 = arith.constant 0 : index
    %350 = vector.load %arg14[%c6_148, %c0_149, %c0_150] : memref<8x8x128xf32, #tpu.memory_space<vmem>>, vector<1x8x128xf32>
    %351 = vector.shape_cast %350 : vector<1x8x128xf32> to vector<8x128xf32>
    %352 = vector.shape_cast %349 : vector<8x128xf32> to vector<1x8x128xf32>
    tpu.vector_store %arg14[%c6_148, %c0_149, %c0_150], %352 {strides = array<i32>} : memref<8x8x128xf32, #tpu.memory_space<vmem>>, vector<1x8x128xf32>,
    %c0_151 = arith.constant 0 : index
    %c0_152 = arith.constant 0 : index
    %353 = vector.load %arg3[%c0_151, %c0_152] : memref<128x512xf32, #tpu.memory_space<vmem>>, vector<128x512xf32>
    %cst_153 = arith.constant dense<0.000000e+00> : vector<8x512xf32>
    %354 = tpu.matmul %349, %353, %cst_153 {dimension_numbers = #tpu.dot_dimension_numbers<[1], [0], [0], [1], [0, 0, 1, 1], [], []>} : vector<8x128xf32>, vector<128x512xf32>, vector<8x512xf32> -> vector<8x512xf32>
    %c7_154 = arith.constant 7 : index
    %c0_155 = arith.constant 0 : index
    %c0_156 = arith.constant 0 : index
    %355 = vector.load %arg13[%c7_154, %c0_155, %c0_156] : memref<8x8x512xf32, #tpu.memory_space<vmem>>, vector<1x8x512xf32>
    %356 = vector.shape_cast %355 : vector<1x8x512xf32> to vector<8x512xf32>
    %357 = arith.addf %354, %356 : vector<8x512xf32>
    %358 = vector.extract_strided_slice %357 {offsets = [0, 0], sizes = [8, 128], strides = [1, 1]} : vector<8x512xf32> to vector<8x128xf32>
    %359 = arith.negf %358 : vector<8x128xf32>
    %360 = math.exp %359 : vector<8x128xf32>
    %cst_157 = arith.constant 1.000000e+00 : f32
    %361 = vector.broadcast %cst_157 : f32 to vector<8x128xf32>
    %362 = arith.addf %361, %360 : vector<8x128xf32>
    %363 = arith.divf %361, %362 : vector<8x128xf32>
    %364 = vector.extract_strided_slice %357 {offsets = [0, 128], sizes = [8, 128], strides = [1, 1]} : vector<8x512xf32> to vector<8x128xf32>
    %365 = arith.negf %364 : vector<8x128xf32>
    %366 = math.exp %365 : vector<8x128xf32>
    %cst_158 = arith.constant 1.000000e+00 : f32
    %367 = vector.broadcast %cst_158 : f32 to vector<8x128xf32>
    %368 = arith.addf %367, %366 : vector<8x128xf32>
    %369 = arith.divf %367, %368 : vector<8x128xf32>
    %370 = vector.extract_strided_slice %357 {offsets = [0, 256], sizes = [8, 128], strides = [1, 1]} : vector<8x512xf32> to vector<8x128xf32>
    %371 = math.tanh %370 : vector<8x128xf32>
    %372 = vector.extract_strided_slice %357 {offsets = [0, 384], sizes = [8, 128], strides = [1, 1]} : vector<8x512xf32> to vector<8x128xf32>
    %373 = arith.negf %372 : vector<8x128xf32>
    %374 = math.exp %373 : vector<8x128xf32>
    %cst_159 = arith.constant 1.000000e+00 : f32
    %375 = vector.broadcast %cst_159 : f32 to vector<8x128xf32>
    %376 = arith.addf %375, %374 : vector<8x128xf32>
    %377 = arith.divf %375, %376 : vector<8x128xf32>
    %378 = arith.mulf %369, %347 : vector<8x128xf32>
    %379 = arith.mulf %363, %371 : vector<8x128xf32>
    %380 = arith.addf %378, %379 : vector<8x128xf32>
    %381 = math.tanh %380 : vector<8x128xf32>
    %382 = arith.mulf %377, %381 : vector<8x128xf32>
    %c7_160 = arith.constant 7 : index
    %c0_161 = arith.constant 0 : index
    %c0_162 = arith.constant 0 : index
    %383 = vector.load %arg14[%c7_160, %c0_161, %c0_162] : memref<8x8x128xf32, #tpu.memory_space<vmem>>, vector<1x8x128xf32>
    %384 = vector.shape_cast %383 : vector<1x8x128xf32> to vector<8x128xf32>
    %385 = vector.shape_cast %382 : vector<8x128xf32> to vector<1x8x128xf32>
    tpu.vector_store %arg14[%c7_160, %c0_161, %c0_162], %385 {strides = array<i32>} : memref<8x8x128xf32, #tpu.memory_space<vmem>>, vector<1x8x128xf32>,
    %c0_163 = arith.constant 0 : index
    %c0_164 = arith.constant 0 : index
    %386 = vector.load %arg8[%c0_163, %c0_164] : memref<1x512xf32, #tpu.memory_space<vmem>>, vector<1x512xf32>
    %c0_165 = arith.constant 0 : index
    %c0_166 = arith.constant 0 : index
    %c0_167 = arith.constant 0 : index
    %387 = vector.load %arg14[%c0_165, %c0_166, %c0_167] : memref<8x8x128xf32, #tpu.memory_space<vmem>>, vector<8x8x128xf32>
    %388 = vector.shape_cast %387 : vector<8x8x128xf32> to vector<64x128xf32>
    %c0_168 = arith.constant 0 : index
    %c0_169 = arith.constant 0 : index
    %389 = vector.load %arg5[%c0_168, %c0_169] : memref<128x512xf32, #tpu.memory_space<vmem>>, vector<128x512xf32>
    %cst_170 = arith.constant dense<0.000000e+00> : vector<64x512xf32>
    %390 = tpu.matmul %388, %389, %cst_170 {dimension_numbers = #tpu.dot_dimension_numbers<[1], [0], [0], [1], [0, 0, 1, 1], [], []>} : vector<64x128xf32>, vector<128x512xf32>, vector<64x512xf32> -> vector<64x512xf32>
    %c0_171 = arith.constant 0 : index
    %c0_172 = arith.constant 0 : index
    %391 = vector.load %arg6[%c0_171, %c0_172] : memref<128x512xf32, #tpu.memory_space<vmem>>, vector<128x512xf32>
    %cst_173 = arith.constant dense<0.000000e+00> : vector<64x512xf32>
    %392 = tpu.matmul %388, %391, %cst_173 {dimension_numbers = #tpu.dot_dimension_numbers<[1], [0], [0], [1], [0, 0, 1, 1], [], []>} : vector<64x128xf32>, vector<128x512xf32>, vector<64x512xf32> -> vector<64x512xf32>
    %393 = vector.extract_strided_slice %390 {offsets = [0, 0], sizes = [8, 512], strides = [1, 1]} : vector<64x512xf32> to vector<8x512xf32>
    %394 = vector.extract_strided_slice %392 {offsets = [56, 0], sizes = [8, 512], strides = [1, 1]} : vector<64x512xf32> to vector<8x512xf32>
    %395 = arith.addf %393, %394 : vector<8x512xf32>
    %396 = vector.broadcast %386 : vector<1x512xf32> to vector<8x512xf32>
    %397 = arith.addf %395, %396 : vector<8x512xf32>
    %c0_174 = arith.constant 0 : index
    %c0_175 = arith.constant 0 : index
    %c0_176 = arith.constant 0 : index
    %398 = vector.load %arg13[%c0_174, %c0_175, %c0_176] : memref<8x8x512xf32, #tpu.memory_space<vmem>>, vector<1x8x512xf32>
    %399 = vector.shape_cast %398 : vector<1x8x512xf32> to vector<8x512xf32>
    %400 = vector.shape_cast %397 : vector<8x512xf32> to vector<1x8x512xf32>
    tpu.vector_store %arg13[%c0_174, %c0_175, %c0_176], %400 {strides = array<i32>} : memref<8x8x512xf32, #tpu.memory_space<vmem>>, vector<1x8x512xf32>,
    %401 = vector.extract_strided_slice %390 {offsets = [8, 0], sizes = [8, 512], strides = [1, 1]} : vector<64x512xf32> to vector<8x512xf32>
    %402 = vector.extract_strided_slice %392 {offsets = [48, 0], sizes = [8, 512], strides = [1, 1]} : vector<64x512xf32> to vector<8x512xf32>
    %403 = arith.addf %401, %402 : vector<8x512xf32>
    %404 = vector.broadcast %386 : vector<1x512xf32> to vector<8x512xf32>
    %405 = arith.addf %403, %404 : vector<8x512xf32>
    %c1_177 = arith.constant 1 : index
    %c0_178 = arith.constant 0 : index
    %c0_179 = arith.constant 0 : index
    %406 = vector.load %arg13[%c1_177, %c0_178, %c0_179] : memref<8x8x512xf32, #tpu.memory_space<vmem>>, vector<1x8x512xf32>
    %407 = vector.shape_cast %406 : vector<1x8x512xf32> to vector<8x512xf32>
    %408 = vector.shape_cast %405 : vector<8x512xf32> to vector<1x8x512xf32>
    tpu.vector_store %arg13[%c1_177, %c0_178, %c0_179], %408 {strides = array<i32>} : memref<8x8x512xf32, #tpu.memory_space<vmem>>, vector<1x8x512xf32>,
    %409 = vector.extract_strided_slice %390 {offsets = [16, 0], sizes = [8, 512], strides = [1, 1]} : vector<64x512xf32> to vector<8x512xf32>
    %410 = vector.extract_strided_slice %392 {offsets = [40, 0], sizes = [8, 512], strides = [1, 1]} : vector<64x512xf32> to vector<8x512xf32>
    %411 = arith.addf %409, %410 : vector<8x512xf32>
    %412 = vector.broadcast %386 : vector<1x512xf32> to vector<8x512xf32>
    %413 = arith.addf %411, %412 : vector<8x512xf32>
    %c2_180 = arith.constant 2 : index
    %c0_181 = arith.constant 0 : index
    %c0_182 = arith.constant 0 : index
    %414 = vector.load %arg13[%c2_180, %c0_181, %c0_182] : memref<8x8x512xf32, #tpu.memory_space<vmem>>, vector<1x8x512xf32>
    %415 = vector.shape_cast %414 : vector<1x8x512xf32> to vector<8x512xf32>
    %416 = vector.shape_cast %413 : vector<8x512xf32> to vector<1x8x512xf32>
    tpu.vector_store %arg13[%c2_180, %c0_181, %c0_182], %416 {strides = array<i32>} : memref<8x8x512xf32, #tpu.memory_space<vmem>>, vector<1x8x512xf32>,
    %417 = vector.extract_strided_slice %390 {offsets = [24, 0], sizes = [8, 512], strides = [1, 1]} : vector<64x512xf32> to vector<8x512xf32>
    %418 = vector.extract_strided_slice %392 {offsets = [32, 0], sizes = [8, 512], strides = [1, 1]} : vector<64x512xf32> to vector<8x512xf32>
    %419 = arith.addf %417, %418 : vector<8x512xf32>
    %420 = vector.broadcast %386 : vector<1x512xf32> to vector<8x512xf32>
    %421 = arith.addf %419, %420 : vector<8x512xf32>
    %c3_183 = arith.constant 3 : index
    %c0_184 = arith.constant 0 : index
    %c0_185 = arith.constant 0 : index
    %422 = vector.load %arg13[%c3_183, %c0_184, %c0_185] : memref<8x8x512xf32, #tpu.memory_space<vmem>>, vector<1x8x512xf32>
    %423 = vector.shape_cast %422 : vector<1x8x512xf32> to vector<8x512xf32>
    %424 = vector.shape_cast %421 : vector<8x512xf32> to vector<1x8x512xf32>
    tpu.vector_store %arg13[%c3_183, %c0_184, %c0_185], %424 {strides = array<i32>} : memref<8x8x512xf32, #tpu.memory_space<vmem>>, vector<1x8x512xf32>,
    %425 = vector.extract_strided_slice %390 {offsets = [32, 0], sizes = [8, 512], strides = [1, 1]} : vector<64x512xf32> to vector<8x512xf32>
    %426 = vector.extract_strided_slice %392 {offsets = [24, 0], sizes = [8, 512], strides = [1, 1]} : vector<64x512xf32> to vector<8x512xf32>
    %427 = arith.addf %425, %426 : vector<8x512xf32>
    %428 = vector.broadcast %386 : vector<1x512xf32> to vector<8x512xf32>
    %429 = arith.addf %427, %428 : vector<8x512xf32>
    %c4_186 = arith.constant 4 : index
    %c0_187 = arith.constant 0 : index
    %c0_188 = arith.constant 0 : index
    %430 = vector.load %arg13[%c4_186, %c0_187, %c0_188] : memref<8x8x512xf32, #tpu.memory_space<vmem>>, vector<1x8x512xf32>
    %431 = vector.shape_cast %430 : vector<1x8x512xf32> to vector<8x512xf32>
    %432 = vector.shape_cast %429 : vector<8x512xf32> to vector<1x8x512xf32>
    tpu.vector_store %arg13[%c4_186, %c0_187, %c0_188], %432 {strides = array<i32>} : memref<8x8x512xf32, #tpu.memory_space<vmem>>, vector<1x8x512xf32>,
    %433 = vector.extract_strided_slice %390 {offsets = [40, 0], sizes = [8, 512], strides = [1, 1]} : vector<64x512xf32> to vector<8x512xf32>
    %434 = vector.extract_strided_slice %392 {offsets = [16, 0], sizes = [8, 512], strides = [1, 1]} : vector<64x512xf32> to vector<8x512xf32>
    %435 = arith.addf %433, %434 : vector<8x512xf32>
    %436 = vector.broadcast %386 : vector<1x512xf32> to vector<8x512xf32>
    %437 = arith.addf %435, %436 : vector<8x512xf32>
    %c5_189 = arith.constant 5 : index
    %c0_190 = arith.constant 0 : index
    %c0_191 = arith.constant 0 : index
    %438 = vector.load %arg13[%c5_189, %c0_190, %c0_191] : memref<8x8x512xf32, #tpu.memory_space<vmem>>, vector<1x8x512xf32>
    %439 = vector.shape_cast %438 : vector<1x8x512xf32> to vector<8x512xf32>
    %440 = vector.shape_cast %437 : vector<8x512xf32> to vector<1x8x512xf32>
    tpu.vector_store %arg13[%c5_189, %c0_190, %c0_191], %440 {strides = array<i32>} : memref<8x8x512xf32, #tpu.memory_space<vmem>>, vector<1x8x512xf32>,
    %441 = vector.extract_strided_slice %390 {offsets = [48, 0], sizes = [8, 512], strides = [1, 1]} : vector<64x512xf32> to vector<8x512xf32>
    %442 = vector.extract_strided_slice %392 {offsets = [8, 0], sizes = [8, 512], strides = [1, 1]} : vector<64x512xf32> to vector<8x512xf32>
    %443 = arith.addf %441, %442 : vector<8x512xf32>
    %444 = vector.broadcast %386 : vector<1x512xf32> to vector<8x512xf32>
    %445 = arith.addf %443, %444 : vector<8x512xf32>
    %c6_192 = arith.constant 6 : index
    %c0_193 = arith.constant 0 : index
    %c0_194 = arith.constant 0 : index
    %446 = vector.load %arg13[%c6_192, %c0_193, %c0_194] : memref<8x8x512xf32, #tpu.memory_space<vmem>>, vector<1x8x512xf32>
    %447 = vector.shape_cast %446 : vector<1x8x512xf32> to vector<8x512xf32>
    %448 = vector.shape_cast %445 : vector<8x512xf32> to vector<1x8x512xf32>
    tpu.vector_store %arg13[%c6_192, %c0_193, %c0_194], %448 {strides = array<i32>} : memref<8x8x512xf32, #tpu.memory_space<vmem>>, vector<1x8x512xf32>,
    %449 = vector.extract_strided_slice %390 {offsets = [56, 0], sizes = [8, 512], strides = [1, 1]} : vector<64x512xf32> to vector<8x512xf32>
    %450 = vector.extract_strided_slice %392 {offsets = [0, 0], sizes = [8, 512], strides = [1, 1]} : vector<64x512xf32> to vector<8x512xf32>
    %451 = arith.addf %449, %450 : vector<8x512xf32>
    %452 = vector.broadcast %386 : vector<1x512xf32> to vector<8x512xf32>
    %453 = arith.addf %451, %452 : vector<8x512xf32>
    %c7_195 = arith.constant 7 : index
    %c0_196 = arith.constant 0 : index
    %c0_197 = arith.constant 0 : index
    %454 = vector.load %arg13[%c7_195, %c0_196, %c0_197] : memref<8x8x512xf32, #tpu.memory_space<vmem>>, vector<1x8x512xf32>
    %455 = vector.shape_cast %454 : vector<1x8x512xf32> to vector<8x512xf32>
    %456 = vector.shape_cast %453 : vector<8x512xf32> to vector<1x8x512xf32>
    tpu.vector_store %arg13[%c7_195, %c0_196, %c0_197], %456 {strides = array<i32>} : memref<8x8x512xf32, #tpu.memory_space<vmem>>, vector<1x8x512xf32>,
    %c0_198 = arith.constant 0 : index
    %c0_199 = arith.constant 0 : index
    %c0_200 = arith.constant 0 : index
    %457 = vector.load %arg13[%c0_198, %c0_199, %c0_200] : memref<8x8x512xf32, #tpu.memory_space<vmem>>, vector<1x8x512xf32>
    %458 = vector.shape_cast %457 : vector<1x8x512xf32> to vector<8x512xf32>
    %459 = vector.extract_strided_slice %458 {offsets = [0, 0], sizes = [8, 128], strides = [1, 1]} : vector<8x512xf32> to vector<8x128xf32>
    %460 = arith.negf %459 : vector<8x128xf32>
    %461 = math.exp %460 : vector<8x128xf32>
    %cst_201 = arith.constant 1.000000e+00 : f32
    %462 = vector.broadcast %cst_201 : f32 to vector<8x128xf32>
    %463 = arith.addf %462, %461 : vector<8x128xf32>
    %464 = arith.divf %462, %463 : vector<8x128xf32>
    %465 = vector.extract_strided_slice %458 {offsets = [0, 256], sizes = [8, 128], strides = [1, 1]} : vector<8x512xf32> to vector<8x128xf32>
    %466 = math.tanh %465 : vector<8x128xf32>
    %467 = vector.extract_strided_slice %458 {offsets = [0, 384], sizes = [8, 128], strides = [1, 1]} : vector<8x512xf32> to vector<8x128xf32>
    %468 = arith.negf %467 : vector<8x128xf32>
    %469 = math.exp %468 : vector<8x128xf32>
    %cst_202 = arith.constant 1.000000e+00 : f32
    %470 = vector.broadcast %cst_202 : f32 to vector<8x128xf32>
    %471 = arith.addf %470, %469 : vector<8x128xf32>
    %472 = arith.divf %470, %471 : vector<8x128xf32>
    %473 = arith.mulf %464, %466 : vector<8x128xf32>
    %474 = math.tanh %473 : vector<8x128xf32>
    %475 = arith.mulf %472, %474 : vector<8x128xf32>
    %c0_203 = arith.constant 0 : index
    %c0_204 = arith.constant 0 : index
    %476 = vector.load %arg7[%c0_203, %c0_204] : memref<128x512xf32, #tpu.memory_space<vmem>>, vector<128x512xf32>
    %cst_205 = arith.constant dense<0.000000e+00> : vector<8x512xf32>
    %477 = tpu.matmul %475, %476, %cst_205 {dimension_numbers = #tpu.dot_dimension_numbers<[1], [0], [0], [1], [0, 0, 1, 1], [], []>} : vector<8x128xf32>, vector<128x512xf32>, vector<8x512xf32> -> vector<8x512xf32>
    %c1_206 = arith.constant 1 : index
    %c0_207 = arith.constant 0 : index
    %c0_208 = arith.constant 0 : index
    %478 = vector.load %arg13[%c1_206, %c0_207, %c0_208] : memref<8x8x512xf32, #tpu.memory_space<vmem>>, vector<1x8x512xf32>
    %479 = vector.shape_cast %478 : vector<1x8x512xf32> to vector<8x512xf32>
    %480 = arith.addf %477, %479 : vector<8x512xf32>
    %481 = vector.extract_strided_slice %480 {offsets = [0, 0], sizes = [8, 128], strides = [1, 1]} : vector<8x512xf32> to vector<8x128xf32>
    %482 = arith.negf %481 : vector<8x128xf32>
    %483 = math.exp %482 : vector<8x128xf32>
    %cst_209 = arith.constant 1.000000e+00 : f32
    %484 = vector.broadcast %cst_209 : f32 to vector<8x128xf32>
    %485 = arith.addf %484, %483 : vector<8x128xf32>
    %486 = arith.divf %484, %485 : vector<8x128xf32>
    %487 = vector.extract_strided_slice %480 {offsets = [0, 128], sizes = [8, 128], strides = [1, 1]} : vector<8x512xf32> to vector<8x128xf32>
    %488 = arith.negf %487 : vector<8x128xf32>
    %489 = math.exp %488 : vector<8x128xf32>
    %cst_210 = arith.constant 1.000000e+00 : f32
    %490 = vector.broadcast %cst_210 : f32 to vector<8x128xf32>
    %491 = arith.addf %490, %489 : vector<8x128xf32>
    %492 = arith.divf %490, %491 : vector<8x128xf32>
    %493 = vector.extract_strided_slice %480 {offsets = [0, 256], sizes = [8, 128], strides = [1, 1]} : vector<8x512xf32> to vector<8x128xf32>
    %494 = math.tanh %493 : vector<8x128xf32>
    %495 = vector.extract_strided_slice %480 {offsets = [0, 384], sizes = [8, 128], strides = [1, 1]} : vector<8x512xf32> to vector<8x128xf32>
    %496 = arith.negf %495 : vector<8x128xf32>
    %497 = math.exp %496 : vector<8x128xf32>
    %cst_211 = arith.constant 1.000000e+00 : f32
    %498 = vector.broadcast %cst_211 : f32 to vector<8x128xf32>
    %499 = arith.addf %498, %497 : vector<8x128xf32>
    %500 = arith.divf %498, %499 : vector<8x128xf32>
    %501 = arith.mulf %492, %473 : vector<8x128xf32>
    %502 = arith.mulf %486, %494 : vector<8x128xf32>
    %503 = arith.addf %501, %502 : vector<8x128xf32>
    %504 = math.tanh %503 : vector<8x128xf32>
    %505 = arith.mulf %500, %504 : vector<8x128xf32>
    %c0_212 = arith.constant 0 : index
    %c0_213 = arith.constant 0 : index
    %506 = vector.load %arg7[%c0_212, %c0_213] : memref<128x512xf32, #tpu.memory_space<vmem>>, vector<128x512xf32>
    %cst_214 = arith.constant dense<0.000000e+00> : vector<8x512xf32>
    %507 = tpu.matmul %505, %506, %cst_214 {dimension_numbers = #tpu.dot_dimension_numbers<[1], [0], [0], [1], [0, 0, 1, 1], [], []>} : vector<8x128xf32>, vector<128x512xf32>, vector<8x512xf32> -> vector<8x512xf32>
    %c2_215 = arith.constant 2 : index
    %c0_216 = arith.constant 0 : index
    %c0_217 = arith.constant 0 : index
    %508 = vector.load %arg13[%c2_215, %c0_216, %c0_217] : memref<8x8x512xf32, #tpu.memory_space<vmem>>, vector<1x8x512xf32>
    %509 = vector.shape_cast %508 : vector<1x8x512xf32> to vector<8x512xf32>
    %510 = arith.addf %507, %509 : vector<8x512xf32>
    %511 = vector.extract_strided_slice %510 {offsets = [0, 0], sizes = [8, 128], strides = [1, 1]} : vector<8x512xf32> to vector<8x128xf32>
    %512 = arith.negf %511 : vector<8x128xf32>
    %513 = math.exp %512 : vector<8x128xf32>
    %cst_218 = arith.constant 1.000000e+00 : f32
    %514 = vector.broadcast %cst_218 : f32 to vector<8x128xf32>
    %515 = arith.addf %514, %513 : vector<8x128xf32>
    %516 = arith.divf %514, %515 : vector<8x128xf32>
    %517 = vector.extract_strided_slice %510 {offsets = [0, 128], sizes = [8, 128], strides = [1, 1]} : vector<8x512xf32> to vector<8x128xf32>
    %518 = arith.negf %517 : vector<8x128xf32>
    %519 = math.exp %518 : vector<8x128xf32>
    %cst_219 = arith.constant 1.000000e+00 : f32
    %520 = vector.broadcast %cst_219 : f32 to vector<8x128xf32>
    %521 = arith.addf %520, %519 : vector<8x128xf32>
    %522 = arith.divf %520, %521 : vector<8x128xf32>
    %523 = vector.extract_strided_slice %510 {offsets = [0, 256], sizes = [8, 128], strides = [1, 1]} : vector<8x512xf32> to vector<8x128xf32>
    %524 = math.tanh %523 : vector<8x128xf32>
    %525 = vector.extract_strided_slice %510 {offsets = [0, 384], sizes = [8, 128], strides = [1, 1]} : vector<8x512xf32> to vector<8x128xf32>
    %526 = arith.negf %525 : vector<8x128xf32>
    %527 = math.exp %526 : vector<8x128xf32>
    %cst_220 = arith.constant 1.000000e+00 : f32
    %528 = vector.broadcast %cst_220 : f32 to vector<8x128xf32>
    %529 = arith.addf %528, %527 : vector<8x128xf32>
    %530 = arith.divf %528, %529 : vector<8x128xf32>
    %531 = arith.mulf %522, %503 : vector<8x128xf32>
    %532 = arith.mulf %516, %524 : vector<8x128xf32>
    %533 = arith.addf %531, %532 : vector<8x128xf32>
    %534 = math.tanh %533 : vector<8x128xf32>
    %535 = arith.mulf %530, %534 : vector<8x128xf32>
    %c0_221 = arith.constant 0 : index
    %c0_222 = arith.constant 0 : index
    %536 = vector.load %arg7[%c0_221, %c0_222] : memref<128x512xf32, #tpu.memory_space<vmem>>, vector<128x512xf32>
    %cst_223 = arith.constant dense<0.000000e+00> : vector<8x512xf32>
    %537 = tpu.matmul %535, %536, %cst_223 {dimension_numbers = #tpu.dot_dimension_numbers<[1], [0], [0], [1], [0, 0, 1, 1], [], []>} : vector<8x128xf32>, vector<128x512xf32>, vector<8x512xf32> -> vector<8x512xf32>
    %c3_224 = arith.constant 3 : index
    %c0_225 = arith.constant 0 : index
    %c0_226 = arith.constant 0 : index
    %538 = vector.load %arg13[%c3_224, %c0_225, %c0_226] : memref<8x8x512xf32, #tpu.memory_space<vmem>>, vector<1x8x512xf32>
    %539 = vector.shape_cast %538 : vector<1x8x512xf32> to vector<8x512xf32>
    %540 = arith.addf %537, %539 : vector<8x512xf32>
    %541 = vector.extract_strided_slice %540 {offsets = [0, 0], sizes = [8, 128], strides = [1, 1]} : vector<8x512xf32> to vector<8x128xf32>
    %542 = arith.negf %541 : vector<8x128xf32>
    %543 = math.exp %542 : vector<8x128xf32>
    %cst_227 = arith.constant 1.000000e+00 : f32
    %544 = vector.broadcast %cst_227 : f32 to vector<8x128xf32>
    %545 = arith.addf %544, %543 : vector<8x128xf32>
    %546 = arith.divf %544, %545 : vector<8x128xf32>
    %547 = vector.extract_strided_slice %540 {offsets = [0, 128], sizes = [8, 128], strides = [1, 1]} : vector<8x512xf32> to vector<8x128xf32>
    %548 = arith.negf %547 : vector<8x128xf32>
    %549 = math.exp %548 : vector<8x128xf32>
    %cst_228 = arith.constant 1.000000e+00 : f32
    %550 = vector.broadcast %cst_228 : f32 to vector<8x128xf32>
    %551 = arith.addf %550, %549 : vector<8x128xf32>
    %552 = arith.divf %550, %551 : vector<8x128xf32>
    %553 = vector.extract_strided_slice %540 {offsets = [0, 256], sizes = [8, 128], strides = [1, 1]} : vector<8x512xf32> to vector<8x128xf32>
    %554 = math.tanh %553 : vector<8x128xf32>
    %555 = vector.extract_strided_slice %540 {offsets = [0, 384], sizes = [8, 128], strides = [1, 1]} : vector<8x512xf32> to vector<8x128xf32>
    %556 = arith.negf %555 : vector<8x128xf32>
    %557 = math.exp %556 : vector<8x128xf32>
    %cst_229 = arith.constant 1.000000e+00 : f32
    %558 = vector.broadcast %cst_229 : f32 to vector<8x128xf32>
    %559 = arith.addf %558, %557 : vector<8x128xf32>
    %560 = arith.divf %558, %559 : vector<8x128xf32>
    %561 = arith.mulf %552, %533 : vector<8x128xf32>
    %562 = arith.mulf %546, %554 : vector<8x128xf32>
    %563 = arith.addf %561, %562 : vector<8x128xf32>
    %564 = math.tanh %563 : vector<8x128xf32>
    %565 = arith.mulf %560, %564 : vector<8x128xf32>
    %c0_230 = arith.constant 0 : index
    %c0_231 = arith.constant 0 : index
    %566 = vector.load %arg7[%c0_230, %c0_231] : memref<128x512xf32, #tpu.memory_space<vmem>>, vector<128x512xf32>
    %cst_232 = arith.constant dense<0.000000e+00> : vector<8x512xf32>
    %567 = tpu.matmul %565, %566, %cst_232 {dimension_numbers = #tpu.dot_dimension_numbers<[1], [0], [0], [1], [0, 0, 1, 1], [], []>} : vector<8x128xf32>, vector<128x512xf32>, vector<8x512xf32> -> vector<8x512xf32>
    %c4_233 = arith.constant 4 : index
    %c0_234 = arith.constant 0 : index
    %c0_235 = arith.constant 0 : index
    %568 = vector.load %arg13[%c4_233, %c0_234, %c0_235] : memref<8x8x512xf32, #tpu.memory_space<vmem>>, vector<1x8x512xf32>
    %569 = vector.shape_cast %568 : vector<1x8x512xf32> to vector<8x512xf32>
    %570 = arith.addf %567, %569 : vector<8x512xf32>
    %571 = vector.extract_strided_slice %570 {offsets = [0, 0], sizes = [8, 128], strides = [1, 1]} : vector<8x512xf32> to vector<8x128xf32>
    %572 = arith.negf %571 : vector<8x128xf32>
    %573 = math.exp %572 : vector<8x128xf32>
    %cst_236 = arith.constant 1.000000e+00 : f32
    %574 = vector.broadcast %cst_236 : f32 to vector<8x128xf32>
    %575 = arith.addf %574, %573 : vector<8x128xf32>
    %576 = arith.divf %574, %575 : vector<8x128xf32>
    %577 = vector.extract_strided_slice %570 {offsets = [0, 128], sizes = [8, 128], strides = [1, 1]} : vector<8x512xf32> to vector<8x128xf32>
    %578 = arith.negf %577 : vector<8x128xf32>
    %579 = math.exp %578 : vector<8x128xf32>
    %cst_237 = arith.constant 1.000000e+00 : f32
    %580 = vector.broadcast %cst_237 : f32 to vector<8x128xf32>
    %581 = arith.addf %580, %579 : vector<8x128xf32>
    %582 = arith.divf %580, %581 : vector<8x128xf32>
    %583 = vector.extract_strided_slice %570 {offsets = [0, 256], sizes = [8, 128], strides = [1, 1]} : vector<8x512xf32> to vector<8x128xf32>
    %584 = math.tanh %583 : vector<8x128xf32>
    %585 = vector.extract_strided_slice %570 {offsets = [0, 384], sizes = [8, 128], strides = [1, 1]} : vector<8x512xf32> to vector<8x128xf32>
    %586 = arith.negf %585 : vector<8x128xf32>
    %587 = math.exp %586 : vector<8x128xf32>
    %cst_238 = arith.constant 1.000000e+00 : f32
    %588 = vector.broadcast %cst_238 : f32 to vector<8x128xf32>
    %589 = arith.addf %588, %587 : vector<8x128xf32>
    %590 = arith.divf %588, %589 : vector<8x128xf32>
    %591 = arith.mulf %582, %563 : vector<8x128xf32>
    %592 = arith.mulf %576, %584 : vector<8x128xf32>
    %593 = arith.addf %591, %592 : vector<8x128xf32>
    %594 = math.tanh %593 : vector<8x128xf32>
    %595 = arith.mulf %590, %594 : vector<8x128xf32>
    %c0_239 = arith.constant 0 : index
    %c0_240 = arith.constant 0 : index
    %596 = vector.load %arg7[%c0_239, %c0_240] : memref<128x512xf32, #tpu.memory_space<vmem>>, vector<128x512xf32>
    %cst_241 = arith.constant dense<0.000000e+00> : vector<8x512xf32>
    %597 = tpu.matmul %595, %596, %cst_241 {dimension_numbers = #tpu.dot_dimension_numbers<[1], [0], [0], [1], [0, 0, 1, 1], [], []>} : vector<8x128xf32>, vector<128x512xf32>, vector<8x512xf32> -> vector<8x512xf32>
    %c5_242 = arith.constant 5 : index
    %c0_243 = arith.constant 0 : index
    %c0_244 = arith.constant 0 : index
    %598 = vector.load %arg13[%c5_242, %c0_243, %c0_244] : memref<8x8x512xf32, #tpu.memory_space<vmem>>, vector<1x8x512xf32>
    %599 = vector.shape_cast %598 : vector<1x8x512xf32> to vector<8x512xf32>
    %600 = arith.addf %597, %599 : vector<8x512xf32>
    %601 = vector.extract_strided_slice %600 {offsets = [0, 0], sizes = [8, 128], strides = [1, 1]} : vector<8x512xf32> to vector<8x128xf32>
    %602 = arith.negf %601 : vector<8x128xf32>
    %603 = math.exp %602 : vector<8x128xf32>
    %cst_245 = arith.constant 1.000000e+00 : f32
    %604 = vector.broadcast %cst_245 : f32 to vector<8x128xf32>
    %605 = arith.addf %604, %603 : vector<8x128xf32>
    %606 = arith.divf %604, %605 : vector<8x128xf32>
    %607 = vector.extract_strided_slice %600 {offsets = [0, 128], sizes = [8, 128], strides = [1, 1]} : vector<8x512xf32> to vector<8x128xf32>
    %608 = arith.negf %607 : vector<8x128xf32>
    %609 = math.exp %608 : vector<8x128xf32>
    %cst_246 = arith.constant 1.000000e+00 : f32
    %610 = vector.broadcast %cst_246 : f32 to vector<8x128xf32>
    %611 = arith.addf %610, %609 : vector<8x128xf32>
    %612 = arith.divf %610, %611 : vector<8x128xf32>
    %613 = vector.extract_strided_slice %600 {offsets = [0, 256], sizes = [8, 128], strides = [1, 1]} : vector<8x512xf32> to vector<8x128xf32>
    %614 = math.tanh %613 : vector<8x128xf32>
    %615 = vector.extract_strided_slice %600 {offsets = [0, 384], sizes = [8, 128], strides = [1, 1]} : vector<8x512xf32> to vector<8x128xf32>
    %616 = arith.negf %615 : vector<8x128xf32>
    %617 = math.exp %616 : vector<8x128xf32>
    %cst_247 = arith.constant 1.000000e+00 : f32
    %618 = vector.broadcast %cst_247 : f32 to vector<8x128xf32>
    %619 = arith.addf %618, %617 : vector<8x128xf32>
    %620 = arith.divf %618, %619 : vector<8x128xf32>
    %621 = arith.mulf %612, %593 : vector<8x128xf32>
    %622 = arith.mulf %606, %614 : vector<8x128xf32>
    %623 = arith.addf %621, %622 : vector<8x128xf32>
    %624 = math.tanh %623 : vector<8x128xf32>
    %625 = arith.mulf %620, %624 : vector<8x128xf32>
    %c0_248 = arith.constant 0 : index
    %c0_249 = arith.constant 0 : index
    %626 = vector.load %arg7[%c0_248, %c0_249] : memref<128x512xf32, #tpu.memory_space<vmem>>, vector<128x512xf32>
    %cst_250 = arith.constant dense<0.000000e+00> : vector<8x512xf32>
    %627 = tpu.matmul %625, %626, %cst_250 {dimension_numbers = #tpu.dot_dimension_numbers<[1], [0], [0], [1], [0, 0, 1, 1], [], []>} : vector<8x128xf32>, vector<128x512xf32>, vector<8x512xf32> -> vector<8x512xf32>
    %c6_251 = arith.constant 6 : index
    %c0_252 = arith.constant 0 : index
    %c0_253 = arith.constant 0 : index
    %628 = vector.load %arg13[%c6_251, %c0_252, %c0_253] : memref<8x8x512xf32, #tpu.memory_space<vmem>>, vector<1x8x512xf32>
    %629 = vector.shape_cast %628 : vector<1x8x512xf32> to vector<8x512xf32>
    %630 = arith.addf %627, %629 : vector<8x512xf32>
    %631 = vector.extract_strided_slice %630 {offsets = [0, 0], sizes = [8, 128], strides = [1, 1]} : vector<8x512xf32> to vector<8x128xf32>
    %632 = arith.negf %631 : vector<8x128xf32>
    %633 = math.exp %632 : vector<8x128xf32>
    %cst_254 = arith.constant 1.000000e+00 : f32
    %634 = vector.broadcast %cst_254 : f32 to vector<8x128xf32>
    %635 = arith.addf %634, %633 : vector<8x128xf32>
    %636 = arith.divf %634, %635 : vector<8x128xf32>
    %637 = vector.extract_strided_slice %630 {offsets = [0, 128], sizes = [8, 128], strides = [1, 1]} : vector<8x512xf32> to vector<8x128xf32>
    %638 = arith.negf %637 : vector<8x128xf32>
    %639 = math.exp %638 : vector<8x128xf32>
    %cst_255 = arith.constant 1.000000e+00 : f32
    %640 = vector.broadcast %cst_255 : f32 to vector<8x128xf32>
    %641 = arith.addf %640, %639 : vector<8x128xf32>
    %642 = arith.divf %640, %641 : vector<8x128xf32>
    %643 = vector.extract_strided_slice %630 {offsets = [0, 256], sizes = [8, 128], strides = [1, 1]} : vector<8x512xf32> to vector<8x128xf32>
    %644 = math.tanh %643 : vector<8x128xf32>
    %645 = vector.extract_strided_slice %630 {offsets = [0, 384], sizes = [8, 128], strides = [1, 1]} : vector<8x512xf32> to vector<8x128xf32>
    %646 = arith.negf %645 : vector<8x128xf32>
    %647 = math.exp %646 : vector<8x128xf32>
    %cst_256 = arith.constant 1.000000e+00 : f32
    %648 = vector.broadcast %cst_256 : f32 to vector<8x128xf32>
    %649 = arith.addf %648, %647 : vector<8x128xf32>
    %650 = arith.divf %648, %649 : vector<8x128xf32>
    %651 = arith.mulf %642, %623 : vector<8x128xf32>
    %652 = arith.mulf %636, %644 : vector<8x128xf32>
    %653 = arith.addf %651, %652 : vector<8x128xf32>
    %654 = math.tanh %653 : vector<8x128xf32>
    %655 = arith.mulf %650, %654 : vector<8x128xf32>
    %c0_257 = arith.constant 0 : index
    %c0_258 = arith.constant 0 : index
    %656 = vector.load %arg7[%c0_257, %c0_258] : memref<128x512xf32, #tpu.memory_space<vmem>>, vector<128x512xf32>
    %cst_259 = arith.constant dense<0.000000e+00> : vector<8x512xf32>
    %657 = tpu.matmul %655, %656, %cst_259 {dimension_numbers = #tpu.dot_dimension_numbers<[1], [0], [0], [1], [0, 0, 1, 1], [], []>} : vector<8x128xf32>, vector<128x512xf32>, vector<8x512xf32> -> vector<8x512xf32>
    %c7_260 = arith.constant 7 : index
    %c0_261 = arith.constant 0 : index
    %c0_262 = arith.constant 0 : index
    %658 = vector.load %arg13[%c7_260, %c0_261, %c0_262] : memref<8x8x512xf32, #tpu.memory_space<vmem>>, vector<1x8x512xf32>
    %659 = vector.shape_cast %658 : vector<1x8x512xf32> to vector<8x512xf32>
    %660 = arith.addf %657, %659 : vector<8x512xf32>
    %661 = vector.extract_strided_slice %660 {offsets = [0, 0], sizes = [8, 128], strides = [1, 1]} : vector<8x512xf32> to vector<8x128xf32>
    %662 = arith.negf %661 : vector<8x128xf32>
    %663 = math.exp %662 : vector<8x128xf32>
    %cst_263 = arith.constant 1.000000e+00 : f32
    %664 = vector.broadcast %cst_263 : f32 to vector<8x128xf32>
    %665 = arith.addf %664, %663 : vector<8x128xf32>
    %666 = arith.divf %664, %665 : vector<8x128xf32>
    %667 = vector.extract_strided_slice %660 {offsets = [0, 128], sizes = [8, 128], strides = [1, 1]} : vector<8x512xf32> to vector<8x128xf32>
    %668 = arith.negf %667 : vector<8x128xf32>
    %669 = math.exp %668 : vector<8x128xf32>
    %cst_264 = arith.constant 1.000000e+00 : f32
    %670 = vector.broadcast %cst_264 : f32 to vector<8x128xf32>
    %671 = arith.addf %670, %669 : vector<8x128xf32>
    %672 = arith.divf %670, %671 : vector<8x128xf32>
    %673 = vector.extract_strided_slice %660 {offsets = [0, 256], sizes = [8, 128], strides = [1, 1]} : vector<8x512xf32> to vector<8x128xf32>
    %674 = math.tanh %673 : vector<8x128xf32>
    %675 = vector.extract_strided_slice %660 {offsets = [0, 384], sizes = [8, 128], strides = [1, 1]} : vector<8x512xf32> to vector<8x128xf32>
    %676 = arith.negf %675 : vector<8x128xf32>
    %677 = math.exp %676 : vector<8x128xf32>
    %cst_265 = arith.constant 1.000000e+00 : f32
    %678 = vector.broadcast %cst_265 : f32 to vector<8x128xf32>
    %679 = arith.addf %678, %677 : vector<8x128xf32>
    %680 = arith.divf %678, %679 : vector<8x128xf32>
    %681 = arith.mulf %672, %653 : vector<8x128xf32>
    %682 = arith.mulf %666, %674 : vector<8x128xf32>
    %683 = arith.addf %681, %682 : vector<8x128xf32>
    %684 = math.tanh %683 : vector<8x128xf32>
    %685 = arith.mulf %680, %684 : vector<8x128xf32>
    %c0_266 = arith.constant 0 : index
    %c0_267 = arith.constant 0 : index
    %686 = vector.load %arg9[%c0_266, %c0_267] : memref<128x2xf32, #tpu.memory_space<vmem>>, vector<128x2xf32>
    %cst_268 = arith.constant dense<0.000000e+00> : vector<8x2xf32>
    %687 = tpu.matmul %685, %686, %cst_268 {dimension_numbers = #tpu.dot_dimension_numbers<[1], [0], [0], [1], [0, 0, 1, 1], [], []>} : vector<8x128xf32>, vector<128x2xf32>, vector<8x2xf32> -> vector<8x2xf32>
    %c0_269 = arith.constant 0 : index
    %c0_270 = arith.constant 0 : index
    %688 = vector.load %arg10[%c0_269, %c0_270] : memref<128x2xf32, #tpu.memory_space<vmem>>, vector<128x2xf32>
    %cst_271 = arith.constant dense<0.000000e+00> : vector<8x2xf32>
    %689 = tpu.matmul %475, %688, %cst_271 {dimension_numbers = #tpu.dot_dimension_numbers<[1], [0], [0], [1], [0, 0, 1, 1], [], []>} : vector<8x128xf32>, vector<128x2xf32>, vector<8x2xf32> -> vector<8x2xf32>
    %690 = arith.addf %687, %689 : vector<8x2xf32>
    %c0_272 = arith.constant 0 : index
    %c0_273 = arith.constant 0 : index
    %691 = vector.load %arg11[%c0_272, %c0_273] : memref<1x2xf32, #tpu.memory_space<vmem>>, vector<1x2xf32>
    %692 = vector.broadcast %691 : vector<1x2xf32> to vector<8x2xf32>
    %693 = arith.addf %690, %692 : vector<8x2xf32>
    %c0_274 = arith.constant 0 : index
    %c0_275 = arith.constant 0 : index
    %694 = vector.load %arg12[%c0_274, %c0_275] : memref<8x2xf32, #tpu.memory_space<vmem>>, vector<8x2xf32>
    tpu.vector_store %arg12[%c0_274, %c0_275], %693 {strides = array<i32>} : memref<8x2xf32, #tpu.memory_space<vmem>>, vector<8x2xf32>,
    return
  }
  func.func @transform_0(%arg0: i32) -> (i32, i32, i32) {
    %c0_i32 = arith.constant 0 : i32
    %c0_i32_0 = arith.constant 0 : i32
    %c0_i32_1 = arith.constant 0 : i32
    return %c0_i32, %arg0, %c0_i32_0 : i32, i32, i32
  }
  func.func @transform_1(%arg0: i32) -> (i32, i32, i32) {
    %c0_i32 = arith.constant 0 : i32
    %c0_i32_0 = arith.constant 0 : i32
    %c0_i32_1 = arith.constant 0 : i32
    %c0_i32_2 = arith.constant 0 : i32
    return %c0_i32, %c0_i32_0, %c0_i32_1 : i32, i32, i32
  }
  func.func @transform_2(%arg0: i32) -> (i32, i32) {
    %c0_i32 = arith.constant 0 : i32
    %c0_i32_0 = arith.constant 0 : i32
    %c0_i32_1 = arith.constant 0 : i32
    return %c0_i32, %c0_i32_0 : i32, i32
  }
  func.func @transform_3(%arg0: i32) -> (i32, i32) {
    %c0_i32 = arith.constant 0 : i32
    %c0_i32_0 = arith.constant 0 : i32
    %c0_i32_1 = arith.constant 0 : i32
    return %c0_i32, %c0_i32_0 : i32, i32
  }
  func.func @transform_4(%arg0: i32) -> (i32, i32) {
    %c0_i32 = arith.constant 0 : i32
    %c0_i32_0 = arith.constant 0 : i32
    %c0_i32_1 = arith.constant 0 : i32
    return %c0_i32, %c0_i32_0 : i32, i32
  }
  func.func @transform_5(%arg0: i32) -> (i32, i32) {
    %c0_i32 = arith.constant 0 : i32
    %c0_i32_0 = arith.constant 0 : i32
    %c0_i32_1 = arith.constant 0 : i32
    return %c0_i32, %c0_i32_0 : i32, i32
  }
  func.func @transform_6(%arg0: i32) -> (i32, i32) {
    %c0_i32 = arith.constant 0 : i32
    %c0_i32_0 = arith.constant 0 : i32
    %c0_i32_1 = arith.constant 0 : i32
    return %c0_i32, %c0_i32_0 : i32, i32
  }
  func.func @transform_7(%arg0: i32) -> (i32, i32) {
    %c0_i32 = arith.constant 0 : i32
    %c0_i32_0 = arith.constant 0 : i32
    %c0_i32_1 = arith.constant 0 : i32
    return %c0_i32, %c0_i32_0 : i32, i32
  }
  func.func @transform_8(%arg0: i32) -> (i32, i32) {
    %c0_i32 = arith.constant 0 : i32
    %c0_i32_0 = arith.constant 0 : i32
    %c0_i32_1 = arith.constant 0 : i32
    return %c0_i32, %c0_i32_0 : i32, i32
  }
  func.func @transform_9(%arg0: i32) -> (i32, i32) {
    %c0_i32 = arith.constant 0 : i32
    %c0_i32_0 = arith.constant 0 : i32
    %c0_i32_1 = arith.constant 0 : i32
    return %c0_i32, %c0_i32_0 : i32, i32
  }
  func.func @transform_10(%arg0: i32) -> (i32, i32) {
    %c0_i32 = arith.constant 0 : i32
    %c0_i32_0 = arith.constant 0 : i32
    %c0_i32_1 = arith.constant 0 : i32
    return %c0_i32, %c0_i32_0 : i32, i32
  }
  func.func @transform_11(%arg0: i32) -> (i32, i32) {
    %c0_i32 = arith.constant 0 : i32
    %c0_i32_0 = arith.constant 0 : i32
    return %arg0, %c0_i32 : i32, i32
  }
}

</mosaic_0001>

<bundles_post_ra>
// kernel: tabular_bilstm_forward.1
= control target key start
LH: loop header
LB: loop body
LE: loop exit
PB: predicated region body
PF: predicated region fallthrough
CT: control target
= control target key end

     0   :  { %16 = vsyncpa [#allocation5], 0  ;;  %s7347_s0 = inlined_call_operand.vmem [shape: f32[8,8,1], index: 0, kind: input, shape index: {}]   ;;  %s7348_s1 = inlined_call_operand.vmem [shape: f32[2,1,512], index: 1, kind: input, shape index: {}]   ;;  %s7349_s2 = inlined_call_operand.hbm [shape: f32[128,512], index: 2, kind: input, shape index: {}]   ;;  %s7350_s3 = inlined_call_operand.vmem [shape: f32[1,512], index: 3, kind: input, shape index: {}]   ;;  %s7351_s4 = inlined_call_operand.hbm [shape: f32[128,512], index: 4, kind: input, shape index: {}]   ;;  %s7352_s5 = inlined_call_operand.hbm [shape: f32[128,512], index: 5, kind: input, shape index: {}]   ;;  %s7353_s6 = inlined_call_operand.hbm [shape: f32[128,512], index: 6, kind: input, shape index: {}]   ;;  %s7354_s7 = inlined_call_operand.vmem [shape: f32[1,512], index: 7, kind: input, shape index: {}]   ;;  %s7355_s8 = inlined_call_operand.vmem [shape: f32[128,2], index: 8, kind: input, shape index: {}]   ;;  %s7356_s9 = inlined_call_operand.vmem [shape: f32[128,2], index: 9, kind: input, shape index: {}]   ;;  %s7357_s10 = inlined_call_operand.vmem [shape: f32[1,2], index: 10, kind: input, shape index: {}]   ;;  %s7358_s11 = inlined_call_operand.vmem [shape: f32[8,2], index: 11, kind: output, shape index: {}]  }
   0x1   :  { %17 = vsyncpa [#allocation7], 0 }
   0x2   :  { %18 = vsyncpa [#allocation10], 0  ;;  %s5948_s17 = smov [#allocation6]   ;;  %s5949_s19 = smov [#allocation4]  }
   0x3   :  { %s42_s18 = sshll.u32 %s5948_s17, 4  ;;  %s28_s20 = sshll.u32 %s5949_s19, 4  ;;  %s43_s18 = int_to_ptr.vmem [resolvable:$true] %s42_s18  ;;  %s6018_s20 = int_to_ptr.vmem [resolvable:$true] %s28_s20 }
   0x4   :  { %s5854_s23 = scalar_lea.hbm %s7351_s4, 8192 }
   0x5   :  { %p5855_p0 = scmp.ne.s32.totalorder %s7351_s4, %s5854_s23  ;;  %p5858_p1 = scmp.lt.u32.totalorder %s5854_s23, %s7351_s4 }
   0x7   :  { %p5860_p2 = pnand %p5858_p1, %p5855_p0 }
   0x9   :  { %5863 = shalt.err (!%p5860_p2)
}
   0xa   :  { %s5864_s28 = scalar_lea.vmem %s43_s18, 8192  ;;  %p5869_p4 = scmp.lt.s32.totalorder %s43_s18, %s43_s18 }
   0xb   :  { %p5865_p3 = scmp.ne.s32.totalorder %s43_s18, %s5864_s28  ;;  %p5870_p5 = scmp.lt.s32.totalorder %s5864_s28, %s5864_s28 }
   0xd   :  { %p5871_p6 = por %p5870_p5, %p5869_p4 }
   0xf   :  { %p5872_p7 = pnand %p5871_p6, %p5865_p3 }
  0x11   :  { %5875 = shalt.err (!%p5872_p7)
}
  0x12   :  { %s5950_s29 = smov 512   ;;  %s5951_s30 = smov 32  }
  0x13   :  { %48 = dma.hbm_to_vmem [thread:$0]  %s7351_s4, 8192, %s43_s18, [#allocation7], %s5950_s29, %s5950_s29, %s5951_s30  }
  0x14   :  { %s5876_s16 = scalar_lea.hbm %s7349_s2, 8192 }
  0x15   :  { %p5877_p8 = scmp.ne.s32.totalorder %s7349_s2, %s5876_s16  ;;  %p5880_p9 = scmp.lt.u32.totalorder %s5876_s16, %s7349_s2 }
  0x17   :  { %p5882_p10 = pnand %p5880_p9, %p5877_p8 }
  0x19   :  { %5885 = shalt.err (!%p5882_p10)
}
  0x1a   :  { %s5886_s23 = scalar_lea.vmem %s6018_s20, 8192  ;;  %p5891_p12 = scmp.lt.s32.totalorder %s6018_s20, %s6018_s20 }
  0x1b   :  { %p5887_p11 = scmp.ne.s32.totalorder %s6018_s20, %s5886_s23  ;;  %p5892_p13 = scmp.lt.s32.totalorder %s5886_s23, %s5886_s23 }
  0x1d   :  { %p5893_p0 = por %p5892_p13, %p5891_p12 }
  0x1f   :  { %p5894_p1 = pnand %p5893_p0, %p5887_p11 }
  0x21   :  { %5897 = shalt.err (!%p5894_p1)
}
  0x22   :  { %34 = dma.hbm_to_vmem [thread:$0]  %s7349_s2, 8192, %s6018_s20, [#allocation5], %s5950_s29, %s5950_s29, %s5951_s30  }
  0x23   :  { %s5952_s24 = smov [#allocation8]   ;;  %s5953_s26 = smov [#allocation9]  }
  0x24   :  { %s54_s25 = sshll.u32 %s5952_s24, 4  ;;  %s66_s27 = sshll.u32 %s5953_s26, 4  ;;  %s55_s25 = int_to_ptr.vmem [resolvable:$true] %s54_s25  ;;  %s6055_s27 = int_to_ptr.vmem [resolvable:$true] %s66_s27 }
  0x25   :  { %s5898_s13 = scalar_lea.hbm %s7352_s5, 8192 }
  0x26   :  { %p5899_p2 = scmp.ne.s32.totalorder %s7352_s5, %s5898_s13  ;;  %p5902_p3 = scmp.lt.u32.totalorder %s5898_s13, %s7352_s5 }
  0x28   :  { %p5904_p4 = pnand %p5902_p3, %p5899_p2 }
  0x2a   :  { %5907 = shalt.err (!%p5904_p4)
}
  0x2b   :  { %s5908_s2 = scalar_lea.vmem %s55_s25, 8192  ;;  %p5913_p6 = scmp.lt.s32.totalorder %s55_s25, %s55_s25 }
  0x2c   :  { %p5909_p5 = scmp.ne.s32.totalorder %s55_s25, %s5908_s2  ;;  %p5914_p7 = scmp.lt.s32.totalorder %s5908_s2, %s5908_s2 }
  0x2e   :  { %p5915_p8 = por %p5914_p7, %p5913_p6 }
  0x30   :  { %p5916_p9 = pnand %p5915_p8, %p5909_p5 }
  0x32   :  { %5919 = shalt.err (!%p5916_p9)
}
  0x33   :  { %60 = dma.hbm_to_vmem [thread:$0]  %s7352_s5, 8192, %s55_s25, [#allocation7], %s5950_s29, %s5950_s29, %s5951_s30  }
  0x34   :  { %s5920_s23 = scalar_lea.hbm %s7353_s6, 8192 }
  0x35   :  { %p5921_p10 = scmp.ne.s32.totalorder %s7353_s6, %s5920_s23  ;;  %p5924_p11 = scmp.lt.u32.totalorder %s5920_s23, %s7353_s6 }
  0x37   :  { %p5926_p12 = pnand %p5924_p11, %p5921_p10 }
  0x39   :  { %5929 = shalt.err (!%p5926_p12)
}
  0x3a   :  { %s5930_s28 = scalar_lea.vmem %s6055_s27, 8192  ;;  %p5935_p0 = scmp.lt.s32.totalorder %s6055_s27, %s6055_s27 }
  0x3b   :  { %p5931_p13 = scmp.ne.s32.totalorder %s6055_s27, %s5930_s28  ;;  %p5936_p1 = scmp.lt.s32.totalorder %s5930_s28, %s5930_s28 }
  0x3d   :  { %p5937_p2 = por %p5936_p1, %p5935_p0 }
  0x3f   :  { %p5938_p3 = pnand %p5937_p2, %p5931_p13 }
  0x41   :  { %5941 = shalt.err (!%p5938_p3)
}
  0x42   :  { %72 = dma.hbm_to_vmem [thread:$0]  %s7353_s6, 8192, %s6055_s27, [#allocation10], %s5950_s29, %s5950_s29, %s5951_s30  }
  0x43   :  { %5942 = dma.done.wait [#allocation5], 8192  }
  0x44   :  { %5943 = vsyncadd [#allocation5], 4294959104 }
  0x45   :  { %5944 = dma.done.wait [#allocation7], 16384  }
  0x46   :  { %5945 = vsyncadd [#allocation7], 4294950912 }
  0x47   :  { %5946 = dma.done.wait [#allocation10], 8192  }
  0x48   :  { %5947 = vsyncadd [#allocation10], 4294959104  ;;  %v5954_v0 = vmov 0   ;;  %v4272_v1 = vld [vmem:[%s7347_s0 + $0x8] sm:$0xff]  ;;  %v97_v2 = vld [vmem:[%s7347_s0] sm:$0xff]  ;;  %vm5957_vm0 = vmmov 0  }
  0x49   :  { %5605 = vset.pattern.permute.xlu1 %v5954_v0  ;;  %5604 = vset.pattern.permute.xlu0 %v5954_v0  ;;  %v4273_v3 = vld [vmem:[%s7347_s0 + $0x30] sm:$0xff]  ;;  %v4271_v4 = vld [vmem:[%s7347_s0 + $0x38] sm:$0xff]  ;;  %v4275_v5 = vld [vmem:[%s7347_s0 + $0x28] sm:$0xff]  ;;  %vm4261_vm1 = vcmask 15360  }
  0x4a   :  { %197 = vperm.xlu1 %5605, %v4272_v1   ;;  %100 = vperm.xlu0 %5604, %v97_v2   ;;  %v4274_v6 = vld [vmem:[%s7347_s0 + $0x10] sm:$0xff]  ;;  %v4277_v7 = vld [vmem:[%s7347_s0 + $0x20] sm:$0xff]  ;;  %v4276_v8 = vld [vmem:[%s7347_s0 + $0x18] sm:$0xff] }
  0x4b   :  { %v451_v9 = vld [vmem:[#allocation4 + $0x8] sm:$0xff]  ;;  %v453_v11 = vld [vmem:[#allocation4 + $0x18] sm:$0xff]  ;;  %v450_v14 = vld [vmem:[#allocation4] sm:$0xff] }
  0x4c   :  { %v455_v10 = vld [vmem:[#allocation4 + $0x28] sm:$0xff]  ;;  %v457_v13 = vld [vmem:[#allocation4 + $0x38] sm:$0xff]  ;;  %v454_v15 = vld [vmem:[#allocation4 + $0x20] sm:$0xff] }
  0x4d   :  { %v6116_v12 = vpack.c.bf16 %v455_v10, %v451_v9  ;;  %v6118_v16 = vpack.c.bf16 %v457_v13, %v453_v11  ;;  %v6120_v17 = vpack.c.bf16 %v454_v15, %v450_v14  ;;  %v452_v18 = vld [vmem:[#allocation4 + $0x10] sm:$0xff]  ;;  %v459_v21 = vld [vmem:[#allocation4 + $0x48] sm:$0xff]  ;;  %v461_v23 = vld [vmem:[#allocation4 + $0x58] sm:$0xff] }
  0x4e   :  { %208 = vperm.xlu1 %5605, %v4273_v3   ;;  %132 = vperm.xlu0 %5604, %v4271_v4   ;;  %v456_v19 = vld [vmem:[#allocation4 + $0x30] sm:$0xff]  ;;  %v463_v22 = vld [vmem:[#allocation4 + $0x68] sm:$0xff]  ;;  %v465_v25 = vld [vmem:[#allocation4 + $0x78] sm:$0xff] }
  0x4f   :  { %7392 = vst [vmem:[#allocation14_spill] sm:$0xff] %v6116_v12  ;;  %7393 = vst [vmem:[#allocation15_spill] sm:$0xff] %v6118_v16  ;;  %4437 = vmatprep.subr.bf16.mxu0 %v6116_v12  ;;  %v6123_v20 = vpack.c.bf16 %v456_v19, %v452_v18  ;;  %4469 = vmatprep.subr.bf16.mxu1 %v6118_v16  ;;  %v6128_v24 = vpack.c.bf16 %v463_v22, %v459_v21  ;;  %v458_v26 = vld [vmem:[#allocation4 + $0x40] sm:$0xff]  ;;  %v460_v30 = vld [vmem:[#allocation4 + $0x50] sm:$0xff]  ;;  %v7359_v21 = vmov 0.0  }
  0x50   :  { %4439 = vmatpush1.bf16.msra.mxu0 %v6120_v17  ;;  %v462_v27 = vld [vmem:[#allocation4 + $0x60] sm:$0xff]  ;;  %v6130_v28 = vpack.c.bf16 %v465_v25, %v461_v23  ;;  %v464_v31 = vld [vmem:[#allocation4 + $0x70] sm:$0xff]  ;;  %v467_v33 = vld [vmem:[#allocation4 + $0x88] sm:$0xff]  ;;  %582 = vmatprep.mubr.f32.mxu0 %v7359_v21 }
  0x51   :  { %4471 = vmatpush1.bf16.msra.mxu1 %v6123_v20  ;;  %v6132_v29 = vpack.c.bf16 %v462_v27, %v458_v26  ;;  %4441 = vmatprep.subr.bf16.mxu0 %v6128_v24  ;;  %v6135_v32 = vpack.c.bf16 %v464_v31, %v460_v30  ;;  %v471_v34 = vld [vmem:[#allocation4 + $0xa8] sm:$0xff]  ;;  %v469_v35 = vld [vmem:[#allocation4 + $0x98] sm:$0xff]  ;;  %v466_v38 = vld [vmem:[#allocation4 + $0x80] sm:$0xff] }
  0x52   :  { %243 = vperm.xlu1 %5605, %v4275_v5   ;;  %232 = vperm.xlu0 %5604, %v4274_v6   ;;  %v6140_v36 = vpack.c.bf16 %v471_v34, %v467_v33  ;;  %v473_v37 = vld [vmem:[#allocation4 + $0xb8] sm:$0xff]  ;;  %v470_v39 = vld [vmem:[#allocation4 + $0xa0] sm:$0xff]  ;;  %v468_v42 = vld [vmem:[#allocation4 + $0x90] sm:$0xff] }
  0x53   :  { %4473 = vmatprep.subr.bf16.mxu1 %v6130_v28  ;;  %v6142_v40 = vpack.c.bf16 %v473_v37, %v469_v35  ;;  %v6144_v41 = vpack.c.bf16 %v470_v39, %v466_v38  ;;  %v472_v43 = vld [vmem:[#allocation4 + $0xb0] sm:$0xff]  ;;  %v475_v45 = vld [vmem:[#allocation4 + $0xc8] sm:$0xff]  ;;  %v477_v47 = vld [vmem:[#allocation4 + $0xd8] sm:$0xff]  ;;  %653 = vmatprep.mubr.f32.mxu1 %v7359_v21 }
  0x54   :  { %4443 = vmatpush1.bf16.msra.mxu0 %v6132_v29  ;;  %v6147_v44 = vpack.c.bf16 %v472_v43, %v468_v42  ;;  %v479_v46 = vld [vmem:[#allocation4 + $0xe8] sm:$0xff]  ;;  %v481_v49 = vld [vmem:[#allocation4 + $0xf8] sm:$0xff]  ;;  %v474_v50 = vld [vmem:[#allocation4 + $0xc0] sm:$0xff] }
  0x55   :  { %4475 = vmatpush1.bf16.msra.mxu1 %v6135_v32  ;;  %4445 = vmatprep.subr.bf16.mxu0 %v6140_v36  ;;  %v6152_v48 = vpack.c.bf16 %v479_v46, %v475_v45  ;;  %v478_v51 = vld [vmem:[#allocation4 + $0xe0] sm:$0xff]  ;;  %v6154_v52 = vpack.c.bf16 %v481_v49, %v477_v47  ;;  %v476_v54 = vld [vmem:[#allocation4 + $0xd0] sm:$0xff]  ;;  %v483_v57 = vld [vmem:[#allocation4 + $0x108] sm:$0xff] }
  0x56   :  { %278 = vperm.xlu1 %5605, %v4277_v7   ;;  %267 = vperm.xlu0 %5604, %v4276_v8   ;;  %v6156_v53 = vpack.c.bf16 %v478_v51, %v474_v50  ;;  %v480_v55 = vld [vmem:[#allocation4 + $0xf0] sm:$0xff]  ;;  %v487_v58 = vld [vmem:[#allocation4 + $0x128] sm:$0xff]  ;;  %v485_v59 = vld [vmem:[#allocation4 + $0x118] sm:$0xff] }
  0x57   :  { %4477 = vmatprep.subr.bf16.mxu1 %v6142_v40  ;;  %v6159_v56 = vpack.c.bf16 %v480_v55, %v476_v54  ;;  %v6164_v60 = vpack.c.bf16 %v487_v58, %v483_v57  ;;  %v489_v61 = vld [vmem:[#allocation4 + $0x138] sm:$0xff]  ;;  %v482_v62 = vld [vmem:[#allocation4 + $0x100] sm:$0xff]  ;;  %v492_v15 = vld [vmem:[#allocation4 + $0x150] sm:$0xff]  ;;  %v104_v58 = vlaneseq }
  0x58   :  { %4447 = vmatpush1.bf16.msra.mxu0 %v6144_v41  ;;  %v486_v63 = vld [vmem:[#allocation4 + $0x120] sm:$0xff]  ;;  %v6166_v0 = vpack.c.bf16 %v489_v61, %v485_v59  ;;  %v497_v9 = vld [vmem:[#allocation4 + $0x178] sm:$0xff]  ;;  %v496_v18 = vld [vmem:[#allocation4 + $0x170] sm:$0xff] }
  0x59   :  { %4479 = vmatpush1.bf16.msra.mxu1 %v6147_v44  ;;  %4449 = vmatprep.subr.bf16.mxu0 %v6152_v48  ;;  %v490_v10 = vld [vmem:[#allocation4 + $0x140] sm:$0xff]  ;;  %v499_v19 = vld [vmem:[#allocation4 + $0x188] sm:$0xff]  ;;  %v6185_v22 = vpack.c.bf16 %v496_v18, %v492_v15  ;;  %v501_v25 = vld [vmem:[#allocation4 + $0x198] sm:$0xff]  ;;  %v105_v59 = vshrl.u32 %v104_v58, 7 }
  0x5a   :  { %311 = vperm.xlu1 %5605, %v4276_v8   ;;  %301 = vperm.xlu0 %5604, %v4277_v7   ;;  %v493_v7 = vld [vmem:[#allocation4 + $0x158] sm:$0xff]  ;;  %v494_v11 = vld [vmem:[#allocation4 + $0x160] sm:$0xff]  ;;  %v503_v23 = vld [vmem:[#allocation4 + $0x1a8] sm:$0xff] }
  0x5b   :  { %4481 = vmatprep.subr.bf16.mxu1 %v6154_v52  ;;  %v6178_v13 = vpack.c.bf16 %v497_v9, %v493_v7  ;;  %v6180_v14 = vpack.c.bf16 %v494_v11, %v490_v10  ;;  %v505_v26 = vld [vmem:[#allocation4 + $0x1b8] sm:$0xff]  ;;  %v6189_v27 = vpack.c.bf16 %v503_v23, %v499_v19  ;;  %v498_v31 = vld [vmem:[#allocation4 + $0x180] sm:$0xff]  ;;  %v500_v34 = vld [vmem:[#allocation4 + $0x190] sm:$0xff]  ;;  %v6216_v61 = vsub.s32 0, %v105_v59 }
  0x5c   :  { %4451 = vmatpush1.bf16.msra.mxu0 %v6156_v53  ;;  %v6191_v30 = vpack.c.bf16 %v505_v26, %v501_v25  ;;  %v502_v33 = vld [vmem:[#allocation4 + $0x1a0] sm:$0xff]  ;;  %v504_v37 = vld [vmem:[#allocation4 + $0x1b0] sm:$0xff]  ;;  %v507_v38 = vld [vmem:[#allocation4 + $0x1c8] sm:$0xff]  ;;  %v6230_v7 = vsub.s32 2, %v105_v59 }
  0x5d   :  { %4483 = vmatpush1.bf16.msra.mxu1 %v6159_v56  ;;  %4453 = vmatprep.subr.bf16.mxu0 %v6164_v60  ;;  %v6194_v35 = vpack.c.bf16 %v502_v33, %v498_v31  ;;  %v511_v39 = vld [vmem:[#allocation4 + $0x1e8] sm:$0xff]  ;;  %v6198_v42 = vpack.c.bf16 %v504_v37, %v500_v34  ;;  %v509_v45 = vld [vmem:[#allocation4 + $0x1d8] sm:$0xff]  ;;  %v506_v47 = vld [vmem:[#allocation4 + $0x1c0] sm:$0xff]  ;;  %7400 = vst [vmem:[#allocation22_spill] sm:$0xff] %v6216_v61 }
  0x5e   :  { %344 = vperm.xlu1 %5605, %v4274_v6   ;;  %334 = vperm.xlu0 %5604, %v4275_v5   ;;  %v491_v5 = vld [vmem:[#allocation4 + $0x148] sm:$0xff]  ;;  %v6200_v43 = vpack.c.bf16 %v511_v39, %v507_v38  ;;  %v513_v46 = vld [vmem:[#allocation4 + $0x1f8] sm:$0xff]  ;;  %v510_v50 = vld [vmem:[#allocation4 + $0x1e0] sm:$0xff]  ;;  %7404 = vst [vmem:[#allocation26_spill] sm:$0xff] %v6230_v7 }
  0x5f   :  { %4485 = vmatprep.subr.bf16.mxu1 %v6166_v0  ;;  %v495_v6 = vld [vmem:[#allocation4 + $0x168] sm:$0xff]  ;;  %7394 = vst [vmem:[#allocation16_spill] sm:$0xff] %v6194_v35  ;;  %7395 = vst [vmem:[#allocation17_spill] sm:$0xff] %v6198_v42  ;;  %v6202_v49 = vpack.c.bf16 %v513_v46, %v509_v45  ;;  %v508_v51 = vld [vmem:[#allocation4 + $0x1d0] sm:$0xff]  ;;  %v6205_v55 = vpack.c.bf16 %v510_v50, %v506_v47 }
  0x60   :  { %v6176_v8 = vpack.c.bf16 %v495_v6, %v491_v5  ;;  %7396 = vst [vmem:[#allocation18_spill] sm:$0xff] %v6200_v43  ;;  %v512_v54 = vld [vmem:[#allocation4 + $0x1f0] sm:$0xff]  ;;  %v6228_v6 = vsub.s32 1, %v105_v59  ;;  %v6249_v19 = vld [vmem:[%s7350_s3] sm:$0xf] }
  0x61   :  { %7397 = vst [vmem:[#allocation19_spill] sm:$0xff] %v6202_v49  ;;  %7398 = vst [vmem:[#allocation20_spill] sm:$0xff] %v6205_v55  ;;  %v6209_v57 = vpack.c.bf16 %v512_v54, %v508_v51  ;;  %v6269_v45 = vrot.slane %v6249_v19, %v6216_v61 }
  0x62   :  { %377 = vperm.xlu1 %5605, %v4272_v1   ;;  %367 = vperm.xlu0 %5604, %v4273_v3   ;;  %v6168_v1 = vpack.c.bf16 %v486_v63, %v482_v62  ;;  %v488_v3 = vld [vmem:[#allocation4 + $0x130] sm:$0xff]  ;;  %v94_v62 = vld [vmem:[%s7348_s1] sm:$0xf]  ;;  %v6221_v63 = vsub.s32 3, %v105_v59  ;;  %7403 = vst [vmem:[#allocation25_spill] sm:$0xff] %v6228_v6 }
  0x63   :  { %7399 = vst [vmem:[#allocation21_spill] sm:$0xff] %v6209_v57  ;;  %v6233_v9 = vrot.slane %v94_v62, %v6216_v61  ;;  %v6254_v26 = vrot.slane %v94_v62, %v6230_v7  ;;  %v6273_v50 = vrot.slane %v94_v62, %v6228_v6 }
  0x64   :  { %4455 = vmatpush1.bf16.msra.mxu0 %v6168_v1  ;;  %7401 = vst [vmem:[#allocation23_spill] sm:$0xff] %v6221_v63  ;;  %v6242_v15 = vrot.slane %v94_v62, %v6221_v63  ;;  %v6278_v21 = vrot.slane %v6249_v19, %v6221_v63 }
  0x65   :  { %4457 = vmatprep.subr.bf16.mxu0 %v6176_v8 }
  0x66   :  { %410 = vperm.xlu1 %5605, %v97_v2   ;;  %400 = vperm.xlu0 %5604, %v4271_v4   ;;  %v484_v2 = vld [vmem:[#allocation4 + $0x110] sm:$0xff]  ;;  %7406 = vst [vmem:[#allocation28_spill] sm:$0xff] %v6278_v21 }
  0x67   :  { %v6171_v4 = vpack.c.bf16 %v488_v3, %v484_v2  ;;  %v4270_v2 = vld [vmem:[%s7348_s1 + $0x4] sm:$0xf] }
  0x68   :  { %4459 = vmatpush1.bf16.msra.mxu0 %v6180_v14  ;;  %v6236_v10 = vrot.slane %v4270_v2, %v6216_v61  ;;  %v6239_v11 = vrot.slane %v4270_v2, %v6221_v63  ;;  %v6257_v31 = vrot.slane %v4270_v2, %v6228_v6  ;;  %v6260_v33 = vrot.slane %v4270_v2, %v6230_v7 }
  0x69   :  { %4487 = vmatpush1.bf16.msra.mxu1 %v6171_v4  ;;  %4461 = vmatprep.subr.bf16.mxu0 %v6189_v27 }
  0x6a   :  { %4489 = vmatprep.subr.bf16.mxu1 %v6178_v13 }
  0x6c   :  { %4463 = vmatpush1.bf16.msra.mxu0 %v6194_v35  ;;  %v6315_v35 = vrot.slane %v6249_v19, %v6230_v7 }
  0x6d   :  { %4491 = vmatpush1.bf16.msra.mxu1 %v6185_v22  ;;  %4465 = vmatprep.subr.bf16.mxu0 %v6200_v43 }
  0x6e   :  { %4493 = vmatprep.subr.bf16.mxu1 %v6191_v30 }
  0x70   :  { %4467 = vmatpush1.bf16.msra.mxu0 %v6205_v55 }
  0x71   :  { %4495 = vmatpush1.bf16.msra.mxu1 %v6198_v42  ;;  %4501 = vmatprep.subr.bf16.mxu0 %v6116_v12 }
  0x72   :  { %4497 = vmatprep.subr.bf16.mxu1 %v6202_v49 }
  0x75   :  { %4499 = vmatpush1.bf16.msra.mxu1 %v6209_v57 }
  0x76   :  { %4533 = vmatprep.subr.bf16.mxu1 %v6118_v16 }
  0xc9   :  { %v6226_v3 = vpop.permute.xlu1 %197  ;;  %v101_v5 = vpop.permute.xlu0 %100 }
  0xca   :  { %7402 = vst [vmem:[#allocation24_spill] sm:$0xff] %v6226_v3  ;;  %v200_v18 = vmul.f32 %v6226_v3, %v6233_v9  ;;  %v124_v37 = vmul.f32 %v6233_v9, %v101_v5  ;;  %v127_v46 = vmul.f32 %v6242_v15, %v101_v5  ;;  %v126_v59 = vmul.f32 %v6254_v26, %v101_v5 }
  0xcd   :  { %v6251_v23 = vpop.permute.xlu1 %208  ;;  %v133_v25 = vpop.permute.xlu0 %132 }
  0xce   :  { %7405 = vst [vmem:[#allocation27_spill] sm:$0xff] %v6251_v23  ;;  %v211_v34 = vmul.f32 %v6251_v23, %v6236_v10  ;;  %v156_v38 = vmul.f32 %v6236_v10, %v133_v25  ;;  %v159_v39 = vmul.f32 %v6239_v11, %v133_v25  ;;  %v158_v61 = vmul.f32 %v6260_v33, %v133_v25 }
  0xd0   :  { %v215_v47 = vadd.f32 %v211_v34, %v200_v18  ;;  %v160_v51 = vadd.f32 %v156_v38, %v124_v37  ;;  %v163_v2 = vadd.f32 %v159_v39, %v127_v46  ;;  %v162_v42 = vadd.f32 %v158_v61, %v126_v59 }
  0xd1   :  { %v244_v54 = vpop.permute.xlu1 %243  ;;  %v233_v58 = vpop.permute.xlu0 %232 }
  0xd2   :  { %v246_v23 = vmul.f32 %v244_v54, %v6236_v10  ;;  %v185_v3 = vadd.f32 %v6269_v45, %v160_v51  ;;  %v247_v18 = vmul.f32 %v244_v54, %v6257_v31  ;;  %v235_v62 = vmul.f32 %v233_v58, %v6233_v9 }
  0xd3   :  { %v248_v34 = vmul.f32 %v244_v54, %v6260_v33  ;;  %v249_v37 = vmul.f32 %v244_v54, %v6239_v11  ;;  %v237_v5 = vmul.f32 %v233_v58, %v6254_v26  ;;  %v6289_v38 = vadd.f32 %v215_v47, %v6269_v45 }
  0xd4   :  { %v4285_v39 = vmul.f32 -1.442695, %v185_v3  ;;  %v236_v46 = vmul.f32 %v233_v58, %v6273_v50  ;;  %v238_v25 = vmul.f32 %v233_v58, %v6242_v15  ;;  %v250_v6 = vadd.f32 %v246_v23, %v235_v62 }
  0xd5   :  { %7407 = vst [vmem:[#allocation29_spill] sm:$0xff] %v6289_v38  ;;  %v279_v63 = vpop.permute.xlu1 %278  ;;  %v268_v51 = vpop.permute.xlu0 %267  ;;  %v188_v16 = vadd.f32 %v6278_v21, %v163_v2  ;;  %v6305_v2 = vadd.f32 %v248_v34, %v237_v5  ;;  %v187_v7 = vadd.f32 %v6315_v35, %v162_v42 }
  0xd6   :  { %v281_v12 = vmul.f32 %v279_v63, %v6236_v10  ;;  %v282_v57 = vmul.f32 %v279_v63, %v6257_v31  ;;  %v283_v54 = vmul.f32 %v279_v63, %v6260_v33  ;;  %5606 = vpow2.f32 %v4285_v39 }
  0xd7   :  { %v284_v47 = vmul.f32 %v279_v63, %v6239_v11  ;;  %v270_v3 = vmul.f32 %v268_v51, %v6233_v9  ;;  %v272_v38 = vmul.f32 %v268_v51, %v6254_v26  ;;  %v271_v58 = vmul.f32 %v268_v51, %v6273_v50  ;;  %7409 = vst [vmem:[#allocation31_spill] sm:$0xff] %v6305_v2 }
  0xd8   :  { %v273_v55 = vmul.f32 %v268_v51, %v6242_v15  ;;  %v6303_v23 = vadd.f32 %v250_v6, %v6269_v45  ;;  %v6307_v49 = vadd.f32 %v247_v18, %v236_v46  ;;  %v6309_v39 = vadd.f32 %v249_v37, %v238_v25 }
  0xd9   :  { %v312_v62 = vpop.permute.xlu1 %311  ;;  %v302_v21 = vpop.permute.xlu0 %301  ;;  %v285_v63 = vadd.f32 %v281_v12, %v270_v3  ;;  %v6311_v43 = vadd.f32 %v283_v54, %v272_v38  ;;  %v4286_v6 = vmul.f32 -1.442695, %v188_v16  ;;  %v6328_v16 = vadd.f32 %v282_v57, %v271_v58 }
  0xda   :  { %7408 = vst [vmem:[#allocation30_spill] sm:$0xff] %v6303_v23  ;;  %7410 = vst [vmem:[#allocation32_spill] sm:$0xff] %v6307_v49  ;;  %v314_v51 = vmul.f32 %v312_v62, %v6236_v10  ;;  %v315_v34 = vmul.f32 %v312_v62, %v6257_v31  ;;  %v316_v5 = vmul.f32 %v312_v62, %v6260_v33 }
  0xdb   :  { %7411 = vst [vmem:[#allocation33_spill] sm:$0xff] %v6309_v39  ;;  %7412 = vst [vmem:[#allocation34_spill] sm:$0xff] %v6311_v43  ;;  %v304_v18 = vmul.f32 %v302_v21, %v6233_v9  ;;  %v317_v37 = vmul.f32 %v312_v62, %v6239_v11  ;;  %v305_v12 = vmul.f32 %v302_v21, %v6273_v50  ;;  %5608 = vpow2.f32 %v4286_v6 }
  0xdc   :  { %v306_v38 = vmul.f32 %v302_v21, %v6254_v26  ;;  %v6325_v61 = vadd.f32 %v285_v63, %v6269_v45  ;;  %v307_v59 = vmul.f32 %v302_v21, %v6242_v15  ;;  %7414 = vst [vmem:[#allocation36_spill] sm:$0xff] %v6328_v16  ;;  %v6330_v54 = vadd.f32 %v284_v47, %v273_v55 }
  0xdd   :  { %v345_v46 = vpop.permute.xlu1 %344  ;;  %v335_v25 = vpop.permute.xlu0 %334  ;;  %v318_v3 = vadd.f32 %v314_v51, %v304_v18  ;;  %v6342_v58 = vadd.f32 %v315_v34, %v305_v12  ;;  %5610 = vtanh.f32 %v187_v7 }
  0xde   :  { %7413 = vst [vmem:[#allocation35_spill] sm:$0xff] %v6325_v61  ;;  %7415 = vst [vmem:[#allocation37_spill] sm:$0xff] %v6330_v54  ;;  %v347_v62 = vmul.f32 %v345_v46, %v6236_v10  ;;  %v349_v43 = vmul.f32 %v345_v46, %v6260_v33  ;;  %v337_v23 = vmul.f32 %v335_v25, %v6233_v9 }
  0xdf   :  { %v339_v63 = vmul.f32 %v335_v25, %v6254_v26  ;;  %v6338_v21 = vadd.f32 %v318_v3, %v6269_v45  ;;  %v6340_v61 = vadd.f32 %v316_v5, %v306_v38  ;;  %7418 = vst [vmem:[#allocation40_spill] sm:$0xff] %v6342_v58  ;;  %v6344_v42 = vadd.f32 %v317_v37, %v307_v59 }
  0xe0   :  { %v5607_v57 = vpop.eup %5606  ;;  %v351_v51 = vadd.f32 %v347_v62, %v337_v23  ;;  %v348_v54 = vmul.f32 %v345_v46, %v6257_v31  ;;  %v350_v16 = vmul.f32 %v345_v46, %v6239_v11  ;;  %v338_v3 = vmul.f32 %v335_v25, %v6273_v50 }
  0xe1   :  { %7416 = vst [vmem:[#allocation38_spill] sm:$0xff] %v6338_v21  ;;  %7417 = vst [vmem:[#allocation39_spill] sm:$0xff] %v6340_v61  ;;  %v378_v55 = vpop.permute.xlu1 %377  ;;  %v368_v47 = vpop.permute.xlu0 %367  ;;  %v6346_v18 = vadd.f32 %v349_v43, %v339_v63  ;;  %v436_v6 = vadd.f32 1.0, %v5607_v57  ;;  %v340_v5 = vmul.f32 %v335_v25, %v6242_v15 }
  0xe2   :  { %7419 = vst [vmem:[#allocation41_spill] sm:$0xff] %v6344_v42  ;;  %v380_v38 = vmul.f32 %v378_v55, %v6236_v10  ;;  %v381_v34 = vmul.f32 %v378_v55, %v6257_v31  ;;  %v382_v37 = vmul.f32 %v378_v55, %v6260_v33  ;;  %v383_v43 = vmul.f32 %v378_v55, %v6239_v11 }
  0xe3   :  { %7420 = vst [vmem:[#allocation42_spill] sm:$0xff] %v6346_v18  ;;  %5612 = vrcp.f32 %v436_v6  ;;  %v370_v23 = vmul.f32 %v368_v47, %v6233_v9  ;;  %v371_v7 = vmul.f32 %v368_v47, %v6273_v50  ;;  %v372_v12 = vmul.f32 %v368_v47, %v6254_v26 }
  0xe4   :  { %v373_v59 = vmul.f32 %v368_v47, %v6242_v15  ;;  %v6361_v25 = vadd.f32 %v351_v51, %v6269_v45  ;;  %v6371_v58 = vadd.f32 %v348_v54, %v338_v3  ;;  %v6373_v51 = vadd.f32 %v350_v16, %v340_v5 }
  0xe5   :  { %v411_v46 = vpop.permute.xlu1 %410  ;;  %v401_v62 = vpop.permute.xlu0 %400  ;;  %v6375_v61 = vadd.f32 %v382_v37, %v372_v12  ;;  %v6377_v39 = vadd.f32 %v381_v34, %v371_v7  ;;  %v7430_v7 = vld [vmem:[#allocation19_spill] sm:$0xff]  ;;  %v7431_v12 = vld [vmem:[#allocation20_spill] sm:$0xff] }
  0xe6   :  { %7421 = vst [vmem:[#allocation43_spill] sm:$0xff] %v6361_v25  ;;  %v413_v63 = vmul.f32 %v411_v46, %v6236_v10  ;;  %v414_v57 = vmul.f32 %v411_v46, %v6257_v31  ;;  %v415_v6 = vmul.f32 %v411_v46, %v6260_v33  ;;  %v416_v55 = vmul.f32 %v411_v46, %v6239_v11  ;;  %v5609_v10 = vpop.eup %5608 }
  0xe7   :  { %v403_v18 = vmul.f32 %v401_v62, %v6233_v9  ;;  %v404_v21 = vmul.f32 %v401_v62, %v6273_v50  ;;  %v405_v42 = vmul.f32 %v401_v62, %v6254_v26  ;;  %v406_v47 = vmul.f32 %v401_v62, %v6242_v15  ;;  %v5611_v54 = vpop.eup %5610 }
  0xe8   :  { %v384_v25 = vadd.f32 %v380_v38, %v370_v23  ;;  %v6379_v49 = vadd.f32 %v383_v43, %v373_v59  ;;  %v443_v16 = vadd.f32 1.0, %v5609_v10  ;;  %v7429_v23 = vld [vmem:[#allocation18_spill] sm:$0xff]  ;;  %v7432_v59 = vld [vmem:[#allocation21_spill] sm:$0xff]  ;;  %v7436_v10 = vld [vmem:[#allocation27_spill] sm:$0xff] }
  0xe9   :  { %v417_v46 = vadd.f32 %v413_v63, %v403_v18  ;;  %v6384_v2 = vadd.f32 %v415_v6, %v405_v42  ;;  %v6389_v3 = vadd.f32 %v414_v57, %v404_v21  ;;  %v6391_v5 = vadd.f32 %v416_v55, %v406_v47  ;;  %v7427_v21 = vld [vmem:[#allocation16_spill] sm:$0xff]  ;;  %v7428_v42 = vld [vmem:[#allocation17_spill] sm:$0xff]  ;;  %v7434_v63 = vld [vmem:[#allocation15_spill] sm:$0xff] }
  0xea   :  { %v6382_v9 = vadd.f32 %v384_v25, %v6269_v45  ;;  %5614 = vrcp.f32 %v443_v16  ;;  %v7433_v25 = vld [vmem:[#allocation14_spill] sm:$0xff]  ;;  %v7435_v57 = vld [vmem:[#allocation24_spill] sm:$0xff]  ;;  %v214_v16 = vmul.f32 %v7436_v10, %v6239_v11 }
  0xeb   :  { %7422 = vst [vmem:[#allocation44_spill] sm:$0xff] %v6384_v2  ;;  %v6387_v62 = vadd.f32 %v417_v46, %v6269_v45  ;;  %7424 = vst [vmem:[#allocation46_spill] sm:$0xff] %v6389_v3  ;;  %v7426_v45 = vmov 0.0   ;;  %v201_v6 = vmul.f32 %v7435_v57, %v6273_v50  ;;  %v202_v55 = vmul.f32 %v7435_v57, %v6254_v26 }
  0xec   :  { %7425 = vst [vmem:[#allocation47_spill] sm:$0xff] %v6391_v5  ;;  %v203_v47 = vmul.f32 %v7435_v57, %v6242_v15  ;;  %v212_v46 = vmul.f32 %v7436_v10, %v6257_v31  ;;  %v7438_v31 = vld [vmem:[#allocation28_spill] sm:$0xff]  ;;  %v7439_v5 = vld [vmem:[#allocation29_spill] sm:$0xff] }
  0xed   :  { %7423 = vst [vmem:[#allocation45_spill] sm:$0xff] %v6387_v62  ;;  %v5613_v38 = vpop.eup %5612 }
  0xee   :  { %v6393_v34 = vmul.f32 %v5613_v38, %v5611_v54  ;;  %v213_v54 = vmul.f32 %v7436_v10, %v6260_v33 }
  0xf0   :  { %5616 = vtanh.f32 %v6393_v34  ;;  %v217_v38 = vadd.f32 %v213_v54, %v202_v55 }
  0xf2   :  { %v221_v26 = vadd.f32 %v217_v38, %v6315_v35 }
  0xf4   :  { %v5615_v18 = vpop.eup %5614 }
  0xfa   :  { %v5617_v37 = vpop.eup %5616 }
  0xfb   :  { %v6396_v43 = vmul.f32 %v5617_v37, %v5615_v18  ;;  %v216_v18 = vadd.f32 %v212_v46, %v201_v6  ;;  %v218_v37 = vadd.f32 %v214_v16, %v203_v47 }
  0xfd   :  { %583 = vmatmul.mubr.f32.vlgmr.msra.gmra.mrb[0].mxu0 %v6396_v43  ;;  %654 = vmatmul.mubr.f32.vlgmr.msra.gmra.mrb[0].mxu1 %v6396_v43  ;;  %v222_v62 = vadd.f32 %v218_v37, %v7438_v31 }
  0xfe   :  { %4503 = vmatpush1.bf16.msra.mxu0 %v6120_v17  ;;  %4535 = vmatpush1.bf16.msra.mxu1 %v6123_v20 }
  0xff   :  { %4505 = vmatprep.subr.bf16.mxu0 %v6128_v24  ;;  %4537 = vmatprep.subr.bf16.mxu1 %v6130_v28 }
 0x100   :  { %818 = vmatprep.mubr.f32.mxu0 %v7426_v45  ;;  %889 = vmatprep.mubr.f32.mxu1 %v7426_v45 }
 0x102   :  { %4507 = vmatpush1.bf16.msra.mxu0 %v6132_v29  ;;  %4539 = vmatpush1.bf16.msra.mxu1 %v6135_v32 }
 0x103   :  { %4509 = vmatprep.subr.bf16.mxu0 %v6140_v36  ;;  %4541 = vmatprep.subr.bf16.mxu1 %v6142_v40 }
 0x106   :  { %4511 = vmatpush1.bf16.msra.mxu0 %v6144_v41  ;;  %4543 = vmatpush1.bf16.msra.mxu1 %v6147_v44 }
 0x107   :  { %4513 = vmatprep.subr.bf16.mxu0 %v6152_v48  ;;  %4545 = vmatprep.subr.bf16.mxu1 %v6154_v52 }
 0x10a   :  { %4515 = vmatpush1.bf16.msra.mxu0 %v6156_v53  ;;  %4547 = vmatpush1.bf16.msra.mxu1 %v6159_v56 }
 0x10b   :  { %4517 = vmatprep.subr.bf16.mxu0 %v6164_v60  ;;  %4549 = vmatprep.subr.bf16.mxu1 %v6166_v0 }
 0x10e   :  { %4519 = vmatpush1.bf16.msra.mxu0 %v6168_v1  ;;  %4551 = vmatpush1.bf16.msra.mxu1 %v6171_v4 }
 0x10f   :  { %4521 = vmatprep.subr.bf16.mxu0 %v6176_v8  ;;  %4553 = vmatprep.subr.bf16.mxu1 %v6178_v13 }
 0x112   :  { %4523 = vmatpush1.bf16.msra.mxu0 %v6180_v14  ;;  %4555 = vmatpush1.bf16.msra.mxu1 %v6185_v22 }
 0x113   :  { %4525 = vmatprep.subr.bf16.mxu0 %v6189_v27  ;;  %4557 = vmatprep.subr.bf16.mxu1 %v6191_v30 }
 0x116   :  { %4527 = vmatpush1.bf16.msra.mxu0 %v7427_v21  ;;  %4559 = vmatpush1.bf16.msra.mxu1 %v7428_v42 }
 0x117   :  { %4529 = vmatprep.subr.bf16.mxu0 %v7429_v23  ;;  %4561 = vmatprep.subr.bf16.mxu1 %v7430_v7 }
 0x11a   :  { %4531 = vmatpush1.bf16.msra.mxu0 %v7431_v12  ;;  %4563 = vmatpush1.bf16.msra.mxu1 %v7432_v59 }
 0x11b   :  { %4565 = vmatprep.subr.bf16.mxu0 %v7433_v25  ;;  %4597 = vmatprep.subr.bf16.mxu1 %v7434_v63  ;;  %v7437_v25 = vld [vmem:[#allocation25_spill] sm:$0xff] }
 0x11c   :  { %v6448_v50 = vrot.slane %v6249_v19, %v7437_v25 }
 0x11e   :  { %v220_v57 = vadd.f32 %v216_v18, %v6448_v50 }
 0x1d0   :  { %v584_v63 = vpop.f32.mrb[0].mxu0  ;;  %v655_v15 = vpop.f32.mrb[0].mxu1 }
 0x1d1   :  { %v585_v33 = vadd.f32 %v584_v63, %v7439_v5  ;;  %v656_v3 = vadd.f32 %v655_v15, %v221_v26  ;;  %v586_v2 = vpop.f32.mrb[1].mxu0  ;;  %v657_v11 = vpop.f32.mrb[1].mxu1 }
 0x1d2   :  { %v587_v55 = vadd.f32 %v586_v2, %v220_v57  ;;  %v658_v6 = vadd.f32 %v657_v11, %v222_v62 }
 0x1d3   :  { %v4287_v47 = vmul.f32 -1.442695, %v585_v33 }
 0x1d4   :  { %v4288_v10 = vmul.f32 -1.442695, %v587_v55  ;;  %v4289_v19 = vmul.f32 -1.442695, %v658_v6  ;;  %v7443_v55 = vld [vmem:[#allocation33_spill] sm:$0xff] }
 0x1d5   :  { %5618 = vpow2.f32 %v4287_v47  ;;  %v257_v6 = vadd.f32 %v7443_v55, %v7438_v31  ;;  %v7444_v47 = vld [vmem:[#allocation30_spill] sm:$0xff] }
 0x1d6   :  { %5620 = vpow2.f32 %v4288_v10 }
 0x1d7   :  { %5622 = vpow2.f32 %v4289_v19 }
 0x1d8   :  { %5624 = vtanh.f32 %v656_v3  ;;  %v7442_v3 = vld [vmem:[#allocation32_spill] sm:$0xff] }
 0x1df   :  { %v5619_v46 = vpop.eup %5618 }
 0x1e0   :  { %v5621_v54 = vpop.eup %5620  ;;  %v663_v16 = vadd.f32 1.0, %v5619_v46 }
 0x1e1   :  { %v669_v38 = vadd.f32 1.0, %v5621_v54  ;;  %v5623_v18 = vpop.eup %5622 }
 0x1e2   :  { %5626 = vrcp.f32 %v663_v16  ;;  %v5625_v5 = vpop.eup %5624  ;;  %v676_v2 = vadd.f32 1.0, %v5623_v18 }
 0x1e3   :  { %5628 = vrcp.f32 %v669_v38 }
 0x1e4   :  { %5630 = vrcp.f32 %v676_v2 }
 0x1ec   :  { %v5627_v37 = vpop.eup %5626 }
 0x1ed   :  { %v5629_v26 = vpop.eup %5628  ;;  %v680_v63 = vmul.f32 %v5627_v37, %v5625_v5 }
 0x1ee   :  { %v679_v62 = vmul.f32 %v5629_v26, %v6393_v34  ;;  %v5631_v57 = vpop.eup %5630  ;;  %v255_v34 = vadd.f32 %v7442_v3, %v6448_v50 }
 0x1f0   :  { %v6455_v15 = vadd.f32 %v680_v63, %v679_v62 }
 0x1f2   :  { %5632 = vtanh.f32 %v6455_v15 }
 0x1fc   :  { %v5633_v33 = vpop.eup %5632 }
 0x1fd   :  { %v6458_v11 = vmul.f32 %v5633_v33, %v5631_v57 }
 0x1ff   :  { %7440 = vst [vmem:[#allocation16_spill] sm:$0xff] %v6458_v11  ;;  %819 = vmatmul.mubr.f32.vlgmr.msra.gmra.mrb[2].mxu0 %v6458_v11  ;;  %890 = vmatmul.mubr.f32.vlgmr.msra.gmra.mrb[2].mxu1 %v6458_v11 }
 0x200   :  { %4567 = vmatpush1.bf16.msra.mxu0 %v6120_v17  ;;  %4599 = vmatpush1.bf16.msra.mxu1 %v6123_v20  ;;  %v7441_v17 = vld [vmem:[#allocation31_spill] sm:$0xff] }
 0x201   :  { %4569 = vmatprep.subr.bf16.mxu0 %v6128_v24  ;;  %4601 = vmatprep.subr.bf16.mxu1 %v6130_v28  ;;  %v256_v20 = vadd.f32 %v7441_v17, %v6315_v35 }
 0x202   :  { %1054 = vmatprep.mubr.f32.mxu0 %v7426_v45  ;;  %1125 = vmatprep.mubr.f32.mxu1 %v7426_v45 }
 0x204   :  { %4571 = vmatpush1.bf16.msra.mxu0 %v6132_v29  ;;  %4603 = vmatpush1.bf16.msra.mxu1 %v6135_v32 }
 0x205   :  { %4573 = vmatprep.subr.bf16.mxu0 %v6140_v36  ;;  %4605 = vmatprep.subr.bf16.mxu1 %v6142_v40 }
 0x208   :  { %4575 = vmatpush1.bf16.msra.mxu0 %v6144_v41  ;;  %4607 = vmatpush1.bf16.msra.mxu1 %v6147_v44 }
 0x209   :  { %4577 = vmatprep.subr.bf16.mxu0 %v6152_v48  ;;  %4609 = vmatprep.subr.bf16.mxu1 %v6154_v52 }
 0x20c   :  { %4579 = vmatpush1.bf16.msra.mxu0 %v6156_v53  ;;  %4611 = vmatpush1.bf16.msra.mxu1 %v6159_v56 }
 0x20d   :  { %4581 = vmatprep.subr.bf16.mxu0 %v6164_v60  ;;  %4613 = vmatprep.subr.bf16.mxu1 %v6166_v0 }
 0x210   :  { %4583 = vmatpush1.bf16.msra.mxu0 %v6168_v1  ;;  %4615 = vmatpush1.bf16.msra.mxu1 %v6171_v4 }
 0x211   :  { %4585 = vmatprep.subr.bf16.mxu0 %v6176_v8  ;;  %4617 = vmatprep.subr.bf16.mxu1 %v6178_v13 }
 0x214   :  { %4587 = vmatpush1.bf16.msra.mxu0 %v6180_v14  ;;  %4619 = vmatpush1.bf16.msra.mxu1 %v6185_v22 }
 0x215   :  { %4589 = vmatprep.subr.bf16.mxu0 %v6189_v27  ;;  %4621 = vmatprep.subr.bf16.mxu1 %v6191_v30 }
 0x218   :  { %4591 = vmatpush1.bf16.msra.mxu0 %v7427_v21  ;;  %4623 = vmatpush1.bf16.msra.mxu1 %v7428_v42 }
 0x219   :  { %4593 = vmatprep.subr.bf16.mxu0 %v7429_v23  ;;  %4625 = vmatprep.subr.bf16.mxu1 %v7430_v7 }
 0x21c   :  { %4595 = vmatpush1.bf16.msra.mxu0 %v7431_v12  ;;  %4627 = vmatpush1.bf16.msra.mxu1 %v7432_v59 }
 0x2d2   :  { %v820_v24 = vpop.f32.mrb[2].mxu0  ;;  %v891_v28 = vpop.f32.mrb[2].mxu1 }
 0x2d3   :  { %v821_v10 = vadd.f32 %v820_v24, %v7444_v47  ;;  %v892_v19 = vadd.f32 %v891_v28, %v256_v20  ;;  %v822_v46 = vpop.f32.mrb[3].mxu0  ;;  %v893_v54 = vpop.f32.mrb[3].mxu1 }
 0x2d4   :  { %v823_v16 = vadd.f32 %v822_v46, %v255_v34  ;;  %v894_v38 = vadd.f32 %v893_v54, %v257_v6  ;;  %v1165_v54 = vld [vmem:[#allocation4 + $0x38] sm:$0xff] }
 0x2d5   :  { %v4290_v18 = vmul.f32 -1.442695, %v821_v10  ;;  %v1159_v10 = vld [vmem:[#allocation4 + $0x8] sm:$0xff] }
 0x2d6   :  { %v4291_v5 = vmul.f32 -1.442695, %v823_v16  ;;  %v4292_v37 = vmul.f32 -1.442695, %v894_v38  ;;  %v1158_v16 = vld [vmem:[#allocation4] sm:$0xff] }
 0x2d7   :  { %5634 = vpow2.f32 %v4290_v18  ;;  %v1162_v38 = vld [vmem:[#allocation4 + $0x20] sm:$0xff] }
 0x2d8   :  { %5636 = vpow2.f32 %v4291_v5  ;;  %v6515_v5 = vpack.c.bf16 %v1162_v38, %v1158_v16  ;;  %v1408_v38 = vld [vmem:[#allocation4 + $0x70] sm:$0xff] }
 0x2d9   :  { %5638 = vpow2.f32 %v4292_v37  ;;  %v1160_v37 = vld [vmem:[#allocation4 + $0x10] sm:$0xff] }
 0x2da   :  { %5640 = vtanh.f32 %v892_v19  ;;  %v1163_v19 = vld [vmem:[#allocation4 + $0x28] sm:$0xff] }
 0x2db   :  { %v6511_v46 = vpack.c.bf16 %v1163_v19, %v1159_v10 }
 0x2dd   :  { %4629 = vmatprep.subr.bf16.mxu0 %v6511_v46 }
 0x2e1   :  { %v5635_v26 = vpop.eup %5634 }
 0x2e2   :  { %v5637_v63 = vpop.eup %5636  ;;  %v899_v2 = vadd.f32 1.0, %v5635_v26  ;;  %v1164_v26 = vld [vmem:[#allocation4 + $0x30] sm:$0xff] }
 0x2e3   :  { %v905_v62 = vadd.f32 1.0, %v5637_v63  ;;  %v5639_v57 = vpop.eup %5638  ;;  %v6518_v63 = vpack.c.bf16 %v1164_v26, %v1160_v37  ;;  %v1411_v26 = vld [vmem:[#allocation4 + $0x88] sm:$0xff] }
 0x2e4   :  { %5642 = vrcp.f32 %v899_v2  ;;  %v5641_v33 = vpop.eup %5640  ;;  %v912_v28 = vadd.f32 1.0, %v5639_v57  ;;  %v1167_v2 = vld [vmem:[#allocation4 + $0x48] sm:$0xff]  ;;  %v1169_v57 = vld [vmem:[#allocation4 + $0x58] sm:$0xff] }
 0x2e5   :  { %5644 = vrcp.f32 %v905_v62  ;;  %v1171_v62 = vld [vmem:[#allocation4 + $0x68] sm:$0xff] }
 0x2e6   :  { %5646 = vrcp.f32 %v912_v28 }
 0x2ee   :  { %v5643_v17 = vpop.eup %5642 }
 0x2ef   :  { %v5645_v20 = vpop.eup %5644  ;;  %v916_v24 = vmul.f32 %v5643_v17, %v5641_v33  ;;  %v6523_v33 = vpack.c.bf16 %v1171_v62, %v1167_v2  ;;  %v1173_v17 = vld [vmem:[#allocation4 + $0x78] sm:$0xff]  ;;  %v1415_v2 = vld [vmem:[#allocation4 + $0xa8] sm:$0xff] }
 0x2f0   :  { %v915_v3 = vmul.f32 %v5645_v20, %v6455_v15  ;;  %v5647_v55 = vpop.eup %5646  ;;  %v1161_v15 = vld [vmem:[#allocation4 + $0x18] sm:$0xff]  ;;  %v6525_v20 = vpack.c.bf16 %v1173_v17, %v1169_v57  ;;  %v6584_v57 = vpack.c.bf16 %v1415_v2, %v1411_v26  ;;  %v1434_v2 = vld [vmem:[#allocation4 + $0x140] sm:$0xff] }
 0x2f1   :  { %v6513_v18 = vpack.c.bf16 %v1165_v54, %v1161_v15  ;;  %v1406_v15 = vld [vmem:[#allocation4 + $0x60] sm:$0xff]  ;;  %v1404_v54 = vld [vmem:[#allocation4 + $0x50] sm:$0xff]  ;;  %v1413_v62 = vld [vmem:[#allocation4 + $0x98] sm:$0xff] }
 0x2f2   :  { %v6502_v34 = vadd.f32 %v916_v24, %v915_v3  ;;  %v6580_v37 = vpack.c.bf16 %v1408_v38, %v1404_v54  ;;  %v1417_v17 = vld [vmem:[#allocation4 + $0xb8] sm:$0xff] }
 0x2f3   :  { %4661 = vmatprep.subr.bf16.mxu1 %v6513_v18  ;;  %v1437_v54 = vld [vmem:[#allocation4 + $0x158] sm:$0xff] }
 0x2f4   :  { %5648 = vtanh.f32 %v6502_v34  ;;  %v1441_v26 = vld [vmem:[#allocation4 + $0x178] sm:$0xff] }
 0x2fe   :  { %v5649_v6 = vpop.eup %5648 }
 0x2ff   :  { %v6505_v47 = vmul.f32 %v5649_v6, %v5647_v55 }
 0x301   :  { %7445 = vst [vmem:[#allocation17_spill] sm:$0xff] %v6505_v47  ;;  %1055 = vmatmul.mubr.f32.vlgmr.msra.gmra.mrb[4].mxu0 %v6505_v47  ;;  %1126 = vmatmul.mubr.f32.vlgmr.msra.gmra.mrb[4].mxu1 %v6505_v47 }
 0x302   :  { %1290 = vmatprep.mubr.f32.mxu0 %v7426_v45  ;;  %1361 = vmatprep.mubr.f32.mxu1 %v7426_v45 }
 0x303   :  { %4631 = vmatpush1.bf16.msra.mxu0 %v6515_v5  ;;  %4663 = vmatpush1.bf16.msra.mxu1 %v6518_v63 }
 0x304   :  { %4633 = vmatprep.subr.bf16.mxu0 %v6523_v33  ;;  %4665 = vmatprep.subr.bf16.mxu1 %v6525_v20 }
 0x307   :  { %4635 = vmatpush1.bf16.msra.mxu0 %v6132_v29  ;;  %4667 = vmatpush1.bf16.msra.mxu1 %v6135_v32  ;;  %v7446_v29 = vld [vmem:[#allocation34_spill] sm:$0xff] }
 0x308   :  { %4637 = vmatprep.subr.bf16.mxu0 %v6140_v36  ;;  %4669 = vmatprep.subr.bf16.mxu1 %v6142_v40  ;;  %v291_v32 = vadd.f32 %v7446_v29, %v6315_v35  ;;  %v1410_v29 = vld [vmem:[#allocation4 + $0x80] sm:$0xff] }
 0x30b   :  { %4639 = vmatpush1.bf16.msra.mxu0 %v6144_v41  ;;  %4671 = vmatpush1.bf16.msra.mxu1 %v6147_v44  ;;  %v7447_v41 = vld [vmem:[#allocation36_spill] sm:$0xff] }
 0x30c   :  { %4641 = vmatprep.subr.bf16.mxu0 %v6152_v48  ;;  %4673 = vmatprep.subr.bf16.mxu1 %v6154_v52  ;;  %v290_v44 = vadd.f32 %v7447_v41, %v6448_v50  ;;  %v7448_v48 = vld [vmem:[#allocation37_spill] sm:$0xff]  ;;  %v1412_v41 = vld [vmem:[#allocation4 + $0x90] sm:$0xff] }
 0x30d   :  { %v292_v52 = vadd.f32 %v7448_v48, %v7438_v31 }
 0x30f   :  { %4643 = vmatpush1.bf16.msra.mxu0 %v6156_v53  ;;  %4675 = vmatpush1.bf16.msra.mxu1 %v6159_v56  ;;  %v7449_v53 = vld [vmem:[#allocation35_spill] sm:$0xff] }
 0x310   :  { %4645 = vmatprep.subr.bf16.mxu0 %v6164_v60  ;;  %4677 = vmatprep.subr.bf16.mxu1 %v6166_v0 }
 0x313   :  { %4647 = vmatpush1.bf16.msra.mxu0 %v6168_v1  ;;  %4679 = vmatpush1.bf16.msra.mxu1 %v6171_v4 }
 0x314   :  { %4649 = vmatprep.subr.bf16.mxu0 %v6176_v8  ;;  %4681 = vmatprep.subr.bf16.mxu1 %v6178_v13 }
 0x317   :  { %4651 = vmatpush1.bf16.msra.mxu0 %v6180_v14  ;;  %4683 = vmatpush1.bf16.msra.mxu1 %v6185_v22 }
 0x318   :  { %4653 = vmatprep.subr.bf16.mxu0 %v6189_v27  ;;  %4685 = vmatprep.subr.bf16.mxu1 %v6191_v30 }
 0x31b   :  { %4655 = vmatpush1.bf16.msra.mxu0 %v7427_v21  ;;  %4687 = vmatpush1.bf16.msra.mxu1 %v7428_v42 }
 0x31c   :  { %4657 = vmatprep.subr.bf16.mxu0 %v7429_v23  ;;  %4689 = vmatprep.subr.bf16.mxu1 %v7430_v7 }
 0x31f   :  { %4659 = vmatpush1.bf16.msra.mxu0 %v7431_v12  ;;  %4691 = vmatpush1.bf16.msra.mxu1 %v7432_v59 }
 0x320   :  { %4693 = vmatprep.subr.bf16.mxu0 %v6511_v46  ;;  %4725 = vmatprep.subr.bf16.mxu1 %v6513_v18 }
 0x3d4   :  { %v1056_v36 = vpop.f32.mrb[4].mxu0  ;;  %v1127_v40 = vpop.f32.mrb[4].mxu1 }
 0x3d5   :  { %v1057_v56 = vadd.f32 %v1056_v36, %v7449_v53  ;;  %v1128_v60 = vadd.f32 %v1127_v40, %v291_v32  ;;  %v1058_v0 = vpop.f32.mrb[5].mxu0  ;;  %v1129_v1 = vpop.f32.mrb[5].mxu1  ;;  %v1414_v32 = vld [vmem:[#allocation4 + $0xa0] sm:$0xff]  ;;  %v6586_v36 = vpack.c.bf16 %v1417_v17, %v1413_v62  ;;  %v1423_v53 = vld [vmem:[#allocation4 + $0xe8] sm:$0xff]  ;;  %v6622_v17 = vpack.c.bf16 %v1441_v26, %v1437_v54 }
 0x3d6   :  { %v1059_v4 = vadd.f32 %v1058_v0, %v290_v44  ;;  %v1130_v8 = vadd.f32 %v1129_v1, %v292_v52  ;;  %v6588_v40 = vpack.c.bf16 %v1414_v32, %v1410_v29  ;;  %v1416_v44 = vld [vmem:[#allocation4 + $0xb0] sm:$0xff]  ;;  %v1419_v52 = vld [vmem:[#allocation4 + $0xc8] sm:$0xff]  ;;  %v1425_v0 = vld [vmem:[#allocation4 + $0xf8] sm:$0xff] }
 0x3d7   :  { %v4293_v13 = vmul.f32 -1.442695, %v1057_v56  ;;  %v6591_v48 = vpack.c.bf16 %v1416_v44, %v1412_v41  ;;  %v1421_v56 = vld [vmem:[#allocation4 + $0xd8] sm:$0xff]  ;;  %v1418_v1 = vld [vmem:[#allocation4 + $0xc0] sm:$0xff]  ;;  %v1436_v32 = vld [vmem:[#allocation4 + $0x150] sm:$0xff] }
 0x3d8   :  { %v4294_v14 = vmul.f32 -1.442695, %v1059_v4  ;;  %v4295_v22 = vmul.f32 -1.442695, %v1130_v8  ;;  %v1422_v4 = vld [vmem:[#allocation4 + $0xe0] sm:$0xff]  ;;  %v6598_v8 = vpack.c.bf16 %v1425_v0, %v1421_v56  ;;  %v1440_v41 = vld [vmem:[#allocation4 + $0x170] sm:$0xff] }
 0x3d9   :  { %5650 = vpow2.f32 %v4293_v13  ;;  %v6600_v13 = vpack.c.bf16 %v1422_v4, %v1418_v1  ;;  %v1438_v62 = vld [vmem:[#allocation4 + $0x160] sm:$0xff]  ;;  %v6627_v44 = vpack.c.bf16 %v1440_v41, %v1436_v32  ;;  %v1445_v56 = vld [vmem:[#allocation4 + $0x198] sm:$0xff]  ;;  %v1456_v32 = vld [vmem:[#allocation4 + $0x1f0] sm:$0xff] }
 0x3da   :  { %5652 = vpow2.f32 %v4294_v14  ;;  %v1420_v14 = vld [vmem:[#allocation4 + $0xd0] sm:$0xff]  ;;  %v6624_v29 = vpack.c.bf16 %v1438_v62, %v1434_v2  ;;  %v1449_v1 = vld [vmem:[#allocation4 + $0x1b8] sm:$0xff]  ;;  %v1442_v4 = vld [vmem:[#allocation4 + $0x180] sm:$0xff] }
 0x3db   :  { %5654 = vpow2.f32 %v4295_v22  ;;  %v1424_v22 = vld [vmem:[#allocation4 + $0xf0] sm:$0xff]  ;;  %v1454_v54 = vld [vmem:[#allocation4 + $0x1e0] sm:$0xff] }
 0x3dc   :  { %5656 = vtanh.f32 %v1128_v60  ;;  %v6596_v60 = vpack.c.bf16 %v1423_v53, %v1419_v52  ;;  %v1443_v52 = vld [vmem:[#allocation4 + $0x188] sm:$0xff]  ;;  %v1452_v62 = vld [vmem:[#allocation4 + $0x1d0] sm:$0xff] }
 0x3dd   :  { %v1447_v53 = vld [vmem:[#allocation4 + $0x1a8] sm:$0xff]  ;;  %v6651_v41 = vpack.c.bf16 %v1456_v32, %v1452_v62 }
 0x3de   :  { %v6632_v0 = vpack.c.bf16 %v1447_v53, %v1443_v52  ;;  %v7451_v52 = vld [vmem:[#allocation39_spill] sm:$0xff] }
 0x3df   :  { %v324_v53 = vadd.f32 %v7451_v52, %v6315_v35 }
 0x3e3   :  { %v5651_v27 = vpop.eup %5650 }
 0x3e4   :  { %v5653_v30 = vpop.eup %5652  ;;  %v1135_v21 = vadd.f32 1.0, %v5651_v27  ;;  %v6603_v27 = vpack.c.bf16 %v1424_v22, %v1420_v14  ;;  %v1446_v14 = vld [vmem:[#allocation4 + $0x1a0] sm:$0xff]  ;;  %v6634_v22 = vpack.c.bf16 %v1449_v1, %v1445_v56 }
 0x3e5   :  { %v1141_v42 = vadd.f32 1.0, %v5653_v30  ;;  %v5655_v23 = vpop.eup %5654  ;;  %v1427_v30 = vld [vmem:[#allocation4 + $0x108] sm:$0xff] }
 0x3e6   :  { %5658 = vrcp.f32 %v1135_v21  ;;  %v5657_v7 = vpop.eup %5656  ;;  %v1148_v28 = vadd.f32 1.0, %v5655_v23  ;;  %v1431_v21 = vld [vmem:[#allocation4 + $0x128] sm:$0xff] }
 0x3e7   :  { %5660 = vrcp.f32 %v1141_v42  ;;  %v1429_v42 = vld [vmem:[#allocation4 + $0x118] sm:$0xff]  ;;  %v6608_v23 = vpack.c.bf16 %v1431_v21, %v1427_v30  ;;  %v6636_v30 = vpack.c.bf16 %v1446_v14, %v1442_v4  ;;  %v1444_v21 = vld [vmem:[#allocation4 + $0x190] sm:$0xff] }
 0x3e8   :  { %5662 = vrcp.f32 %v1148_v28  ;;  %v7452_v4 = vld [vmem:[#allocation40_spill] sm:$0xff] }
 0x3e9   :  { %v323_v14 = vadd.f32 %v7452_v4, %v6448_v50 }
 0x3f0   :  { %v5659_v12 = vpop.eup %5658 }
 0x3f1   :  { %v5661_v59 = vpop.eup %5660  ;;  %v1152_v24 = vmul.f32 %v5659_v12, %v5657_v7  ;;  %v1433_v7 = vld [vmem:[#allocation4 + $0x138] sm:$0xff]  ;;  %v1426_v12 = vld [vmem:[#allocation4 + $0x100] sm:$0xff] }
 0x3f2   :  { %v1151_v3 = vmul.f32 %v5661_v59, %v6502_v34  ;;  %v5663_v6 = vpop.eup %5662  ;;  %v1402_v34 = vld [vmem:[#allocation4 + $0x40] sm:$0xff] }
 0x3f3   :  { %v6578_v16 = vpack.c.bf16 %v1406_v15, %v1402_v34  ;;  %v1430_v59 = vld [vmem:[#allocation4 + $0x120] sm:$0xff]  ;;  %v1435_v34 = vld [vmem:[#allocation4 + $0x148] sm:$0xff] }
 0x3f4   :  { %v6565_v55 = vadd.f32 %v1152_v24, %v1151_v3  ;;  %v6610_v24 = vpack.c.bf16 %v1433_v7, %v1429_v42  ;;  %v6612_v28 = vpack.c.bf16 %v1430_v59, %v1426_v12  ;;  %v1428_v3 = vld [vmem:[#allocation4 + $0x110] sm:$0xff]  ;;  %v1439_v15 = vld [vmem:[#allocation4 + $0x168] sm:$0xff] }
 0x3f5   :  { %v6620_v38 = vpack.c.bf16 %v1439_v15, %v1435_v34  ;;  %v1448_v42 = vld [vmem:[#allocation4 + $0x1b0] sm:$0xff]  ;;  %v1451_v12 = vld [vmem:[#allocation4 + $0x1c8] sm:$0xff]  ;;  %v1457_v34 = vld [vmem:[#allocation4 + $0x1f8] sm:$0xff] }
 0x3f6   :  { %5664 = vtanh.f32 %v6565_v55  ;;  %v6639_v7 = vpack.c.bf16 %v1448_v42, %v1444_v21  ;;  %v1455_v59 = vld [vmem:[#allocation4 + $0x1e8] sm:$0xff]  ;;  %v1450_v15 = vld [vmem:[#allocation4 + $0x1c0] sm:$0xff]  ;;  %v7453_v21 = vld [vmem:[#allocation41_spill] sm:$0xff] }
 0x3f7   :  { %v6648_v2 = vpack.c.bf16 %v1454_v54, %v1450_v15  ;;  %v325_v42 = vadd.f32 %v7453_v21, %v7438_v31 }
 0x400   :  { %v5665_v10 = vpop.eup %5664 }
 0x401   :  { %v6568_v19 = vmul.f32 %v5665_v10, %v5663_v6  ;;  %v1432_v6 = vld [vmem:[#allocation4 + $0x130] sm:$0xff] }
 0x402   :  { %v6615_v10 = vpack.c.bf16 %v1432_v6, %v1428_v3  ;;  %v1453_v3 = vld [vmem:[#allocation4 + $0x1d8] sm:$0xff]  ;;  %v6643_v6 = vpack.c.bf16 %v1455_v59, %v1451_v12  ;;  %v7454_v12 = vld [vmem:[#allocation38_spill] sm:$0xff] }
 0x403   :  { %7450 = vst [vmem:[#allocation18_spill] sm:$0xff] %v6568_v19  ;;  %1291 = vmatmul.mubr.f32.vlgmr.msra.gmra.mrb[6].mxu0 %v6568_v19  ;;  %1362 = vmatmul.mubr.f32.vlgmr.msra.gmra.mrb[6].mxu1 %v6568_v19  ;;  %v6646_v26 = vpack.c.bf16 %v1457_v34, %v1453_v3 }
 0x404   :  { %4695 = vmatpush1.bf16.msra.mxu0 %v6515_v5  ;;  %4727 = vmatpush1.bf16.msra.mxu1 %v6518_v63 }
 0x405   :  { %4697 = vmatprep.subr.bf16.mxu0 %v6523_v33  ;;  %4729 = vmatprep.subr.bf16.mxu1 %v6525_v20 }
 0x406   :  { %1526 = vmatprep.mubr.f32.mxu0 %v7426_v45  ;;  %1597 = vmatprep.mubr.f32.mxu1 %v7426_v45 }
 0x408   :  { %4699 = vmatpush1.bf16.msra.mxu0 %v6578_v16  ;;  %4731 = vmatpush1.bf16.msra.mxu1 %v6580_v37 }
 0x409   :  { %4701 = vmatprep.subr.bf16.mxu0 %v6584_v57  ;;  %4733 = vmatprep.subr.bf16.mxu1 %v6586_v36 }
 0x40c   :  { %4703 = vmatpush1.bf16.msra.mxu0 %v6588_v40  ;;  %4735 = vmatpush1.bf16.msra.mxu1 %v6591_v48 }
 0x40d   :  { %4705 = vmatprep.subr.bf16.mxu0 %v6596_v60  ;;  %4737 = vmatprep.subr.bf16.mxu1 %v6598_v8 }
 0x410   :  { %4707 = vmatpush1.bf16.msra.mxu0 %v6600_v13  ;;  %4739 = vmatpush1.bf16.msra.mxu1 %v6603_v27 }
 0x411   :  { %4709 = vmatprep.subr.bf16.mxu0 %v6608_v23  ;;  %4741 = vmatprep.subr.bf16.mxu1 %v6610_v24 }
 0x414   :  { %4711 = vmatpush1.bf16.msra.mxu0 %v6612_v28  ;;  %4743 = vmatpush1.bf16.msra.mxu1 %v6615_v10 }
 0x415   :  { %4713 = vmatprep.subr.bf16.mxu0 %v6620_v38  ;;  %4745 = vmatprep.subr.bf16.mxu1 %v6622_v17 }
 0x418   :  { %4715 = vmatpush1.bf16.msra.mxu0 %v6624_v29  ;;  %4747 = vmatpush1.bf16.msra.mxu1 %v6627_v44 }
 0x419   :  { %4717 = vmatprep.subr.bf16.mxu0 %v6632_v0  ;;  %4749 = vmatprep.subr.bf16.mxu1 %v6634_v22 }
 0x41c   :  { %4719 = vmatpush1.bf16.msra.mxu0 %v6636_v30  ;;  %4751 = vmatpush1.bf16.msra.mxu1 %v6639_v7 }
 0x41d   :  { %4721 = vmatprep.subr.bf16.mxu0 %v6643_v6  ;;  %4753 = vmatprep.subr.bf16.mxu1 %v6646_v26 }
 0x420   :  { %4723 = vmatpush1.bf16.msra.mxu0 %v6648_v2  ;;  %4755 = vmatpush1.bf16.msra.mxu1 %v6651_v41 }
 0x421   :  { %4757 = vmatprep.subr.bf16.mxu0 %v6511_v46  ;;  %4789 = vmatprep.subr.bf16.mxu1 %v6513_v18 }
 0x4d6   :  { %v1292_v56 = vpop.f32.mrb[6].mxu0  ;;  %v1363_v1 = vpop.f32.mrb[6].mxu1 }
 0x4d7   :  { %v1293_v59 = vadd.f32 %v1292_v56, %v7454_v12  ;;  %v1364_v3 = vadd.f32 %v1363_v1, %v324_v53  ;;  %v1294_v34 = vpop.f32.mrb[7].mxu0  ;;  %v1365_v15 = vpop.f32.mrb[7].mxu1 }
 0x4d8   :  { %v1295_v54 = vadd.f32 %v1294_v34, %v323_v14  ;;  %v1366_v62 = vadd.f32 %v1365_v15, %v325_v42  ;;  %v356_v15 = vadd.f32 %v6371_v58, %v6448_v50 }
 0x4d9   :  { %v4296_v32 = vmul.f32 -1.442695, %v1293_v59 }
 0x4da   :  { %v4297_v25 = vmul.f32 -1.442695, %v1295_v54  ;;  %v4298_v52 = vmul.f32 -1.442695, %v1366_v62  ;;  %v358_v54 = vadd.f32 %v6373_v51, %v7438_v31  ;;  %v7456_v62 = vld [vmem:[#allocation43_spill] sm:$0xff] }
 0x4db   :  { %5666 = vpow2.f32 %v4296_v32 }
 0x4dc   :  { %5668 = vpow2.f32 %v4297_v25 }
 0x4dd   :  { %5670 = vpow2.f32 %v4298_v52 }
 0x4de   :  { %5672 = vtanh.f32 %v1364_v3 }
 0x4e5   :  { %v5667_v19 = vpop.eup %5666 }
 0x4e6   :  { %v5669_v47 = vpop.eup %5668  ;;  %v1371_v11 = vadd.f32 1.0, %v5667_v19 }
 0x4e7   :  { %v1377_v4 = vadd.f32 1.0, %v5669_v47  ;;  %v5671_v21 = vpop.eup %5670 }
 0x4e8   :  { %5674 = vrcp.f32 %v1371_v11  ;;  %v5673_v56 = vpop.eup %5672  ;;  %v1384_v14 = vadd.f32 1.0, %v5671_v21  ;;  %v7455_v11 = vld [vmem:[#allocation42_spill] sm:$0xff] }
 0x4e9   :  { %5676 = vrcp.f32 %v1377_v4  ;;  %v357_v47 = vadd.f32 %v7455_v11, %v6315_v35 }
 0x4ea   :  { %5678 = vrcp.f32 %v1384_v14 }
 0x4f2   :  { %v5675_v53 = vpop.eup %5674 }
 0x4f3   :  { %v5677_v1 = vpop.eup %5676  ;;  %v1388_v12 = vmul.f32 %v5675_v53, %v5673_v56 }
 0x4f4   :  { %v1387_v42 = vmul.f32 %v5677_v1, %v6565_v55  ;;  %v5679_v25 = vpop.eup %5678 }
 0x4f6   :  { %v6666_v59 = vadd.f32 %v1388_v12, %v1387_v42 }
 0x4f8   :  { %5680 = vtanh.f32 %v6666_v59 }
 0x502   :  { %v5681_v19 = vpop.eup %5680 }
 0x503   :  { %v6669_v34 = vmul.f32 %v5681_v19, %v5679_v25 }
 0x505   :  { %1527 = vmatmul.mubr.f32.vlgmr.msra.gmra.mrb[8].mxu0 %v6669_v34  ;;  %1598 = vmatmul.mubr.f32.vlgmr.msra.gmra.mrb[8].mxu1 %v6669_v34 }
 0x506   :  { %4759 = vmatpush1.bf16.msra.mxu0 %v6515_v5  ;;  %4791 = vmatpush1.bf16.msra.mxu1 %v6518_v63 }
 0x507   :  { %4761 = vmatprep.subr.bf16.mxu0 %v6523_v33  ;;  %4793 = vmatprep.subr.bf16.mxu1 %v6525_v20 }
 0x508   :  { %1762 = vmatprep.mubr.f32.mxu0 %v7426_v45  ;;  %1833 = vmatprep.mubr.f32.mxu1 %v7426_v45 }
 0x50a   :  { %4763 = vmatpush1.bf16.msra.mxu0 %v6578_v16  ;;  %4795 = vmatpush1.bf16.msra.mxu1 %v6580_v37 }
 0x50b   :  { %4765 = vmatprep.subr.bf16.mxu0 %v6584_v57  ;;  %4797 = vmatprep.subr.bf16.mxu1 %v6586_v36 }
 0x50e   :  { %4767 = vmatpush1.bf16.msra.mxu0 %v6588_v40  ;;  %4799 = vmatpush1.bf16.msra.mxu1 %v6591_v48 }
 0x50f   :  { %4769 = vmatprep.subr.bf16.mxu0 %v6596_v60  ;;  %4801 = vmatprep.subr.bf16.mxu1 %v6598_v8 }
 0x512   :  { %4771 = vmatpush1.bf16.msra.mxu0 %v6600_v13  ;;  %4803 = vmatpush1.bf16.msra.mxu1 %v6603_v27 }
 0x513   :  { %4773 = vmatprep.subr.bf16.mxu0 %v6608_v23  ;;  %4805 = vmatprep.subr.bf16.mxu1 %v6610_v24 }
 0x516   :  { %4775 = vmatpush1.bf16.msra.mxu0 %v6612_v28  ;;  %4807 = vmatpush1.bf16.msra.mxu1 %v6615_v10 }
 0x517   :  { %4777 = vmatprep.subr.bf16.mxu0 %v6620_v38  ;;  %4809 = vmatprep.subr.bf16.mxu1 %v6622_v17 }
 0x51a   :  { %4779 = vmatpush1.bf16.msra.mxu0 %v6624_v29  ;;  %4811 = vmatpush1.bf16.msra.mxu1 %v6627_v44 }
 0x51b   :  { %4781 = vmatprep.subr.bf16.mxu0 %v6632_v0  ;;  %4813 = vmatprep.subr.bf16.mxu1 %v6634_v22 }
 0x51e   :  { %4783 = vmatpush1.bf16.msra.mxu0 %v6636_v30  ;;  %4815 = vmatpush1.bf16.msra.mxu1 %v6639_v7 }
 0x51f   :  { %4785 = vmatprep.subr.bf16.mxu0 %v6643_v6  ;;  %4817 = vmatprep.subr.bf16.mxu1 %v6646_v26 }
 0x522   :  { %4787 = vmatpush1.bf16.msra.mxu0 %v6648_v2  ;;  %4819 = vmatpush1.bf16.msra.mxu1 %v6651_v41 }
 0x523   :  { %4821 = vmatprep.subr.bf16.mxu0 %v6511_v46  ;;  %4853 = vmatprep.subr.bf16.mxu1 %v6513_v18 }
 0x5d8   :  { %v1528_v55 = vpop.f32.mrb[8].mxu0  ;;  %v1599_v3 = vpop.f32.mrb[8].mxu1 }
 0x5d9   :  { %v1529_v32 = vadd.f32 %v1528_v55, %v7456_v62  ;;  %v1600_v52 = vadd.f32 %v1599_v3, %v357_v47  ;;  %v1530_v4 = vpop.f32.mrb[9].mxu0  ;;  %v1601_v21 = vpop.f32.mrb[9].mxu1 }
 0x5da   :  { %v1531_v56 = vadd.f32 %v1530_v4, %v356_v15  ;;  %v1602_v46 = vadd.f32 %v1601_v21, %v358_v54  ;;  %v2120_v4 = vld [vmem:[#allocation6 + $0x48] sm:$0xff] }
 0x5db   :  { %v4299_v53 = vmul.f32 -1.442695, %v1529_v32  ;;  %v2124_v21 = vld [vmem:[#allocation6 + $0x68] sm:$0xff] }
 0x5dc   :  { %v4300_v18 = vmul.f32 -1.442695, %v1531_v56  ;;  %v4301_v1 = vmul.f32 -1.442695, %v1602_v46  ;;  %v2122_v56 = vld [vmem:[#allocation6 + $0x58] sm:$0xff] }
 0x5dd   :  { %5682 = vpow2.f32 %v4299_v53  ;;  %v2126_v46 = vld [vmem:[#allocation6 + $0x78] sm:$0xff] }
 0x5de   :  { %5684 = vpow2.f32 %v4300_v18 }
 0x5df   :  { %5686 = vpow2.f32 %v4301_v1 }
 0x5e0   :  { %5688 = vtanh.f32 %v1600_v52  ;;  %v2117_v52 = vld [vmem:[#allocation6 + $0x30] sm:$0xff] }
 0x5e7   :  { %v5683_v12 = vpop.eup %5682 }
 0x5e8   :  { %v5685_v14 = vpop.eup %5684  ;;  %v1607_v42 = vadd.f32 1.0, %v5683_v12 }
 0x5e9   :  { %v1613_v58 = vadd.f32 1.0, %v5685_v14  ;;  %v5687_v51 = vpop.eup %5686  ;;  %v2119_v14 = vld [vmem:[#allocation6 + $0x40] sm:$0xff] }
 0x5ea   :  { %5690 = vrcp.f32 %v1607_v42  ;;  %v5689_v25 = vpop.eup %5688  ;;  %v1620_v55 = vadd.f32 1.0, %v5687_v51  ;;  %v2123_v42 = vld [vmem:[#allocation6 + $0x60] sm:$0xff]  ;;  %v4888_v51 = vpack.c.bf16 %v2124_v21, %v2120_v4 }
 0x5eb   :  { %5692 = vrcp.f32 %v1613_v58  ;;  %v2151_v21 = vld [vmem:[#allocation6 + $0x140] sm:$0xff] }
 0x5ec   :  { %5694 = vrcp.f32 %v1620_v55  ;;  %v2132_v55 = vld [vmem:[#allocation6 + $0xa8] sm:$0xff] }
 0x5f4   :  { %v5691_v19 = vpop.eup %5690 }
 0x5f5   :  { %v5693_v11 = vpop.eup %5692  ;;  %v1624_v47 = vmul.f32 %v5691_v19, %v5689_v25  ;;  %v4920_v25 = vpack.c.bf16 %v2126_v46, %v2122_v56  ;;  %v2121_v19 = vld [vmem:[#allocation6 + $0x50] sm:$0xff]  ;;  %v2155_v56 = vld [vmem:[#allocation6 + $0x160] sm:$0xff] }
 0x5f6   :  { %v1623_v3 = vmul.f32 %v5693_v11, %v6666_v59  ;;  %v5695_v54 = vpop.eup %5694  ;;  %v2113_v59 = vld [vmem:[#allocation6 + $0x10] sm:$0xff] }
 0x5f7   :  { %v4918_v12 = vpack.c.bf16 %v2117_v52, %v2113_v59  ;;  %v2125_v11 = vld [vmem:[#allocation6 + $0x70] sm:$0xff]  ;;  %v2158_v59 = vld [vmem:[#allocation6 + $0x178] sm:$0xff] }
 0x5f8   :  { %v6715_v15 = vadd.f32 %v1624_v47, %v1623_v3  ;;  %v2128_v47 = vld [vmem:[#allocation6 + $0x88] sm:$0xff]  ;;  %v2130_v3 = vld [vmem:[#allocation6 + $0x98] sm:$0xff] }
 0x5fa   :  { %5696 = vtanh.f32 %v6715_v15 }
 0x604   :  { %v5697_v62 = vpop.eup %5696 }
 0x605   :  { %v6718_v32 = vmul.f32 %v5697_v62, %v5695_v54  ;;  %v4890_v54 = vpack.c.bf16 %v2123_v42, %v2119_v14  ;;  %v4922_v62 = vpack.c.bf16 %v2125_v11, %v2121_v19  ;;  %v2164_v14 = vld [vmem:[#allocation6 + $0x1a8] sm:$0xff]  ;;  %v2162_v42 = vld [vmem:[#allocation6 + $0x198] sm:$0xff]  ;;  %v2159_v11 = vld [vmem:[#allocation6 + $0x180] sm:$0xff] }
 0x607   :  { %1763 = vmatmul.mubr.f32.vlgmr.msra.gmra.mrb[10].mxu0 %v6718_v32  ;;  %1834 = vmatmul.mubr.f32.vlgmr.msra.gmra.mrb[10].mxu1 %v6718_v32 }
 0x608   :  { %4823 = vmatpush1.bf16.msra.mxu0 %v6515_v5  ;;  %4855 = vmatpush1.bf16.msra.mxu1 %v6518_v63  ;;  %v2112_v5 = vld [vmem:[#allocation6 + $0x8] sm:$0xff] }
 0x609   :  { %4825 = vmatprep.subr.bf16.mxu0 %v6523_v33  ;;  %4857 = vmatprep.subr.bf16.mxu1 %v6525_v20  ;;  %v2116_v63 = vld [vmem:[#allocation6 + $0x28] sm:$0xff]  ;;  %v2114_v33 = vld [vmem:[#allocation6 + $0x18] sm:$0xff] }
 0x60a   :  { %1998 = vmatprep.mubr.f32.mxu0 %v7426_v45  ;;  %2069 = vmatprep.mubr.f32.mxu1 %v7426_v45  ;;  %v4884_v20 = vpack.c.bf16 %v2116_v63, %v2112_v5  ;;  %v2127_v5 = vld [vmem:[#allocation6 + $0x80] sm:$0xff] }
 0x60b   :  { %v2131_v63 = vld [vmem:[#allocation6 + $0xa0] sm:$0xff] }
 0x60c   :  { %4827 = vmatpush1.bf16.msra.mxu0 %v6578_v16  ;;  %4859 = vmatpush1.bf16.msra.mxu1 %v6580_v37  ;;  %v2118_v16 = vld [vmem:[#allocation6 + $0x38] sm:$0xff] }
 0x60d   :  { %4829 = vmatprep.subr.bf16.mxu0 %v6584_v57  ;;  %4861 = vmatprep.subr.bf16.mxu1 %v6586_v36  ;;  %v4916_v37 = vpack.c.bf16 %v2118_v16, %v2114_v33  ;;  %v390_v57 = vadd.f32 %v6375_v61, %v6315_v35  ;;  %v4892_v33 = vpack.c.bf16 %v2132_v55, %v2128_v47  ;;  %v2129_v16 = vld [vmem:[#allocation6 + $0x90] sm:$0xff]  ;;  %v2163_v47 = vld [vmem:[#allocation6 + $0x1a0] sm:$0xff] }
 0x610   :  { %4831 = vmatpush1.bf16.msra.mxu0 %v6588_v40  ;;  %4863 = vmatpush1.bf16.msra.mxu1 %v6591_v48  ;;  %v389_v48 = vadd.f32 %v6377_v39, %v6448_v50 }
 0x611   :  { %4833 = vmatprep.subr.bf16.mxu0 %v6596_v60  ;;  %4865 = vmatprep.subr.bf16.mxu1 %v6598_v8  ;;  %v391_v60 = vadd.f32 %v6379_v49, %v7438_v31 }
 0x614   :  { %4835 = vmatpush1.bf16.msra.mxu0 %v6600_v13  ;;  %4867 = vmatpush1.bf16.msra.mxu1 %v6603_v27 }
 0x615   :  { %4837 = vmatprep.subr.bf16.mxu0 %v6608_v23  ;;  %4869 = vmatprep.subr.bf16.mxu1 %v6610_v24 }
 0x618   :  { %4839 = vmatpush1.bf16.msra.mxu0 %v6612_v28  ;;  %4871 = vmatpush1.bf16.msra.mxu1 %v6615_v10 }
 0x619   :  { %4841 = vmatprep.subr.bf16.mxu0 %v6620_v38  ;;  %4873 = vmatprep.subr.bf16.mxu1 %v6622_v17 }
 0x61c   :  { %4843 = vmatpush1.bf16.msra.mxu0 %v6624_v29  ;;  %4875 = vmatpush1.bf16.msra.mxu1 %v6627_v44 }
 0x61d   :  { %4845 = vmatprep.subr.bf16.mxu0 %v6632_v0  ;;  %4877 = vmatprep.subr.bf16.mxu1 %v6634_v22 }
 0x620   :  { %4847 = vmatpush1.bf16.msra.mxu0 %v6636_v30  ;;  %4879 = vmatpush1.bf16.msra.mxu1 %v6639_v7 }
 0x621   :  { %4849 = vmatprep.subr.bf16.mxu0 %v6643_v6  ;;  %4881 = vmatprep.subr.bf16.mxu1 %v6646_v26 }
 0x624   :  { %4851 = vmatpush1.bf16.msra.mxu0 %v6648_v2  ;;  %4883 = vmatpush1.bf16.msra.mxu1 %v6651_v41  ;;  %v2111_v2 = vld [vmem:[#allocation6] sm:$0xff] }
 0x625   :  { %4885 = vmatprep.subr.bf16.mxu0 %v4884_v20  ;;  %4917 = vmatprep.subr.bf16.mxu1 %v4916_v37  ;;  %v2115_v41 = vld [vmem:[#allocation6 + $0x20] sm:$0xff]  ;;  %v2133_v37 = vld [vmem:[#allocation6 + $0xb0] sm:$0xff] }
 0x626   :  { %v4886_v1 = vpack.c.bf16 %v2115_v41, %v2111_v2  ;;  %v2156_v2 = vld [vmem:[#allocation6 + $0x168] sm:$0xff]  ;;  %v2154_v41 = vld [vmem:[#allocation6 + $0x158] sm:$0xff] }
 0x6da   :  { %v1764_v36 = vpop.f32.mrb[10].mxu0  ;;  %v1835_v40 = vpop.f32.mrb[10].mxu1 }
 0x6db   :  { %v1765_v8 = vadd.f32 %v1764_v36, %v6382_v9  ;;  %v1836_v13 = vadd.f32 %v1835_v40, %v390_v57  ;;  %v1766_v27 = vpop.f32.mrb[11].mxu0  ;;  %v1837_v23 = vpop.f32.mrb[11].mxu1  ;;  %v2136_v57 = vld [vmem:[#allocation6 + $0xc8] sm:$0xff]  ;;  %v2138_v40 = vld [vmem:[#allocation6 + $0xd8] sm:$0xff] }
 0x6dc   :  { %v1767_v24 = vadd.f32 %v1766_v27, %v389_v48  ;;  %v1838_v28 = vadd.f32 %v1837_v23, %v391_v60  ;;  %v2140_v36 = vld [vmem:[#allocation6 + $0xe8] sm:$0xff]  ;;  %v2142_v48 = vld [vmem:[#allocation6 + $0xf8] sm:$0xff]  ;;  %v4894_v60 = vpack.c.bf16 %v2131_v63, %v2127_v5  ;;  %v2139_v27 = vld [vmem:[#allocation6 + $0xe0] sm:$0xff] }
 0x6dd   :  { %v4302_v10 = vmul.f32 -1.442695, %v1765_v8  ;;  %v4926_v8 = vpack.c.bf16 %v2133_v37, %v2129_v16  ;;  %v4896_v23 = vpack.c.bf16 %v2140_v36, %v2136_v57  ;;  %v2172_v5 = vld [vmem:[#allocation6 + $0x1e8] sm:$0xff]  ;;  %v2170_v63 = vld [vmem:[#allocation6 + $0x1d8] sm:$0xff]  ;;  %v2167_v37 = vld [vmem:[#allocation6 + $0x1c0] sm:$0xff] }
 0x6de   :  { %v4303_v38 = vmul.f32 -1.442695, %v1767_v24  ;;  %v4304_v61 = vmul.f32 -1.442695, %v1838_v28  ;;  %v4928_v24 = vpack.c.bf16 %v2142_v48, %v2138_v40  ;;  %v2137_v28 = vld [vmem:[#allocation6 + $0xd0] sm:$0xff]  ;;  %v2171_v40 = vld [vmem:[#allocation6 + $0x1e0] sm:$0xff] }
 0x6df   :  { %5698 = vpow2.f32 %v4302_v10  ;;  %v2141_v10 = vld [vmem:[#allocation6 + $0xf0] sm:$0xff] }
 0x6e0   :  { %5700 = vpow2.f32 %v4303_v38  ;;  %v2144_v38 = vld [vmem:[#allocation6 + $0x108] sm:$0xff]  ;;  %v2169_v48 = vld [vmem:[#allocation6 + $0x1d0] sm:$0xff] }
 0x6e1   :  { %5702 = vpow2.f32 %v4304_v61  ;;  %v2148_v61 = vld [vmem:[#allocation6 + $0x128] sm:$0xff] }
 0x6e2   :  { %5704 = vtanh.f32 %v1836_v13  ;;  %v2135_v13 = vld [vmem:[#allocation6 + $0xc0] sm:$0xff] }
 0x6e9   :  { %v5699_v17 = vpop.eup %5698 }
 0x6ea   :  { %v5701_v29 = vpop.eup %5700  ;;  %v1843_v44 = vadd.f32 1.0, %v5699_v17  ;;  %v2146_v17 = vld [vmem:[#allocation6 + $0x118] sm:$0xff] }
 0x6eb   :  { %v1849_v39 = vadd.f32 1.0, %v5701_v29  ;;  %v5703_v49 = vpop.eup %5702  ;;  %v2150_v29 = vld [vmem:[#allocation6 + $0x138] sm:$0xff] }
 0x6ec   :  { %5706 = vrcp.f32 %v1843_v44  ;;  %v5705_v9 = vpop.eup %5704  ;;  %v1856_v7 = vadd.f32 1.0, %v5703_v49  ;;  %v4898_v44 = vpack.c.bf16 %v2139_v27, %v2135_v13  ;;  %v2143_v49 = vld [vmem:[#allocation6 + $0x100] sm:$0xff]  ;;  %v7457_v27 = vld [vmem:[#allocation16_spill] sm:$0xff] }
 0x6ed   :  { %5708 = vrcp.f32 %v1849_v39  ;;  %v4930_v39 = vpack.c.bf16 %v2141_v10, %v2137_v28  ;;  %v2402_v28 = vld [vmem:[#allocation8 + $0x8] sm:$0xff] }
 0x6ee   :  { %5710 = vrcp.f32 %v1856_v7  ;;  %v2149_v7 = vld [vmem:[#allocation6 + $0x130] sm:$0xff]  ;;  %v2406_v10 = vld [vmem:[#allocation8 + $0x28] sm:$0xff] }
 0x6f6   :  { %v5707_v0 = vpop.eup %5706 }
 0x6f7   :  { %v5709_v22 = vpop.eup %5708  ;;  %v1860_v30 = vmul.f32 %v5707_v0, %v5705_v9  ;;  %v2147_v9 = vld [vmem:[#allocation6 + $0x120] sm:$0xff]  ;;  %v4900_v0 = vpack.c.bf16 %v2148_v61, %v2144_v38  ;;  %v2404_v38 = vld [vmem:[#allocation8 + $0x18] sm:$0xff]  ;;  %v4948_v61 = vpack.c.bf16 %v2406_v10, %v2402_v28 }
 0x6f8   :  { %v1859_v6 = vmul.f32 %v5709_v22, %v6715_v15  ;;  %v5711_v53 = vpop.eup %5710  ;;  %v2134_v15 = vld [vmem:[#allocation6 + $0xb8] sm:$0xff]  ;;  %v4932_v22 = vpack.c.bf16 %v2150_v29, %v2146_v17  ;;  %v4902_v52 = vpack.c.bf16 %v2147_v9, %v2143_v49  ;;  %v2401_v17 = vld [vmem:[#allocation8] sm:$0xff]  ;;  %v2403_v9 = vld [vmem:[#allocation8 + $0x10] sm:$0xff] }
 0x6f9   :  { %v4924_v20 = vpack.c.bf16 %v2134_v15, %v2130_v3  ;;  %v2161_v15 = vld [vmem:[#allocation6 + $0x190] sm:$0xff]  ;;  %v2405_v29 = vld [vmem:[#allocation8 + $0x20] sm:$0xff]  ;;  %v2436_v10 = vld [vmem:[#allocation8 + $0x118] sm:$0xff] }
 0x6fa   :  { %v6762_v26 = vadd.f32 %v1860_v30, %v1859_v6  ;;  %v2145_v30 = vld [vmem:[#allocation6 + $0x110] sm:$0xff]  ;;  %v2152_v6 = vld [vmem:[#allocation6 + $0x148] sm:$0xff]  ;;  %v2437_v28 = vld [vmem:[#allocation8 + $0x120] sm:$0xff] }
 0x6fb   :  { %v4934_v4 = vpack.c.bf16 %v2149_v7, %v2145_v30  ;;  %v4904_v46 = vpack.c.bf16 %v2156_v2, %v2152_v6  ;;  %v2410_v30 = vld [vmem:[#allocation8 + $0x48] sm:$0xff]  ;;  %v2412_v6 = vld [vmem:[#allocation8 + $0x58] sm:$0xff] }
 0x6fc   :  { %5712 = vtanh.f32 %v6762_v26  ;;  %v2414_v7 = vld [vmem:[#allocation8 + $0x68] sm:$0xff] }
 0x6fd   :  { %v4952_v2 = vpack.c.bf16 %v2414_v7, %v2410_v30  ;;  %v2441_v7 = vld [vmem:[#allocation8 + $0x140] sm:$0xff] }
 0x706   :  { %v5713_v18 = vpop.eup %5712 }
 0x707   :  { %v6765_v58 = vmul.f32 %v5713_v18, %v5711_v53  ;;  %v4936_v53 = vpack.c.bf16 %v2158_v59, %v2154_v41  ;;  %v2153_v18 = vld [vmem:[#allocation6 + $0x150] sm:$0xff]  ;;  %v2409_v41 = vld [vmem:[#allocation8 + $0x40] sm:$0xff] }
 0x708   :  { %v2413_v59 = vld [vmem:[#allocation8 + $0x60] sm:$0xff] }
 0x709   :  { %1999 = vmatmul.mubr.f32.vlgmr.msra.gmra.mrb[12].mxu0 %v6765_v58  ;;  %2070 = vmatmul.mubr.f32.vlgmr.msra.gmra.mrb[12].mxu1 %v6765_v58 }
 0x70a   :  { %4887 = vmatpush1.bf16.msra.mxu0 %v4886_v1  ;;  %4919 = vmatpush1.bf16.msra.mxu1 %v4918_v12  ;;  %v2157_v1 = vld [vmem:[#allocation6 + $0x170] sm:$0xff]  ;;  %v2160_v12 = vld [vmem:[#allocation6 + $0x188] sm:$0xff] }
 0x70b   :  { %4889 = vmatprep.subr.bf16.mxu0 %v4888_v51  ;;  %4921 = vmatprep.subr.bf16.mxu1 %v4920_v25  ;;  %v2166_v51 = vld [vmem:[#allocation6 + $0x1b8] sm:$0xff]  ;;  %v4906_v25 = vpack.c.bf16 %v2155_v56, %v2151_v21  ;;  %v4938_v19 = vpack.c.bf16 %v2157_v1, %v2153_v18  ;;  %v4908_v55 = vpack.c.bf16 %v2164_v14, %v2160_v12  ;;  %v2411_v56 = vld [vmem:[#allocation8 + $0x50] sm:$0xff]  ;;  %v2422_v18 = vld [vmem:[#allocation8 + $0xa8] sm:$0xff] }
 0x70c   :  { %2239 = vmatprep.mubr.f32.mxu0 %v7426_v45  ;;  %2352 = vmatprep.mubr.f32.mxu1 %v7426_v45  ;;  %v4940_v3 = vpack.c.bf16 %v2166_v51, %v2162_v42  ;;  %v2417_v1 = vld [vmem:[#allocation8 + $0x80] sm:$0xff]  ;;  %v2420_v51 = vld [vmem:[#allocation8 + $0x98] sm:$0xff] }
 0x70d   :  { %v2421_v42 = vld [vmem:[#allocation8 + $0xa0] sm:$0xff] }
 0x70e   :  { %4891 = vmatpush1.bf16.msra.mxu0 %v4890_v54  ;;  %4923 = vmatpush1.bf16.msra.mxu1 %v4922_v62  ;;  %v2165_v54 = vld [vmem:[#allocation6 + $0x1b0] sm:$0xff]  ;;  %v2168_v62 = vld [vmem:[#allocation6 + $0x1c8] sm:$0xff] }
 0x70f   :  { %4893 = vmatprep.subr.bf16.mxu0 %v4892_v33  ;;  %4925 = vmatprep.subr.bf16.mxu1 %v4924_v20  ;;  %v2174_v33 = vld [vmem:[#allocation6 + $0x1f8] sm:$0xff]  ;;  %v4910_v20 = vpack.c.bf16 %v2163_v47, %v2159_v11  ;;  %v4942_v16 = vpack.c.bf16 %v2165_v54, %v2161_v15  ;;  %v4912_v57 = vpack.c.bf16 %v2172_v5, %v2168_v62  ;;  %v2426_v47 = vld [vmem:[#allocation8 + $0xc8] sm:$0xff]  ;;  %v2423_v54 = vld [vmem:[#allocation8 + $0xb0] sm:$0xff] }
 0x710   :  { %v4944_v36 = vpack.c.bf16 %v2174_v33, %v2170_v63  ;;  %v2425_v62 = vld [vmem:[#allocation8 + $0xc0] sm:$0xff]  ;;  %v2428_v33 = vld [vmem:[#allocation8 + $0xd8] sm:$0xff] }
 0x711   :  { %v2429_v5 = vld [vmem:[#allocation8 + $0xe0] sm:$0xff] }
 0x712   :  { %4895 = vmatpush1.bf16.msra.mxu0 %v4894_v60  ;;  %4927 = vmatpush1.bf16.msra.mxu1 %v4926_v8  ;;  %v2173_v60 = vld [vmem:[#allocation6 + $0x1f0] sm:$0xff]  ;;  %v4914_v8 = vpack.c.bf16 %v2171_v40, %v2167_v37  ;;  %v4962_v37 = vpack.c.bf16 %v2429_v5, %v2425_v62  ;;  %v2461_v62 = vld [vmem:[#allocation8 + $0x1e0] sm:$0xff] }
 0x713   :  { %4897 = vmatprep.subr.bf16.mxu0 %v4896_v23  ;;  %4929 = vmatprep.subr.bf16.mxu1 %v4928_v24  ;;  %v4946_v13 = vpack.c.bf16 %v2173_v60, %v2169_v48  ;;  %v7458_v23 = vld [vmem:[#allocation17_spill] sm:$0xff]  ;;  %v7459_v24 = vld [vmem:[#allocation18_spill] sm:$0xff]  ;;  %v2427_v40 = vld [vmem:[#allocation8 + $0xd0] sm:$0xff] }
 0x714   :  { %v2431_v48 = vld [vmem:[#allocation8 + $0xf0] sm:$0xff] }
 0x716   :  { %4899 = vmatpush1.bf16.msra.mxu0 %v4898_v44  ;;  %4931 = vmatpush1.bf16.msra.mxu1 %v4930_v39  ;;  %v2408_v44 = vld [vmem:[#allocation8 + $0x38] sm:$0xff]  ;;  %v4950_v39 = vpack.c.bf16 %v2405_v29, %v2401_v17  ;;  %v2439_v17 = vld [vmem:[#allocation8 + $0x130] sm:$0xff] }
 0x717   :  { %4901 = vmatprep.subr.bf16.mxu0 %v4900_v0  ;;  %4933 = vmatprep.subr.bf16.mxu1 %v4932_v22  ;;  %v4980_v49 = vpack.c.bf16 %v2408_v44, %v2404_v38  ;;  %v2407_v0 = vld [vmem:[#allocation8 + $0x30] sm:$0xff]  ;;  %v2440_v38 = vld [vmem:[#allocation8 + $0x138] sm:$0xff]  ;;  %v2442_v44 = vld [vmem:[#allocation8 + $0x148] sm:$0xff] }
 0x718   :  { %v4982_v22 = vpack.c.bf16 %v2407_v0, %v2403_v9  ;;  %v4996_v29 = vpack.c.bf16 %v2440_v38, %v2436_v10  ;;  %v2444_v9 = vld [vmem:[#allocation8 + $0x158] sm:$0xff] }
 0x719   :  { %v2448_v0 = vld [vmem:[#allocation8 + $0x178] sm:$0xff] }
 0x71a   :  { %4903 = vmatpush1.bf16.msra.mxu0 %v4902_v52  ;;  %4935 = vmatpush1.bf16.msra.mxu1 %v4934_v4  ;;  %v2416_v52 = vld [vmem:[#allocation8 + $0x78] sm:$0xff]  ;;  %v4954_v4 = vpack.c.bf16 %v2413_v59, %v2409_v41  ;;  %v5000_v41 = vpack.c.bf16 %v2448_v0, %v2444_v9  ;;  %v2447_v59 = vld [vmem:[#allocation8 + $0x170] sm:$0xff] }
 0x71b   :  { %4905 = vmatprep.subr.bf16.mxu0 %v4904_v46  ;;  %4937 = vmatprep.subr.bf16.mxu1 %v4936_v53  ;;  %v4984_v21 = vpack.c.bf16 %v2416_v52, %v2412_v6  ;;  %v2415_v46 = vld [vmem:[#allocation8 + $0x70] sm:$0xff]  ;;  %v2418_v53 = vld [vmem:[#allocation8 + $0x88] sm:$0xff]  ;;  %v2445_v6 = vld [vmem:[#allocation8 + $0x160] sm:$0xff] }
 0x71c   :  { %v4986_v12 = vpack.c.bf16 %v2415_v46, %v2411_v56  ;;  %v4956_v14 = vpack.c.bf16 %v2422_v18, %v2418_v53  ;;  %v2450_v52 = vld [vmem:[#allocation8 + $0x188] sm:$0xff]  ;;  %v2452_v56 = vld [vmem:[#allocation8 + $0x198] sm:$0xff] }
 0x71d   :  { %v2456_v46 = vld [vmem:[#allocation8 + $0x1b8] sm:$0xff] }
 0x71e   :  { %4907 = vmatpush1.bf16.msra.mxu0 %v4906_v25  ;;  %4939 = vmatpush1.bf16.msra.mxu1 %v4938_v19  ;;  %v2424_v25 = vld [vmem:[#allocation8 + $0xb8] sm:$0xff]  ;;  %v4958_v19 = vpack.c.bf16 %v2421_v42, %v2417_v1  ;;  %v2449_v1 = vld [vmem:[#allocation8 + $0x180] sm:$0xff]  ;;  %v5004_v42 = vpack.c.bf16 %v2456_v46, %v2452_v56 }
 0x71f   :  { %4909 = vmatprep.subr.bf16.mxu0 %v4908_v55  ;;  %4941 = vmatprep.subr.bf16.mxu1 %v4940_v3  ;;  %v4988_v11 = vpack.c.bf16 %v2424_v25, %v2420_v51  ;;  %v2430_v55 = vld [vmem:[#allocation8 + $0xe8] sm:$0xff]  ;;  %v2419_v3 = vld [vmem:[#allocation8 + $0x90] sm:$0xff] }
 0x720   :  { %v4960_v15 = vpack.c.bf16 %v2430_v55, %v2426_v47  ;;  %v4990_v63 = vpack.c.bf16 %v2423_v54, %v2419_v3  ;;  %v2455_v51 = vld [vmem:[#allocation8 + $0x1b0] sm:$0xff]  ;;  %v2458_v25 = vld [vmem:[#allocation8 + $0x1c8] sm:$0xff]  ;;  %v2464_v47 = vld [vmem:[#allocation8 + $0x1f8] sm:$0xff] }
 0x721   :  { %v2457_v54 = vld [vmem:[#allocation8 + $0x1c0] sm:$0xff] }
 0x722   :  { %4911 = vmatpush1.bf16.msra.mxu0 %v4910_v20  ;;  %4943 = vmatpush1.bf16.msra.mxu1 %v4942_v16  ;;  %v2432_v20 = vld [vmem:[#allocation8 + $0xf8] sm:$0xff]  ;;  %v2434_v16 = vld [vmem:[#allocation8 + $0x108] sm:$0xff] }
 0x723   :  { %4913 = vmatprep.subr.bf16.mxu0 %v4912_v57  ;;  %4945 = vmatprep.subr.bf16.mxu1 %v4944_v36  ;;  %v4992_v57 = vpack.c.bf16 %v2432_v20, %v2428_v33  ;;  %v2438_v36 = vld [vmem:[#allocation8 + $0x128] sm:$0xff]  ;;  %v2463_v33 = vld [vmem:[#allocation8 + $0x1f0] sm:$0xff]  ;;  %v4978_v20 = vpack.c.bf16 %v2461_v62, %v2457_v54 }
 0x724   :  { %v4964_v60 = vpack.c.bf16 %v2438_v36, %v2434_v16  ;;  %v2837_v54 = vld [vmem:[#allocation9 + $0x50] sm:$0xff] }
 0x725   :  { %v2841_v62 = vld [vmem:[#allocation9 + $0x70] sm:$0xff] }
 0x726   :  { %4915 = vmatpush1.bf16.msra.mxu0 %v4914_v8  ;;  %4947 = vmatpush1.bf16.msra.mxu1 %v4946_v13  ;;  %v4994_v8 = vpack.c.bf16 %v2431_v48, %v2427_v40  ;;  %v2433_v13 = vld [vmem:[#allocation8 + $0x100] sm:$0xff] }
 0x727   :  { %4949 = vmatprep.subr.bf16.mxu0 %v4948_v61  ;;  %4981 = vmatprep.subr.bf16.mxu1 %v4980_v49  ;;  %v2435_v61 = vld [vmem:[#allocation8 + $0x110] sm:$0xff]  ;;  %v4966_v49 = vpack.c.bf16 %v2437_v28, %v2433_v13  ;;  %v7461_v48 = vld [vmem:[#allocation46_spill] sm:$0xff]  ;;  %v7463_v28 = vld [vmem:[#allocation45_spill] sm:$0xff] }
 0x729   :  { %2240 = vmatmul.mubr.f32.vlgmr.msra.gmra.mrb[14].mxu0 %v6396_v43  ;;  %2353 = vmatmul.mubr.f32.vlgmr.msra.gmra.mrb[14].mxu1 %v6396_v43 }
 0x72a   :  { %2245 = vmatprep.mubr.f32.mxu0 %v7426_v45  ;;  %2358 = vmatprep.mubr.f32.mxu1 %v7426_v45 }
 0x72b   :  { %4951 = vmatpush1.bf16.msra.mxu0 %v4950_v39  ;;  %4983 = vmatpush1.bf16.msra.mxu1 %v4982_v22  ;;  %v2446_v39 = vld [vmem:[#allocation8 + $0x168] sm:$0xff]  ;;  %v4998_v22 = vpack.c.bf16 %v2439_v17, %v2435_v61 }
 0x72c   :  { %4953 = vmatprep.subr.bf16.mxu0 %v4952_v2  ;;  %4985 = vmatprep.subr.bf16.mxu1 %v4984_v21  ;;  %v4968_v30 = vpack.c.bf16 %v2446_v39, %v2442_v44  ;;  %v2443_v2 = vld [vmem:[#allocation8 + $0x150] sm:$0xff]  ;;  %v4970_v21 = vpack.c.bf16 %v2445_v6, %v2441_v7 }
 0x72d   :  { %2246 = vmatmul.mubr.f32.gmra.mrb[16].mxu0 %v7457_v27  ;;  %2359 = vmatmul.mubr.f32.gmra.mrb[16].mxu1 %v7457_v27  ;;  %v5002_v53 = vpack.c.bf16 %v2447_v59, %v2443_v2 }
 0x72e   :  { %2251 = vmatprep.mubr.f32.mxu0 %v7426_v45  ;;  %2364 = vmatprep.mubr.f32.mxu1 %v7426_v45 }
 0x72f   :  { %4955 = vmatpush1.bf16.msra.mxu0 %v4954_v4  ;;  %4987 = vmatpush1.bf16.msra.mxu1 %v4986_v12  ;;  %v2454_v4 = vld [vmem:[#allocation8 + $0x1a8] sm:$0xff]  ;;  %v2453_v12 = vld [vmem:[#allocation8 + $0x1a0] sm:$0xff] }
 0x730   :  { %4957 = vmatprep.subr.bf16.mxu0 %v4956_v14  ;;  %4989 = vmatprep.subr.bf16.mxu1 %v4988_v11  ;;  %v4972_v18 = vpack.c.bf16 %v2454_v4, %v2450_v52  ;;  %v2451_v14 = vld [vmem:[#allocation8 + $0x190] sm:$0xff]  ;;  %v2460_v11 = vld [vmem:[#allocation8 + $0x1d8] sm:$0xff]  ;;  %v4974_v55 = vpack.c.bf16 %v2453_v12, %v2449_v1 }
 0x731   :  { %2252 = vmatmul.mubr.f32.gmra.mrb[18].mxu0 %v7458_v23  ;;  %2365 = vmatmul.mubr.f32.gmra.mrb[18].mxu1 %v7458_v23  ;;  %v5006_v3 = vpack.c.bf16 %v2455_v51, %v2451_v14  ;;  %v5008_v5 = vpack.c.bf16 %v2464_v47, %v2460_v11  ;;  %v2829_v1 = vld [vmem:[#allocation9 + $0x10] sm:$0xff]  ;;  %v2840_v51 = vld [vmem:[#allocation9 + $0x68] sm:$0xff]  ;;  %v2835_v11 = vld [vmem:[#allocation9 + $0x40] sm:$0xff] }
 0x732   :  { %2257 = vmatprep.mubr.f32.mxu0 %v7426_v45  ;;  %2370 = vmatprep.mubr.f32.mxu1 %v7426_v45  ;;  %v2833_v12 = vld [vmem:[#allocation9 + $0x30] sm:$0xff]  ;;  %v2839_v47 = vld [vmem:[#allocation9 + $0x60] sm:$0xff] }
 0x733   :  { %4959 = vmatpush1.bf16.msra.mxu0 %v4958_v19  ;;  %4991 = vmatpush1.bf16.msra.mxu1 %v4990_v63  ;;  %v2462_v19 = vld [vmem:[#allocation8 + $0x1e8] sm:$0xff]  ;;  %v2459_v63 = vld [vmem:[#allocation8 + $0x1d0] sm:$0xff]  ;;  %v6848_v14 = vpack.c.bf16 %v2833_v12, %v2829_v1 }
 0x734   :  { %4961 = vmatprep.subr.bf16.mxu0 %v4960_v15  ;;  %4993 = vmatprep.subr.bf16.mxu1 %v4992_v57  ;;  %v4976_v15 = vpack.c.bf16 %v2462_v19, %v2458_v25  ;;  %v5010_v16 = vpack.c.bf16 %v2463_v33, %v2459_v63  ;;  %v2838_v25 = vld [vmem:[#allocation9 + $0x58] sm:$0xff]  ;;  %v2844_v63 = vld [vmem:[#allocation9 + $0x88] sm:$0xff] }
 0x735   :  { %2258 = vmatmul.mubr.f32.gmra.mrb[20].mxu0 %v7459_v24  ;;  %2371 = vmatmul.mubr.f32.gmra.mrb[20].mxu1 %v7459_v24  ;;  %v2848_v33 = vld [vmem:[#allocation9 + $0xa8] sm:$0xff] }
 0x736   :  { %2263 = vmatprep.mubr.f32.mxu0 %v7426_v45  ;;  %2376 = vmatprep.mubr.f32.mxu1 %v7426_v45 }
 0x737   :  { %4963 = vmatpush1.bf16.msra.mxu0 %v4962_v37  ;;  %4995 = vmatpush1.bf16.msra.mxu1 %v4994_v8  ;;  %v7460_v37 = vld [vmem:[#allocation44_spill] sm:$0xff]  ;;  %v7462_v8 = vld [vmem:[#allocation47_spill] sm:$0xff] }
 0x738   :  { %4965 = vmatprep.subr.bf16.mxu0 %v4964_v60  ;;  %4997 = vmatprep.subr.bf16.mxu1 %v4996_v29  ;;  %v423_v57 = vadd.f32 %v7460_v37, %v6315_v35  ;;  %v422_v60 = vadd.f32 %v7461_v48, %v6448_v50  ;;  %v424_v13 = vadd.f32 %v7462_v8, %v7438_v31  ;;  %v2843_v37 = vld [vmem:[#allocation9 + $0x80] sm:$0xff]  ;;  %v2849_v8 = vld [vmem:[#allocation9 + $0xb0] sm:$0xff] }
 0x739   :  { %2264 = vmatmul.mubr.f32.gmra.mrb[22].mxu0 %v6669_v34  ;;  %2377 = vmatmul.mubr.f32.gmra.mrb[22].mxu1 %v6669_v34 }
 0x73a   :  { %2269 = vmatprep.mubr.f32.mxu0 %v7426_v45  ;;  %2382 = vmatprep.mubr.f32.mxu1 %v7426_v45 }
 0x73b   :  { %4967 = vmatpush1.bf16.msra.mxu0 %v4966_v49  ;;  %4999 = vmatpush1.bf16.msra.mxu1 %v4998_v22 }
 0x73c   :  { %4969 = vmatprep.subr.bf16.mxu0 %v4968_v30  ;;  %5001 = vmatprep.subr.bf16.mxu1 %v5000_v41 }
 0x73d   :  { %2270 = vmatmul.mubr.f32.gmra.mrb[24].mxu0 %v6718_v32  ;;  %2383 = vmatmul.mubr.f32.gmra.mrb[24].mxu1 %v6718_v32 }
 0x73e   :  { %2275 = vmatprep.mubr.f32.mxu0 %v7426_v45  ;;  %2388 = vmatprep.mubr.f32.mxu1 %v7426_v45 }
 0x73f   :  { %4971 = vmatpush1.bf16.msra.mxu0 %v4970_v21  ;;  %5003 = vmatpush1.bf16.msra.mxu1 %v5002_v53 }
 0x740   :  { %4973 = vmatprep.subr.bf16.mxu0 %v4972_v18  ;;  %5005 = vmatprep.subr.bf16.mxu1 %v5004_v42  ;;  %v2836_v42 = vld [vmem:[#allocation9 + $0x48] sm:$0xff] }
 0x741   :  { %2276 = vmatmul.mubr.f32.gmra.mrb[26].mxu0 %v6765_v58  ;;  %2389 = vmatmul.mubr.f32.gmra.mrb[26].mxu1 %v6765_v58  ;;  %v6853_v19 = vpack.c.bf16 %v2840_v51, %v2836_v42  ;;  %v2873_v42 = vld [vmem:[#allocation9 + $0x170] sm:$0xff]  ;;  %v2876_v51 = vld [vmem:[#allocation9 + $0x188] sm:$0xff] }
 0x742   :  { %2281 = vmatprep.mubr.f32.mxu0 %v7426_v45  ;;  %2394 = vmatprep.mubr.f32.mxu1 %v7426_v45 }
 0x743   :  { %4975 = vmatpush1.bf16.msra.mxu0 %v4974_v55  ;;  %5007 = vmatpush1.bf16.msra.mxu1 %v5006_v3  ;;  %v2842_v55 = vld [vmem:[#allocation9 + $0x78] sm:$0xff]  ;;  %v6855_v3 = vpack.c.bf16 %v2839_v47, %v2835_v11 }
 0x744   :  { %4977 = vmatprep.subr.bf16.mxu0 %v4976_v15  ;;  %5009 = vmatprep.subr.bf16.mxu1 %v5008_v5  ;;  %v6857_v15 = vpack.c.bf16 %v2842_v55, %v2838_v25  ;;  %v6860_v5 = vpack.c.bf16 %v2841_v62, %v2837_v54  ;;  %v2880_v25 = vld [vmem:[#allocation9 + $0x1a8] sm:$0xff]  ;;  %v2875_v55 = vld [vmem:[#allocation9 + $0x180] sm:$0xff]  ;;  %v2878_v62 = vld [vmem:[#allocation9 + $0x198] sm:$0xff] }
 0x745   :  { %v6910_v47 = vpack.c.bf16 %v2880_v25, %v2876_v51  ;;  %v2879_v54 = vld [vmem:[#allocation9 + $0x1a0] sm:$0xff] }
 0x747   :  { %4979 = vmatpush1.bf16.msra.mxu0 %v4978_v20  ;;  %5011 = vmatpush1.bf16.msra.mxu1 %v5010_v16  ;;  %v2846_v20 = vld [vmem:[#allocation9 + $0x98] sm:$0xff]  ;;  %v6865_v16 = vpack.c.bf16 %v2848_v33, %v2844_v63  ;;  %v2877_v33 = vld [vmem:[#allocation9 + $0x190] sm:$0xff] }
 0x748   :  { %v2882_v63 = vld [vmem:[#allocation9 + $0x1b8] sm:$0xff] }
 0x7dc   :  { %v2000_v36 = vpop.f32.mrb[12].mxu0  ;;  %v2071_v40 = vpop.f32.mrb[12].mxu1 }
 0x7dd   :  { %v2001_v10 = vadd.f32 %v2000_v36, %v7463_v28  ;;  %v2072_v38 = vadd.f32 %v2071_v40, %v423_v57  ;;  %v2002_v61 = vpop.f32.mrb[13].mxu0  ;;  %v2073_v17 = vpop.f32.mrb[13].mxu1  ;;  %v2847_v57 = vld [vmem:[#allocation9 + $0xa0] sm:$0xff]  ;;  %v2850_v36 = vld [vmem:[#allocation9 + $0xb8] sm:$0xff]  ;;  %v2852_v28 = vld [vmem:[#allocation9 + $0xc8] sm:$0xff] }
 0x7de   :  { %v2003_v29 = vadd.f32 %v2002_v61, %v422_v60  ;;  %v2074_v44 = vadd.f32 %v2073_v17, %v424_v13  ;;  %v6867_v40 = vpack.c.bf16 %v2847_v57, %v2843_v37  ;;  %v6869_v48 = vpack.c.bf16 %v2850_v36, %v2846_v20  ;;  %v2845_v60 = vld [vmem:[#allocation9 + $0x90] sm:$0xff]  ;;  %v2851_v17 = vld [vmem:[#allocation9 + $0xc0] sm:$0xff]  ;;  %v2884_v57 = vld [vmem:[#allocation9 + $0x1c8] sm:$0xff] }
 0x7df   :  { %v4305_v39 = vmul.f32 -1.442695, %v2001_v10  ;;  %v6872_v13 = vpack.c.bf16 %v2849_v8, %v2845_v60  ;;  %v2856_v10 = vld [vmem:[#allocation9 + $0xe8] sm:$0xff]  ;;  %v2881_v20 = vld [vmem:[#allocation9 + $0x1b0] sm:$0xff]  ;;  %v6913_v37 = vpack.c.bf16 %v2882_v63, %v2878_v62  ;;  %v6916_v60 = vpack.c.bf16 %v2879_v54, %v2875_v55  ;;  %v2886_v8 = vld [vmem:[#allocation9 + $0x1d8] sm:$0xff] }
 0x7e0   :  { %v4306_v49 = vmul.f32 -1.442695, %v2003_v29  ;;  %v4307_v35 = vmul.f32 -1.442695, %v2074_v44  ;;  %v6877_v61 = vpack.c.bf16 %v2856_v10, %v2852_v28  ;;  %v2855_v29 = vld [vmem:[#allocation9 + $0xe0] sm:$0xff]  ;;  %v2858_v44 = vld [vmem:[#allocation9 + $0xf8] sm:$0xff]  ;;  %v6920_v10 = vpack.c.bf16 %v2881_v20, %v2877_v33 }
 0x7e1   :  { %5714 = vpow2.f32 %v4305_v39  ;;  %v6879_v39 = vpack.c.bf16 %v2855_v29, %v2851_v17  ;;  %v2888_v36 = vld [vmem:[#allocation9 + $0x1e8] sm:$0xff]  ;;  %v2890_v28 = vld [vmem:[#allocation9 + $0x1f8] sm:$0xff]  ;;  %v2883_v17 = vld [vmem:[#allocation9 + $0x1c0] sm:$0xff] }
 0x7e2   :  { %5716 = vpow2.f32 %v4306_v49  ;;  %v2887_v29 = vld [vmem:[#allocation9 + $0x1e0] sm:$0xff] }
 0x7e3   :  { %5718 = vpow2.f32 %v4307_v35  ;;  %v2853_v35 = vld [vmem:[#allocation9 + $0xd0] sm:$0xff] }
 0x7e4   :  { %5720 = vtanh.f32 %v2072_v38  ;;  %v2854_v38 = vld [vmem:[#allocation9 + $0xd8] sm:$0xff] }
 0x7e5   :  { %v6881_v49 = vpack.c.bf16 %v2858_v44, %v2854_v38  ;;  %v6922_v38 = vpack.c.bf16 %v2888_v36, %v2884_v57  ;;  %v6925_v44 = vpack.c.bf16 %v2890_v28, %v2886_v8 }
 0x7eb   :  { %v5715_v9 = vpop.eup %5714 }
 0x7ec   :  { %v5717_v0 = vpop.eup %5716  ;;  %v2079_v22 = vadd.f32 1.0, %v5715_v9  ;;  %v2857_v9 = vld [vmem:[#allocation9 + $0xf0] sm:$0xff] }
 0x7ed   :  { %v2085_v50 = vadd.f32 1.0, %v5717_v0  ;;  %v5719_v31 = vpop.eup %5718  ;;  %v6884_v0 = vpack.c.bf16 %v2857_v9, %v2853_v35  ;;  %v2885_v35 = vld [vmem:[#allocation9 + $0x1d0] sm:$0xff] }
 0x7ee   :  { %5722 = vrcp.f32 %v2079_v22  ;;  %v5721_v30 = vpop.eup %5720  ;;  %v2092_v41 = vadd.f32 1.0, %v5719_v31  ;;  %v2860_v22 = vld [vmem:[#allocation9 + $0x108] sm:$0xff]  ;;  %v2859_v31 = vld [vmem:[#allocation9 + $0x100] sm:$0xff]  ;;  %v2889_v9 = vld [vmem:[#allocation9 + $0x1f0] sm:$0xff] }
 0x7ef   :  { %5724 = vrcp.f32 %v2085_v50  ;;  %v2864_v50 = vld [vmem:[#allocation9 + $0x128] sm:$0xff] }
 0x7f0   :  { %5726 = vrcp.f32 %v2092_v41 }
 0x7f8   :  { %v5723_v7 = vpop.eup %5722 }
 0x7f9   :  { %v5725_v6 = vpop.eup %5724  ;;  %v2096_v2 = vmul.f32 %v5723_v7, %v5721_v30  ;;  %v6888_v30 = vpack.c.bf16 %v2864_v50, %v2860_v22  ;;  %v2863_v7 = vld [vmem:[#allocation9 + $0x120] sm:$0xff]  ;;  %v6928_v22 = vpack.c.bf16 %v2887_v29, %v2883_v17  ;;  %v6932_v50 = vpack.c.bf16 %v2889_v9, %v2885_v35  ;;  %v7467_v17 = vld [vmem:[#allocation25_spill] sm:$0xff] }
 0x7fa   :  { %v2095_v59 = vmul.f32 %v5725_v6, %v6762_v26  ;;  %v5727_v56 = vpop.eup %5726  ;;  %v2862_v6 = vld [vmem:[#allocation9 + $0x118] sm:$0xff]  ;;  %v6891_v41 = vpack.c.bf16 %v2863_v7, %v2859_v31  ;;  %v6942_v31 = vld [vmem:[%s7354_s7] sm:$0xf] }
 0x7fb   :  { %v7464_v7 = vld [vmem:[#allocation22_spill] sm:$0xff]  ;;  %v7003_v29 = vrot.slane %v6942_v31, %v7467_v17 }
 0x7fc   :  { %v2097_v52 = vadd.f32 %v2096_v2, %v2095_v59  ;;  %v6807_v4 = vpop.f32.mrb[14].mxu0  ;;  %v2866_v2 = vld [vmem:[#allocation9 + $0x138] sm:$0xff] }
 0x7fd   :  { %v2243_v21 = vpop.f32.mrb[15].mxu0  ;;  %v6893_v59 = vpack.c.bf16 %v2866_v2, %v2862_v6  ;;  %v6946_v6 = vrot.slane %v6942_v31, %v7464_v7 }
 0x7fe   :  { %5728 = vtanh.f32 %v2097_v52  ;;  %v2861_v52 = vld [vmem:[#allocation9 + $0x110] sm:$0xff] }
 0x7ff   :  { %v2865_v21 = vld [vmem:[#allocation9 + $0x130] sm:$0xff] }
 0x808   :  { %v5729_v46 = vpop.eup %5728 }
 0x809   :  { %v2099_v53 = vmul.f32 %v5729_v46, %v5727_v56  ;;  %v2868_v56 = vld [vmem:[#allocation9 + $0x148] sm:$0xff]  ;;  %v6896_v46 = vpack.c.bf16 %v2865_v21, %v2861_v52 }
 0x80b   :  { %2282 = vmatmul.mubr.f32.gmra.mrb[28].mxu0 %v2099_v53  ;;  %2395 = vmatmul.mubr.f32.gmra.mrb[28].mxu1 %v2099_v53 }
 0x80c   :  { %2529 = vmatprep.mubr.f32.mxu0 %v7426_v45  ;;  %2642 = vmatprep.mubr.f32.mxu1 %v7426_v45 }
 0x813   :  { %2530 = vmatmul.mubr.f32.vlgmr.msra.gmra.mrb[28].mxu0 %v6396_v43  ;;  %2643 = vmatmul.mubr.f32.vlgmr.msra.gmra.mrb[28].mxu1 %v6396_v43  ;;  %v2828_v43 = vld [vmem:[#allocation9 + $0x8] sm:$0xff] }
 0x814   :  { %2535 = vmatprep.mubr.f32.mxu0 %v7426_v45  ;;  %2648 = vmatprep.mubr.f32.mxu1 %v7426_v45 }
 0x817   :  { %2536 = vmatmul.mubr.f32.gmra.mrb[26].mxu0 %v7457_v27  ;;  %2649 = vmatmul.mubr.f32.gmra.mrb[26].mxu1 %v7457_v27  ;;  %v2827_v27 = vld [vmem:[#allocation9] sm:$0xff] }
 0x818   :  { %2541 = vmatprep.mubr.f32.mxu0 %v7426_v45  ;;  %2654 = vmatprep.mubr.f32.mxu1 %v7426_v45 }
 0x81b   :  { %2542 = vmatmul.mubr.f32.gmra.mrb[24].mxu0 %v7458_v23  ;;  %2655 = vmatmul.mubr.f32.gmra.mrb[24].mxu1 %v7458_v23  ;;  %v2831_v23 = vld [vmem:[#allocation9 + $0x20] sm:$0xff] }
 0x81c   :  { %2547 = vmatprep.mubr.f32.mxu0 %v7426_v45  ;;  %2660 = vmatprep.mubr.f32.mxu1 %v7426_v45  ;;  %v6843_v18 = vpack.c.bf16 %v2831_v23, %v2827_v27  ;;  %v2870_v27 = vld [vmem:[#allocation9 + $0x158] sm:$0xff] }
 0x81d   :  { %v2874_v23 = vld [vmem:[#allocation9 + $0x178] sm:$0xff] }
 0x81e   :  { %v6904_v12 = vpack.c.bf16 %v2874_v23, %v2870_v27 }
 0x81f   :  { %2548 = vmatmul.mubr.f32.gmra.mrb[22].mxu0 %v7459_v24  ;;  %2661 = vmatmul.mubr.f32.gmra.mrb[22].mxu1 %v7459_v24  ;;  %v2834_v24 = vld [vmem:[#allocation9 + $0x38] sm:$0xff] }
 0x820   :  { %2553 = vmatprep.mubr.f32.mxu0 %v7426_v45  ;;  %2666 = vmatprep.mubr.f32.mxu1 %v7426_v45 }
 0x823   :  { %2554 = vmatmul.mubr.f32.gmra.mrb[20].mxu0 %v6669_v34  ;;  %2667 = vmatmul.mubr.f32.gmra.mrb[20].mxu1 %v6669_v34  ;;  %v2832_v34 = vld [vmem:[#allocation9 + $0x28] sm:$0xff] }
 0x824   :  { %2559 = vmatprep.mubr.f32.mxu0 %v7426_v45  ;;  %2672 = vmatprep.mubr.f32.mxu1 %v7426_v45  ;;  %v6841_v26 = vpack.c.bf16 %v2832_v34, %v2828_v43  ;;  %v2867_v43 = vld [vmem:[#allocation9 + $0x140] sm:$0xff] }
 0x825   :  { %v2871_v34 = vld [vmem:[#allocation9 + $0x160] sm:$0xff] }
 0x826   :  { %5013 = vmatprep.subr.bf16.mxu0 %v6841_v26  ;;  %v6902_v1 = vpack.c.bf16 %v2871_v34, %v2867_v43  ;;  %v7465_v34 = vld [vmem:[#allocation23_spill] sm:$0xff] }
 0x827   :  { %2560 = vmatmul.mubr.f32.gmra.mrb[18].mxu0 %v6718_v32  ;;  %2673 = vmatmul.mubr.f32.gmra.mrb[18].mxu1 %v6718_v32  ;;  %v2830_v32 = vld [vmem:[#allocation9 + $0x18] sm:$0xff]  ;;  %v6952_v27 = vrot.slane %v6942_v31, %v7465_v34 }
 0x828   :  { %2565 = vmatprep.mubr.f32.mxu0 %v7426_v45  ;;  %2678 = vmatprep.mubr.f32.mxu1 %v7426_v45 }
 0x829   :  { %5015 = vmatpush1.bf16.msra.mxu0 %v6843_v18 }
 0x82a   :  { %5017 = vmatprep.subr.bf16.mxu0 %v6853_v19 }
 0x82b   :  { %2566 = vmatmul.mubr.f32.gmra.mrb[16].mxu0 %v6765_v58  ;;  %2679 = vmatmul.mubr.f32.gmra.mrb[16].mxu1 %v6765_v58  ;;  %v6845_v58 = vpack.c.bf16 %v2834_v24, %v2830_v32  ;;  %v2869_v24 = vld [vmem:[#allocation9 + $0x150] sm:$0xff] }
 0x82c   :  { %2571 = vmatprep.mubr.f32.mxu0 %v7426_v45  ;;  %2684 = vmatprep.mubr.f32.mxu1 %v7426_v45  ;;  %v6908_v11 = vpack.c.bf16 %v2873_v42, %v2869_v24  ;;  %v7466_v42 = vld [vmem:[#allocation26_spill] sm:$0xff] }
 0x82d   :  { %5045 = vmatprep.subr.bf16.mxu1 %v6845_v58  ;;  %5019 = vmatpush1.bf16.msra.mxu0 %v6855_v3  ;;  %v6957_v51 = vrot.slane %v6942_v31, %v7466_v42 }
 0x82e   :  { %5047 = vmatpush1.bf16.msra.mxu1 %v6848_v14  ;;  %5021 = vmatprep.subr.bf16.mxu0 %v6865_v16 }
 0x82f   :  { %2572 = vmatmul.mubr.f32.gmra.mrb[30].mxu0 %v2099_v53  ;;  %2685 = vmatmul.mubr.f32.gmra.mrb[14].mxu1 %v2099_v53  ;;  %v2872_v53 = vld [vmem:[#allocation9 + $0x168] sm:$0xff] }
 0x830   :  { %2959 = vmatprep.mubr.f32.mxu0 %v7426_v45  ;;  %3030 = vmatprep.mubr.f32.mxu1 %v7426_v45  ;;  %v6899_v32 = vpack.c.bf16 %v2872_v53, %v2868_v56 }
 0x831   :  { %5049 = vmatprep.subr.bf16.mxu1 %v6857_v15  ;;  %5023 = vmatpush1.bf16.msra.mxu0 %v6867_v40 }
 0x832   :  { %5051 = vmatpush1.bf16.msra.mxu1 %v6860_v5  ;;  %5025 = vmatprep.subr.bf16.mxu0 %v6877_v61 }
 0x833   :  { %5053 = vmatprep.subr.bf16.mxu1 %v6869_v48 }
 0x835   :  { %5027 = vmatpush1.bf16.msra.mxu0 %v6879_v39 }
 0x836   :  { %5055 = vmatpush1.bf16.msra.mxu1 %v6872_v13  ;;  %5029 = vmatprep.subr.bf16.mxu0 %v6888_v30 }
 0x837   :  { %5057 = vmatprep.subr.bf16.mxu1 %v6881_v49 }
 0x839   :  { %5031 = vmatpush1.bf16.msra.mxu0 %v6891_v41 }
 0x83a   :  { %5059 = vmatpush1.bf16.msra.mxu1 %v6884_v0  ;;  %5033 = vmatprep.subr.bf16.mxu0 %v6899_v32 }
 0x83b   :  { %5061 = vmatprep.subr.bf16.mxu1 %v6893_v59 }
 0x83d   :  { %5035 = vmatpush1.bf16.msra.mxu0 %v6902_v1 }
 0x83e   :  { %5063 = vmatpush1.bf16.msra.mxu1 %v6896_v46  ;;  %5037 = vmatprep.subr.bf16.mxu0 %v6910_v47 }
 0x83f   :  { %5065 = vmatprep.subr.bf16.mxu1 %v6904_v12 }
 0x841   :  { %5039 = vmatpush1.bf16.msra.mxu0 %v6916_v60 }
 0x842   :  { %5067 = vmatpush1.bf16.msra.mxu1 %v6908_v11  ;;  %5041 = vmatprep.subr.bf16.mxu0 %v6922_v38 }
 0x843   :  { %5069 = vmatprep.subr.bf16.mxu1 %v6913_v37 }
 0x845   :  { %5043 = vmatpush1.bf16.msra.mxu0 %v6928_v22 }
 0x846   :  { %5071 = vmatpush1.bf16.msra.mxu1 %v6920_v10  ;;  %5077 = vmatprep.subr.bf16.mxu0 %v6841_v26 }
 0x847   :  { %5073 = vmatprep.subr.bf16.mxu1 %v6925_v44 }
 0x84a   :  { %5075 = vmatpush1.bf16.msra.mxu1 %v6932_v50 }
 0x84b   :  { %5109 = vmatprep.subr.bf16.mxu1 %v6845_v58 }
 0x902   :  { %v2573_v2 = vpop.f32.mrb[30].mxu0  ;;  %v2686_v52 = vpop.f32.mrb[14].mxu1 }
 0x903   :  { %v2691_v21 = vadd.f32 %v2573_v2, %v6807_v4  ;;  %v2575_v56 = vpop.f32.mrb[31].mxu0  ;;  %v2688_v53 = vpop.f32.mrb[15].mxu1  ;;  %v2718_v55 = vadd.f32 %v6957_v51, %v2686_v52 }
 0x904   :  { %v2719_v24 = vadd.f32 %v6952_v27, %v2688_v53 }
 0x905   :  { %v2716_v43 = vadd.f32 %v6946_v6, %v2691_v21 }
 0x906   :  { %v4309_v25 = vmul.f32 -1.442695, %v2719_v24 }
 0x907   :  { %v4308_v23 = vmul.f32 -1.442695, %v2716_v43 }
 0x909   :  { %5730 = vpow2.f32 %v4308_v23 }
 0x90a   :  { %5732 = vpow2.f32 %v4309_v25 }
 0x90b   :  { %5734 = vtanh.f32 %v2718_v55 }
 0x913   :  { %v5731_v4 = vpop.eup %5730 }
 0x914   :  { %v2814_v54 = vadd.f32 1.0, %v5731_v4  ;;  %v5733_v62 = vpop.eup %5732 }
 0x915   :  { %v2821_v63 = vadd.f32 1.0, %v5733_v62  ;;  %v5735_v33 = vpop.eup %5734 }
 0x916   :  { %5736 = vrcp.f32 %v2814_v54 }
 0x917   :  { %5738 = vrcp.f32 %v2821_v63 }
 0x920   :  { %v5737_v20 = vpop.eup %5736 }
 0x921   :  { %v6960_v57 = vmul.f32 %v5737_v20, %v5735_v33  ;;  %v5739_v36 = vpop.eup %5738 }
 0x923   :  { %5740 = vtanh.f32 %v6960_v57 }
 0x92d   :  { %v5741_v8 = vpop.eup %5740 }
 0x92e   :  { %v6963_v28 = vmul.f32 %v5741_v8, %v5739_v36 }
 0x930   :  { %2960 = vmatmul.mubr.f32.vlgmr.msra.gmra.mrb[16].mxu0 %v6963_v28  ;;  %3031 = vmatmul.mubr.f32.vlgmr.msra.gmra.mrb[16].mxu1 %v6963_v28 }
 0x931   :  { %5079 = vmatpush1.bf16.msra.mxu0 %v6843_v18  ;;  %5111 = vmatpush1.bf16.msra.mxu1 %v6848_v14 }
 0x932   :  { %5081 = vmatprep.subr.bf16.mxu0 %v6853_v19  ;;  %5113 = vmatprep.subr.bf16.mxu1 %v6857_v15 }
 0x933   :  { %3129 = vmatprep.mubr.f32.mxu0 %v7426_v45  ;;  %3200 = vmatprep.mubr.f32.mxu1 %v7426_v45 }
 0x935   :  { %5083 = vmatpush1.bf16.msra.mxu0 %v6855_v3  ;;  %5115 = vmatpush1.bf16.msra.mxu1 %v6860_v5 }
 0x936   :  { %5085 = vmatprep.subr.bf16.mxu0 %v6865_v16  ;;  %5117 = vmatprep.subr.bf16.mxu1 %v6869_v48 }
 0x939   :  { %5087 = vmatpush1.bf16.msra.mxu0 %v6867_v40  ;;  %5119 = vmatpush1.bf16.msra.mxu1 %v6872_v13 }
 0x93a   :  { %5089 = vmatprep.subr.bf16.mxu0 %v6877_v61  ;;  %5121 = vmatprep.subr.bf16.mxu1 %v6881_v49 }
 0x93d   :  { %5091 = vmatpush1.bf16.msra.mxu0 %v6879_v39  ;;  %5123 = vmatpush1.bf16.msra.mxu1 %v6884_v0 }
 0x93e   :  { %5093 = vmatprep.subr.bf16.mxu0 %v6888_v30  ;;  %5125 = vmatprep.subr.bf16.mxu1 %v6893_v59 }
 0x941   :  { %5095 = vmatpush1.bf16.msra.mxu0 %v6891_v41  ;;  %5127 = vmatpush1.bf16.msra.mxu1 %v6896_v46 }
 0x942   :  { %5097 = vmatprep.subr.bf16.mxu0 %v6899_v32  ;;  %5129 = vmatprep.subr.bf16.mxu1 %v6904_v12 }
 0x945   :  { %5099 = vmatpush1.bf16.msra.mxu0 %v6902_v1  ;;  %5131 = vmatpush1.bf16.msra.mxu1 %v6908_v11 }
 0x946   :  { %5101 = vmatprep.subr.bf16.mxu0 %v6910_v47  ;;  %5133 = vmatprep.subr.bf16.mxu1 %v6913_v37 }
 0x949   :  { %5103 = vmatpush1.bf16.msra.mxu0 %v6916_v60  ;;  %5135 = vmatpush1.bf16.msra.mxu1 %v6920_v10 }
 0x94a   :  { %5105 = vmatprep.subr.bf16.mxu0 %v6922_v38  ;;  %5137 = vmatprep.subr.bf16.mxu1 %v6925_v44 }
 0x94d   :  { %5107 = vmatpush1.bf16.msra.mxu0 %v6928_v22  ;;  %5139 = vmatpush1.bf16.msra.mxu1 %v6932_v50 }
 0x94e   :  { %5141 = vmatprep.subr.bf16.mxu0 %v6841_v26  ;;  %5173 = vmatprep.subr.bf16.mxu1 %v6845_v58 }
 0xa03   :  { %v2961_v35 = vpop.f32.mrb[16].mxu0  ;;  %v3032_v9 = vpop.f32.mrb[16].mxu1 }
 0xa04   :  { %v5508_v7 = vadd.f32 %v2961_v35, %v6946_v6  ;;  %v2963_v2 = vpop.f32.mrb[17].mxu0  ;;  %v3034_v52 = vpop.f32.mrb[17].mxu1  ;;  %v5522_v23 = vadd.f32 %v3032_v9, %v6957_v51 }
 0xa05   :  { %v5509_v21 = vadd.f32 %v2963_v2, %v7003_v29  ;;  %v5523_v43 = vadd.f32 %v3034_v52, %v6952_v27 }
 0xa06   :  { %v4310_v56 = vmul.f32 -1.442695, %v5508_v7 }
 0xa07   :  { %v4311_v53 = vmul.f32 -1.442695, %v5509_v21  ;;  %v4312_v34 = vmul.f32 -1.442695, %v5523_v43 }
 0xa08   :  { %5742 = vpow2.f32 %v4310_v56 }
 0xa09   :  { %5744 = vpow2.f32 %v4311_v53 }
 0xa0a   :  { %5746 = vpow2.f32 %v4312_v34 }
 0xa0b   :  { %5748 = vtanh.f32 %v5522_v23 }
 0xa12   :  { %v5743_v24 = vpop.eup %5742 }
 0xa13   :  { %v5745_v31 = vpop.eup %5744  ;;  %v3040_v42 = vadd.f32 1.0, %v5743_v24 }
 0xa14   :  { %v3046_v25 = vadd.f32 1.0, %v5745_v31  ;;  %v5747_v55 = vpop.eup %5746 }
 0xa15   :  { %5750 = vrcp.f32 %v3040_v42  ;;  %v5749_v4 = vpop.eup %5748  ;;  %v3053_v33 = vadd.f32 1.0, %v5747_v55 }
 0xa16   :  { %5752 = vrcp.f32 %v3046_v25 }
 0xa17   :  { %5754 = vrcp.f32 %v3053_v33 }
 0xa1f   :  { %v5751_v54 = vpop.eup %5750 }
 0xa20   :  { %v5753_v62 = vpop.eup %5752  ;;  %v3057_v63 = vmul.f32 %v5751_v54, %v5749_v4 }
 0xa21   :  { %v3056_v20 = vmul.f32 %v5753_v62, %v6960_v57  ;;  %v5755_v8 = vpop.eup %5754 }
 0xa23   :  { %v7010_v36 = vadd.f32 %v3057_v63, %v3056_v20 }
 0xa25   :  { %5756 = vtanh.f32 %v7010_v36 }
 0xa2f   :  { %v5757_v17 = vpop.eup %5756 }
 0xa30   :  { %v3060_v35 = vmul.f32 %v5757_v17, %v5755_v8 }
 0xa32   :  { %3130 = vmatmul.mubr.f32.vlgmr.msra.gmra.mrb[18].mxu0 %v3060_v35  ;;  %3201 = vmatmul.mubr.f32.vlgmr.msra.gmra.mrb[18].mxu1 %v3060_v35 }
 0xa33   :  { %5143 = vmatpush1.bf16.msra.mxu0 %v6843_v18  ;;  %5175 = vmatpush1.bf16.msra.mxu1 %v6848_v14 }
 0xa34   :  { %5145 = vmatprep.subr.bf16.mxu0 %v6853_v19  ;;  %5177 = vmatprep.subr.bf16.mxu1 %v6857_v15 }
 0xa35   :  { %3299 = vmatprep.mubr.f32.mxu0 %v7426_v45  ;;  %3370 = vmatprep.mubr.f32.mxu1 %v7426_v45 }
 0xa37   :  { %5147 = vmatpush1.bf16.msra.mxu0 %v6855_v3  ;;  %5179 = vmatpush1.bf16.msra.mxu1 %v6860_v5 }
 0xa38   :  { %5149 = vmatprep.subr.bf16.mxu0 %v6865_v16  ;;  %5181 = vmatprep.subr.bf16.mxu1 %v6869_v48 }
 0xa3b   :  { %5151 = vmatpush1.bf16.msra.mxu0 %v6867_v40  ;;  %5183 = vmatpush1.bf16.msra.mxu1 %v6872_v13 }
 0xa3c   :  { %5153 = vmatprep.subr.bf16.mxu0 %v6877_v61  ;;  %5185 = vmatprep.subr.bf16.mxu1 %v6881_v49 }
 0xa3f   :  { %5155 = vmatpush1.bf16.msra.mxu0 %v6879_v39  ;;  %5187 = vmatpush1.bf16.msra.mxu1 %v6884_v0 }
 0xa40   :  { %5157 = vmatprep.subr.bf16.mxu0 %v6888_v30  ;;  %5189 = vmatprep.subr.bf16.mxu1 %v6893_v59 }
 0xa43   :  { %5159 = vmatpush1.bf16.msra.mxu0 %v6891_v41  ;;  %5191 = vmatpush1.bf16.msra.mxu1 %v6896_v46 }
 0xa44   :  { %5161 = vmatprep.subr.bf16.mxu0 %v6899_v32  ;;  %5193 = vmatprep.subr.bf16.mxu1 %v6904_v12 }
 0xa47   :  { %5163 = vmatpush1.bf16.msra.mxu0 %v6902_v1  ;;  %5195 = vmatpush1.bf16.msra.mxu1 %v6908_v11 }
 0xa48   :  { %5165 = vmatprep.subr.bf16.mxu0 %v6910_v47  ;;  %5197 = vmatprep.subr.bf16.mxu1 %v6913_v37 }
 0xa4b   :  { %5167 = vmatpush1.bf16.msra.mxu0 %v6916_v60  ;;  %5199 = vmatpush1.bf16.msra.mxu1 %v6920_v10 }
 0xa4c   :  { %5169 = vmatprep.subr.bf16.mxu0 %v6922_v38  ;;  %5201 = vmatprep.subr.bf16.mxu1 %v6925_v44 }
 0xa4f   :  { %5171 = vmatpush1.bf16.msra.mxu0 %v6928_v22  ;;  %5203 = vmatpush1.bf16.msra.mxu1 %v6932_v50 }
 0xa50   :  { %5205 = vmatprep.subr.bf16.mxu0 %v6841_v26  ;;  %5237 = vmatprep.subr.bf16.mxu1 %v6845_v58 }
 0xb05   :  { %v3131_v57 = vpop.f32.mrb[18].mxu0  ;;  %v3202_v9 = vpop.f32.mrb[18].mxu1 }
 0xb06   :  { %v5510_v7 = vadd.f32 %v3131_v57, %v6946_v6  ;;  %v3133_v2 = vpop.f32.mrb[19].mxu0  ;;  %v3204_v52 = vpop.f32.mrb[19].mxu1  ;;  %v5524_v23 = vadd.f32 %v3202_v9, %v6957_v51 }
 0xb07   :  { %v5511_v21 = vadd.f32 %v3133_v2, %v7003_v29  ;;  %v5525_v43 = vadd.f32 %v3204_v52, %v6952_v27 }
 0xb08   :  { %v4313_v56 = vmul.f32 -1.442695, %v5510_v7 }
 0xb09   :  { %v4314_v53 = vmul.f32 -1.442695, %v5511_v21  ;;  %v4315_v34 = vmul.f32 -1.442695, %v5525_v43 }
 0xb0a   :  { %5758 = vpow2.f32 %v4313_v56 }
 0xb0b   :  { %5760 = vpow2.f32 %v4314_v53 }
 0xb0c   :  { %5762 = vpow2.f32 %v4315_v34 }
 0xb0d   :  { %5764 = vtanh.f32 %v5524_v23 }
 0xb14   :  { %v5759_v24 = vpop.eup %5758 }
 0xb15   :  { %v5761_v31 = vpop.eup %5760  ;;  %v3210_v42 = vadd.f32 1.0, %v5759_v24 }
 0xb16   :  { %v3216_v25 = vadd.f32 1.0, %v5761_v31  ;;  %v5763_v55 = vpop.eup %5762 }
 0xb17   :  { %5766 = vrcp.f32 %v3210_v42  ;;  %v5765_v4 = vpop.eup %5764  ;;  %v3223_v33 = vadd.f32 1.0, %v5763_v55 }
 0xb18   :  { %5768 = vrcp.f32 %v3216_v25 }
 0xb19   :  { %5770 = vrcp.f32 %v3223_v33 }
 0xb21   :  { %v5767_v54 = vpop.eup %5766 }
 0xb22   :  { %v5769_v62 = vpop.eup %5768  ;;  %v3227_v63 = vmul.f32 %v5767_v54, %v5765_v4 }
 0xb23   :  { %v3226_v20 = vmul.f32 %v5769_v62, %v7010_v36  ;;  %v5771_v17 = vpop.eup %5770 }
 0xb25   :  { %v7052_v8 = vadd.f32 %v3227_v63, %v3226_v20 }
 0xb27   :  { %5772 = vtanh.f32 %v7052_v8 }
 0xb31   :  { %v5773_v35 = vpop.eup %5772 }
 0xb32   :  { %v3230_v57 = vmul.f32 %v5773_v35, %v5771_v17 }
 0xb34   :  { %3300 = vmatmul.mubr.f32.vlgmr.msra.gmra.mrb[20].mxu0 %v3230_v57  ;;  %3371 = vmatmul.mubr.f32.vlgmr.msra.gmra.mrb[20].mxu1 %v3230_v57 }
 0xb35   :  { %5207 = vmatpush1.bf16.msra.mxu0 %v6843_v18  ;;  %5239 = vmatpush1.bf16.msra.mxu1 %v6848_v14 }
 0xb36   :  { %5209 = vmatprep.subr.bf16.mxu0 %v6853_v19  ;;  %5241 = vmatprep.subr.bf16.mxu1 %v6857_v15 }
 0xb37   :  { %3469 = vmatprep.mubr.f32.mxu0 %v7426_v45  ;;  %3540 = vmatprep.mubr.f32.mxu1 %v7426_v45 }
 0xb39   :  { %5211 = vmatpush1.bf16.msra.mxu0 %v6855_v3  ;;  %5243 = vmatpush1.bf16.msra.mxu1 %v6860_v5 }
 0xb3a   :  { %5213 = vmatprep.subr.bf16.mxu0 %v6865_v16  ;;  %5245 = vmatprep.subr.bf16.mxu1 %v6869_v48 }
 0xb3d   :  { %5215 = vmatpush1.bf16.msra.mxu0 %v6867_v40  ;;  %5247 = vmatpush1.bf16.msra.mxu1 %v6872_v13 }
 0xb3e   :  { %5217 = vmatprep.subr.bf16.mxu0 %v6877_v61  ;;  %5249 = vmatprep.subr.bf16.mxu1 %v6881_v49 }
 0xb41   :  { %5219 = vmatpush1.bf16.msra.mxu0 %v6879_v39  ;;  %5251 = vmatpush1.bf16.msra.mxu1 %v6884_v0 }
 0xb42   :  { %5221 = vmatprep.subr.bf16.mxu0 %v6888_v30  ;;  %5253 = vmatprep.subr.bf16.mxu1 %v6893_v59 }
 0xb45   :  { %5223 = vmatpush1.bf16.msra.mxu0 %v6891_v41  ;;  %5255 = vmatpush1.bf16.msra.mxu1 %v6896_v46 }
 0xb46   :  { %5225 = vmatprep.subr.bf16.mxu0 %v6899_v32  ;;  %5257 = vmatprep.subr.bf16.mxu1 %v6904_v12 }
 0xb49   :  { %5227 = vmatpush1.bf16.msra.mxu0 %v6902_v1  ;;  %5259 = vmatpush1.bf16.msra.mxu1 %v6908_v11 }
 0xb4a   :  { %5229 = vmatprep.subr.bf16.mxu0 %v6910_v47  ;;  %5261 = vmatprep.subr.bf16.mxu1 %v6913_v37 }
 0xb4d   :  { %5231 = vmatpush1.bf16.msra.mxu0 %v6916_v60  ;;  %5263 = vmatpush1.bf16.msra.mxu1 %v6920_v10 }
 0xb4e   :  { %5233 = vmatprep.subr.bf16.mxu0 %v6922_v38  ;;  %5265 = vmatprep.subr.bf16.mxu1 %v6925_v44 }
 0xb51   :  { %5235 = vmatpush1.bf16.msra.mxu0 %v6928_v22  ;;  %5267 = vmatpush1.bf16.msra.mxu1 %v6932_v50 }
 0xb52   :  { %5269 = vmatprep.subr.bf16.mxu0 %v6841_v26  ;;  %5301 = vmatprep.subr.bf16.mxu1 %v6845_v58 }
 0xc07   :  { %v3301_v36 = vpop.f32.mrb[20].mxu0  ;;  %v3372_v9 = vpop.f32.mrb[20].mxu1 }
 0xc08   :  { %v5512_v7 = vadd.f32 %v3301_v36, %v6946_v6  ;;  %v3303_v2 = vpop.f32.mrb[21].mxu0  ;;  %v3374_v52 = vpop.f32.mrb[21].mxu1  ;;  %v5526_v23 = vadd.f32 %v3372_v9, %v6957_v51 }
 0xc09   :  { %v5513_v21 = vadd.f32 %v3303_v2, %v7003_v29  ;;  %v5527_v43 = vadd.f32 %v3374_v52, %v6952_v27 }
 0xc0a   :  { %v4316_v56 = vmul.f32 -1.442695, %v5512_v7 }
 0xc0b   :  { %v4317_v53 = vmul.f32 -1.442695, %v5513_v21  ;;  %v4318_v34 = vmul.f32 -1.442695, %v5527_v43 }
 0xc0c   :  { %5774 = vpow2.f32 %v4316_v56 }
 0xc0d   :  { %5776 = vpow2.f32 %v4317_v53 }
 0xc0e   :  { %5778 = vpow2.f32 %v4318_v34 }
 0xc0f   :  { %5780 = vtanh.f32 %v5526_v23 }
 0xc16   :  { %v5775_v24 = vpop.eup %5774 }
 0xc17   :  { %v5777_v31 = vpop.eup %5776  ;;  %v3380_v42 = vadd.f32 1.0, %v5775_v24 }
 0xc18   :  { %v3386_v25 = vadd.f32 1.0, %v5777_v31  ;;  %v5779_v55 = vpop.eup %5778 }
 0xc19   :  { %5782 = vrcp.f32 %v3380_v42  ;;  %v5781_v4 = vpop.eup %5780  ;;  %v3393_v33 = vadd.f32 1.0, %v5779_v55 }
 0xc1a   :  { %5784 = vrcp.f32 %v3386_v25 }
 0xc1b   :  { %5786 = vrcp.f32 %v3393_v33 }
 0xc23   :  { %v5783_v54 = vpop.eup %5782 }
 0xc24   :  { %v5785_v62 = vpop.eup %5784  ;;  %v3397_v63 = vmul.f32 %v5783_v54, %v5781_v4 }
 0xc25   :  { %v3396_v20 = vmul.f32 %v5785_v62, %v7052_v8  ;;  %v5787_v35 = vpop.eup %5786 }
 0xc27   :  { %v7094_v17 = vadd.f32 %v3397_v63, %v3396_v20 }
 0xc29   :  { %5788 = vtanh.f32 %v7094_v17 }
 0xc33   :  { %v5789_v57 = vpop.eup %5788 }
 0xc34   :  { %v3400_v36 = vmul.f32 %v5789_v57, %v5787_v35 }
 0xc36   :  { %3470 = vmatmul.mubr.f32.vlgmr.msra.gmra.mrb[22].mxu0 %v3400_v36  ;;  %3541 = vmatmul.mubr.f32.vlgmr.msra.gmra.mrb[22].mxu1 %v3400_v36 }
 0xc37   :  { %5271 = vmatpush1.bf16.msra.mxu0 %v6843_v18  ;;  %5303 = vmatpush1.bf16.msra.mxu1 %v6848_v14 }
 0xc38   :  { %5273 = vmatprep.subr.bf16.mxu0 %v6853_v19  ;;  %5305 = vmatprep.subr.bf16.mxu1 %v6857_v15 }
 0xc39   :  { %3639 = vmatprep.mubr.f32.mxu0 %v7426_v45  ;;  %3710 = vmatprep.mubr.f32.mxu1 %v7426_v45 }
 0xc3b   :  { %5275 = vmatpush1.bf16.msra.mxu0 %v6855_v3  ;;  %5307 = vmatpush1.bf16.msra.mxu1 %v6860_v5 }
 0xc3c   :  { %5277 = vmatprep.subr.bf16.mxu0 %v6865_v16  ;;  %5309 = vmatprep.subr.bf16.mxu1 %v6869_v48 }
 0xc3f   :  { %5279 = vmatpush1.bf16.msra.mxu0 %v6867_v40  ;;  %5311 = vmatpush1.bf16.msra.mxu1 %v6872_v13 }
 0xc40   :  { %5281 = vmatprep.subr.bf16.mxu0 %v6877_v61  ;;  %5313 = vmatprep.subr.bf16.mxu1 %v6881_v49 }
 0xc43   :  { %5283 = vmatpush1.bf16.msra.mxu0 %v6879_v39  ;;  %5315 = vmatpush1.bf16.msra.mxu1 %v6884_v0 }
 0xc44   :  { %5285 = vmatprep.subr.bf16.mxu0 %v6888_v30  ;;  %5317 = vmatprep.subr.bf16.mxu1 %v6893_v59 }
 0xc47   :  { %5287 = vmatpush1.bf16.msra.mxu0 %v6891_v41  ;;  %5319 = vmatpush1.bf16.msra.mxu1 %v6896_v46 }
 0xc48   :  { %5289 = vmatprep.subr.bf16.mxu0 %v6899_v32  ;;  %5321 = vmatprep.subr.bf16.mxu1 %v6904_v12 }
 0xc4b   :  { %5291 = vmatpush1.bf16.msra.mxu0 %v6902_v1  ;;  %5323 = vmatpush1.bf16.msra.mxu1 %v6908_v11 }
 0xc4c   :  { %5293 = vmatprep.subr.bf16.mxu0 %v6910_v47  ;;  %5325 = vmatprep.subr.bf16.mxu1 %v6913_v37 }
 0xc4f   :  { %5295 = vmatpush1.bf16.msra.mxu0 %v6916_v60  ;;  %5327 = vmatpush1.bf16.msra.mxu1 %v6920_v10 }
 0xc50   :  { %5297 = vmatprep.subr.bf16.mxu0 %v6922_v38  ;;  %5329 = vmatprep.subr.bf16.mxu1 %v6925_v44 }
 0xc53   :  { %5299 = vmatpush1.bf16.msra.mxu0 %v6928_v22  ;;  %5331 = vmatpush1.bf16.msra.mxu1 %v6932_v50 }
 0xc54   :  { %5333 = vmatprep.subr.bf16.mxu0 %v6841_v26  ;;  %5365 = vmatprep.subr.bf16.mxu1 %v6845_v58 }
 0xd09   :  { %v3471_v8 = vpop.f32.mrb[22].mxu0  ;;  %v3542_v9 = vpop.f32.mrb[22].mxu1 }
 0xd0a   :  { %v5514_v7 = vadd.f32 %v3471_v8, %v6946_v6  ;;  %v3473_v2 = vpop.f32.mrb[23].mxu0  ;;  %v3544_v52 = vpop.f32.mrb[23].mxu1  ;;  %v5528_v23 = vadd.f32 %v3542_v9, %v6957_v51 }
 0xd0b   :  { %v5515_v21 = vadd.f32 %v3473_v2, %v7003_v29  ;;  %v5529_v43 = vadd.f32 %v3544_v52, %v6952_v27 }
 0xd0c   :  { %v4319_v56 = vmul.f32 -1.442695, %v5514_v7 }
 0xd0d   :  { %v4320_v53 = vmul.f32 -1.442695, %v5515_v21  ;;  %v4321_v34 = vmul.f32 -1.442695, %v5529_v43 }
 0xd0e   :  { %5790 = vpow2.f32 %v4319_v56 }
 0xd0f   :  { %5792 = vpow2.f32 %v4320_v53 }
 0xd10   :  { %5794 = vpow2.f32 %v4321_v34 }
 0xd11   :  { %5796 = vtanh.f32 %v5528_v23 }
 0xd18   :  { %v5791_v24 = vpop.eup %5790 }
 0xd19   :  { %v5793_v31 = vpop.eup %5792  ;;  %v3550_v42 = vadd.f32 1.0, %v5791_v24 }
 0xd1a   :  { %v3556_v25 = vadd.f32 1.0, %v5793_v31  ;;  %v5795_v55 = vpop.eup %5794 }
 0xd1b   :  { %5798 = vrcp.f32 %v3550_v42  ;;  %v5797_v4 = vpop.eup %5796  ;;  %v3563_v33 = vadd.f32 1.0, %v5795_v55 }
 0xd1c   :  { %5800 = vrcp.f32 %v3556_v25 }
 0xd1d   :  { %5802 = vrcp.f32 %v3563_v33 }
 0xd25   :  { %v5799_v54 = vpop.eup %5798 }
 0xd26   :  { %v5801_v62 = vpop.eup %5800  ;;  %v3567_v63 = vmul.f32 %v5799_v54, %v5797_v4 }
 0xd27   :  { %v3566_v20 = vmul.f32 %v5801_v62, %v7094_v17  ;;  %v5803_v57 = vpop.eup %5802 }
 0xd29   :  { %v7136_v35 = vadd.f32 %v3567_v63, %v3566_v20 }
 0xd2b   :  { %5804 = vtanh.f32 %v7136_v35 }
 0xd35   :  { %v5805_v36 = vpop.eup %5804 }
 0xd36   :  { %v3570_v8 = vmul.f32 %v5805_v36, %v5803_v57 }
 0xd38   :  { %3640 = vmatmul.mubr.f32.vlgmr.msra.gmra.mrb[24].mxu0 %v3570_v8  ;;  %3711 = vmatmul.mubr.f32.vlgmr.msra.gmra.mrb[24].mxu1 %v3570_v8  ;;  %v4100_v8 = vld [vmem:[%s7356_s9 + $0x18] sm:$0xff] }
 0xd39   :  { %5335 = vmatpush1.bf16.msra.mxu0 %v6843_v18  ;;  %5367 = vmatpush1.bf16.msra.mxu1 %v6848_v14 }
 0xd3a   :  { %5337 = vmatprep.subr.bf16.mxu0 %v6853_v19  ;;  %5369 = vmatprep.subr.bf16.mxu1 %v6857_v15 }
 0xd3b   :  { %3809 = vmatprep.mubr.f32.mxu0 %v7426_v45  ;;  %3880 = vmatprep.mubr.f32.mxu1 %v7426_v45 }
 0xd3d   :  { %5339 = vmatpush1.bf16.msra.mxu0 %v6855_v3  ;;  %5371 = vmatpush1.bf16.msra.mxu1 %v6860_v5 }
 0xd3e   :  { %5341 = vmatprep.subr.bf16.mxu0 %v6865_v16  ;;  %5373 = vmatprep.subr.bf16.mxu1 %v6869_v48 }
 0xd41   :  { %5343 = vmatpush1.bf16.msra.mxu0 %v6867_v40  ;;  %5375 = vmatpush1.bf16.msra.mxu1 %v6872_v13 }
 0xd42   :  { %5345 = vmatprep.subr.bf16.mxu0 %v6877_v61  ;;  %5377 = vmatprep.subr.bf16.mxu1 %v6881_v49 }
 0xd45   :  { %5347 = vmatpush1.bf16.msra.mxu0 %v6879_v39  ;;  %5379 = vmatpush1.bf16.msra.mxu1 %v6884_v0 }
 0xd46   :  { %5349 = vmatprep.subr.bf16.mxu0 %v6888_v30  ;;  %5381 = vmatprep.subr.bf16.mxu1 %v6893_v59 }
 0xd49   :  { %5351 = vmatpush1.bf16.msra.mxu0 %v6891_v41  ;;  %5383 = vmatpush1.bf16.msra.mxu1 %v6896_v46 }
 0xd4a   :  { %5353 = vmatprep.subr.bf16.mxu0 %v6899_v32  ;;  %5385 = vmatprep.subr.bf16.mxu1 %v6904_v12 }
 0xd4d   :  { %5355 = vmatpush1.bf16.msra.mxu0 %v6902_v1  ;;  %5387 = vmatpush1.bf16.msra.mxu1 %v6908_v11 }
 0xd4e   :  { %5357 = vmatprep.subr.bf16.mxu0 %v6910_v47  ;;  %5389 = vmatprep.subr.bf16.mxu1 %v6913_v37 }
 0xd51   :  { %5359 = vmatpush1.bf16.msra.mxu0 %v6916_v60  ;;  %5391 = vmatpush1.bf16.msra.mxu1 %v6920_v10 }
 0xd52   :  { %5361 = vmatprep.subr.bf16.mxu0 %v6922_v38  ;;  %5393 = vmatprep.subr.bf16.mxu1 %v6925_v44 }
 0xd55   :  { %5363 = vmatpush1.bf16.msra.mxu0 %v6928_v22  ;;  %5395 = vmatpush1.bf16.msra.mxu1 %v6932_v50 }
 0xd56   :  { %5397 = vmatprep.subr.bf16.mxu0 %v6841_v26  ;;  %5429 = vmatprep.subr.bf16.mxu1 %v6845_v58 }
 0xe0b   :  { %v3641_v17 = vpop.f32.mrb[24].mxu0  ;;  %v3712_v9 = vpop.f32.mrb[24].mxu1 }
 0xe0c   :  { %v5516_v7 = vadd.f32 %v3641_v17, %v6946_v6  ;;  %v3643_v2 = vpop.f32.mrb[25].mxu0  ;;  %v3714_v52 = vpop.f32.mrb[25].mxu1  ;;  %v5530_v23 = vadd.f32 %v3712_v9, %v6957_v51  ;;  %v4101_v9 = vld [vmem:[%s7356_s9 + $0x20] sm:$0xff] }
 0xe0d   :  { %v5517_v21 = vadd.f32 %v3643_v2, %v7003_v29  ;;  %v5531_v43 = vadd.f32 %v3714_v52, %v6952_v27  ;;  %v4103_v52 = vld [vmem:[%s7356_s9 + $0x30] sm:$0xff] }
 0xe0e   :  { %v4322_v56 = vmul.f32 -1.442695, %v5516_v7  ;;  %v4102_v7 = vld [vmem:[%s7356_s9 + $0x28] sm:$0xff] }
 0xe0f   :  { %v4323_v53 = vmul.f32 -1.442695, %v5517_v21  ;;  %v4324_v34 = vmul.f32 -1.442695, %v5531_v43  ;;  %v5467_v2 = vpack.c.bf16 %v4102_v7, %v4101_v9  ;;  %v4104_v21 = vld [vmem:[%s7356_s9 + $0x38] sm:$0xff] }
 0xe10   :  { %5806 = vpow2.f32 %v4322_v56  ;;  %v5470_v56 = vpack.c.bf16 %v4104_v21, %v4103_v52 }
 0xe11   :  { %5808 = vpow2.f32 %v4323_v53  ;;  %v4106_v53 = vld [vmem:[%s7356_s9 + $0x48] sm:$0xff] }
 0xe12   :  { %5810 = vpow2.f32 %v4324_v34  ;;  %v4107_v34 = vld [vmem:[%s7356_s9 + $0x50] sm:$0xff] }
 0xe13   :  { %5812 = vtanh.f32 %v5530_v23  ;;  %v4108_v23 = vld [vmem:[%s7356_s9 + $0x58] sm:$0xff] }
 0xe1a   :  { %v5807_v26 = vpop.eup %5806 }
 0xe1b   :  { %v5809_v24 = vpop.eup %5808  ;;  %v3720_v58 = vadd.f32 1.0, %v5807_v26  ;;  %v5476_v26 = vpack.c.bf16 %v4108_v23, %v4107_v34 }
 0xe1c   :  { %v3726_v31 = vadd.f32 1.0, %v5809_v24  ;;  %v5811_v42 = vpop.eup %5810  ;;  %v4109_v24 = vld [vmem:[%s7356_s9 + $0x60] sm:$0xff] }
 0xe1d   :  { %5814 = vrcp.f32 %v3720_v58  ;;  %v5813_v25 = vpop.eup %5812  ;;  %v3733_v62 = vadd.f32 1.0, %v5811_v42  ;;  %v4110_v58 = vld [vmem:[%s7356_s9 + $0x68] sm:$0xff]  ;;  %v4111_v42 = vld [vmem:[%s7356_s9 + $0x70] sm:$0xff] }
 0xe1e   :  { %5816 = vrcp.f32 %v3726_v31  ;;  %v5479_v31 = vpack.c.bf16 %v4110_v58, %v4109_v24 }
 0xe1f   :  { %5818 = vrcp.f32 %v3733_v62 }
 0xe27   :  { %v5815_v55 = vpop.eup %5814 }
 0xe28   :  { %v5817_v4 = vpop.eup %5816  ;;  %v3737_v54 = vmul.f32 %v5815_v55, %v5813_v25  ;;  %v4112_v25 = vld [vmem:[%s7356_s9 + $0x78] sm:$0xff] }
 0xe29   :  { %v3736_v63 = vmul.f32 %v5817_v4, %v7136_v35  ;;  %v5819_v20 = vpop.eup %5818  ;;  %v4099_v35 = vld [vmem:[%s7356_s9 + $0x10] sm:$0xff]  ;;  %v5482_v55 = vpack.c.bf16 %v4112_v25, %v4111_v42  ;;  %v4081_v4 = vld [vmem:[%s7355_s8] sm:$0xff] }
 0xe2a   :  { %v5464_v17 = vpack.c.bf16 %v4100_v8, %v4099_v35 }
 0xe2b   :  { %v7178_v33 = vadd.f32 %v3737_v54, %v3736_v63  ;;  %v4082_v54 = vld [vmem:[%s7355_s8 + $0x8] sm:$0xff]  ;;  %v4083_v63 = vld [vmem:[%s7355_s8 + $0x10] sm:$0xff] }
 0xe2c   :  { %v5485_v62 = vpack.c.bf16 %v4082_v54, %v4081_v4 }
 0xe2d   :  { %5820 = vtanh.f32 %v7178_v33 }
 0xe37   :  { %v5821_v57 = vpop.eup %5820 }
 0xe38   :  { %v3740_v36 = vmul.f32 %v5821_v57, %v5819_v20  ;;  %v4085_v20 = vld [vmem:[%s7355_s8 + $0x20] sm:$0xff]  ;;  %v4086_v57 = vld [vmem:[%s7355_s8 + $0x28] sm:$0xff] }
 0xe3a   :  { %3810 = vmatmul.mubr.f32.vlgmr.msra.gmra.mrb[26].mxu0 %v3740_v36  ;;  %3881 = vmatmul.mubr.f32.vlgmr.msra.gmra.mrb[26].mxu1 %v3740_v36  ;;  %v5491_v36 = vpack.c.bf16 %v4086_v57, %v4085_v20 }
 0xe3b   :  { %5399 = vmatpush1.bf16.msra.mxu0 %v6843_v18  ;;  %5431 = vmatpush1.bf16.msra.mxu1 %v6848_v14  ;;  %v5956_v18 = vmov 0.0|0.0  }
 0xe3c   :  { %5401 = vmatprep.subr.bf16.mxu0 %v6853_v19  ;;  %5433 = vmatprep.subr.bf16.mxu1 %v6857_v15 }
 0xe3d   :  { %3979 = vmatprep.mubr.f32.mxu0 %v7426_v45  ;;  %4050 = vmatprep.mubr.f32.mxu1 %v7426_v45 }
 0xe3f   :  { %5403 = vmatpush1.bf16.msra.mxu0 %v6855_v3  ;;  %5435 = vmatpush1.bf16.msra.mxu1 %v6860_v5 }
 0xe40   :  { %5405 = vmatprep.subr.bf16.mxu0 %v6865_v16  ;;  %5437 = vmatprep.subr.bf16.mxu1 %v6869_v48 }
 0xe43   :  { %5407 = vmatpush1.bf16.msra.mxu0 %v6867_v40  ;;  %5439 = vmatpush1.bf16.msra.mxu1 %v6872_v13 }
 0xe44   :  { %5409 = vmatprep.subr.bf16.mxu0 %v6877_v61  ;;  %5441 = vmatprep.subr.bf16.mxu1 %v6881_v49 }
 0xe47   :  { %5411 = vmatpush1.bf16.msra.mxu0 %v6879_v39  ;;  %5443 = vmatpush1.bf16.msra.mxu1 %v6884_v0 }
 0xe48   :  { %5413 = vmatprep.subr.bf16.mxu0 %v6888_v30  ;;  %5445 = vmatprep.subr.bf16.mxu1 %v6893_v59 }
 0xe4b   :  { %5415 = vmatpush1.bf16.msra.mxu0 %v6891_v41  ;;  %5447 = vmatpush1.bf16.msra.mxu1 %v6896_v46 }
 0xe4c   :  { %5417 = vmatprep.subr.bf16.mxu0 %v6899_v32  ;;  %5449 = vmatprep.subr.bf16.mxu1 %v6904_v12 }
 0xe4f   :  { %5419 = vmatpush1.bf16.msra.mxu0 %v6902_v1  ;;  %5451 = vmatpush1.bf16.msra.mxu1 %v6908_v11 }
 0xe50   :  { %5421 = vmatprep.subr.bf16.mxu0 %v6910_v47  ;;  %5453 = vmatprep.subr.bf16.mxu1 %v6913_v37 }
 0xe53   :  { %5423 = vmatpush1.bf16.msra.mxu0 %v6916_v60  ;;  %5455 = vmatpush1.bf16.msra.mxu1 %v6920_v10  ;;  %v4097_v60 = vld [vmem:[%s7356_s9] sm:$0xff]  ;;  %v4098_v10 = vld [vmem:[%s7356_s9 + $0x8] sm:$0xff] }
 0xe54   :  { %5425 = vmatprep.subr.bf16.mxu0 %v6922_v38  ;;  %5457 = vmatprep.subr.bf16.mxu1 %v6925_v44 }
 0xe57   :  { %5427 = vmatpush1.bf16.msra.mxu0 %v6928_v22  ;;  %5459 = vmatpush1.bf16.msra.mxu1 %v6932_v50  ;;  %v5461_v22 = vpack.c.bf16 %v4098_v10, %v4097_v60 }
 0xe58   :  { %5460 = vmatprep.subr.bf16.mxu0 %v5956_v18  ;;  %5484 = vmatprep.subr.bf16.mxu1 %v5956_v18 }
 0xf0d   :  { %v3811_v14 = vpop.f32.mrb[26].mxu0  ;;  %v3882_v19 = vpop.f32.mrb[26].mxu1 }
 0xf0e   :  { %v5518_v3 = vadd.f32 %v3811_v14, %v6946_v6  ;;  %v3813_v15 = vpop.f32.mrb[27].mxu0  ;;  %v3884_v5 = vpop.f32.mrb[27].mxu1  ;;  %v5532_v39 = vadd.f32 %v3882_v19, %v6957_v51  ;;  %v4087_v14 = vld [vmem:[%s7355_s8 + $0x30] sm:$0xff]  ;;  %v4088_v19 = vld [vmem:[%s7355_s8 + $0x38] sm:$0xff] }
 0xf0f   :  { %v5519_v16 = vadd.f32 %v3813_v15, %v7003_v29  ;;  %v5533_v13 = vadd.f32 %v3884_v5, %v6952_v27  ;;  %v4089_v15 = vld [vmem:[%s7355_s8 + $0x40] sm:$0xff]  ;;  %v4090_v5 = vld [vmem:[%s7355_s8 + $0x48] sm:$0xff] }
 0xf10   :  { %v4325_v40 = vmul.f32 -1.442695, %v5518_v3  ;;  %v5494_v3 = vpack.c.bf16 %v4088_v19, %v4087_v14 }
 0xf11   :  { %v4326_v48 = vmul.f32 -1.442695, %v5519_v16  ;;  %v4327_v61 = vmul.f32 -1.442695, %v5533_v13  ;;  %v5497_v16 = vpack.c.bf16 %v4090_v5, %v4089_v15 }
 0xf12   :  { %5822 = vpow2.f32 %v4325_v40  ;;  %v4091_v40 = vld [vmem:[%s7355_s8 + $0x50] sm:$0xff] }
 0xf13   :  { %5824 = vpow2.f32 %v4326_v48  ;;  %v4092_v48 = vld [vmem:[%s7355_s8 + $0x58] sm:$0xff] }
 0xf14   :  { %5826 = vpow2.f32 %v4327_v61  ;;  %v5500_v13 = vpack.c.bf16 %v4092_v48, %v4091_v40  ;;  %v4093_v61 = vld [vmem:[%s7355_s8 + $0x60] sm:$0xff] }
 0xf15   :  { %5828 = vtanh.f32 %v5532_v39  ;;  %v4094_v39 = vld [vmem:[%s7355_s8 + $0x68] sm:$0xff] }
 0xf1c   :  { %v5823_v49 = vpop.eup %5822 }
 0xf1d   :  { %v5825_v0 = vpop.eup %5824  ;;  %v3890_v30 = vadd.f32 1.0, %v5823_v49  ;;  %v5503_v49 = vpack.c.bf16 %v4094_v39, %v4093_v61 }
 0xf1e   :  { %v3896_v41 = vadd.f32 1.0, %v5825_v0  ;;  %v5827_v59 = vpop.eup %5826  ;;  %v4095_v0 = vld [vmem:[%s7355_s8 + $0x70] sm:$0xff] }
 0xf1f   :  { %5830 = vrcp.f32 %v3890_v30  ;;  %v5829_v46 = vpop.eup %5828  ;;  %v3903_v11 = vadd.f32 1.0, %v5827_v59  ;;  %v4096_v30 = vld [vmem:[%s7355_s8 + $0x78] sm:$0xff] }
 0xf20   :  { %5832 = vrcp.f32 %v3896_v41  ;;  %v5506_v41 = vpack.c.bf16 %v4096_v30, %v4095_v0 }
 0xf21   :  { %5834 = vrcp.f32 %v3903_v11 }
 0xf29   :  { %v5831_v32 = vpop.eup %5830 }
 0xf2a   :  { %v5833_v1 = vpop.eup %5832  ;;  %v3907_v12 = vmul.f32 %v5831_v32, %v5829_v46 }
 0xf2b   :  { %v3906_v47 = vmul.f32 %v5833_v1, %v7178_v33  ;;  %v5835_v38 = vpop.eup %5834 }
 0xf2d   :  { %v7220_v37 = vadd.f32 %v3907_v12, %v3906_v47 }
 0xf2f   :  { %5836 = vtanh.f32 %v7220_v37 }
 0xf39   :  { %v5837_v44 = vpop.eup %5836 }
 0xf3a   :  { %v3910_v50 = vmul.f32 %v5837_v44, %v5835_v38 }
 0xf3c   :  { %3980 = vmatmul.mubr.f32.vlgmr.msra.gmra.mrb[28].mxu0 %v3910_v50  ;;  %4051 = vmatmul.mubr.f32.vlgmr.msra.gmra.mrb[28].mxu1 %v3910_v50 }
 0xf3d   :  { %5462 = vmatpush3.bf16.msra.mxu0 %v5461_v22  ;;  %4398 = vmatprep.mubr.msk.f32.mxu0 %vm5957_vm0, %v7426_v45 }
 0xf3e   :  { %5463 = vmatprep.subr.bf16.mxu0 %v5956_v18  ;;  %4433 = vmatprep.mubr.msk.f32.mxu1 %vm5957_vm0, %v7426_v45  ;;  %v4105_v45 = vld [vmem:[%s7356_s9 + $0x40] sm:$0xff] }
 0xf3f   :  { %v5473_v43 = vpack.c.bf16 %v4106_v53, %v4105_v45  ;;  %5486 = vmatpush3.bf16.msra.mxu1 %v5485_v62 }
 0xf40   :  { %5487 = vmatprep.subr.bf16.mxu1 %v5956_v18 }
 0xf41   :  { %5465 = vmatpush3.bf16.msra.mxu0 %v5464_v17 }
 0xf42   :  { %5466 = vmatprep.subr.bf16.mxu0 %v5956_v18 }
 0xf45   :  { %5468 = vmatpush3.bf16.msra.mxu0 %v5467_v2 }
 0xf46   :  { %5469 = vmatprep.subr.bf16.mxu0 %v5956_v18 }
 0xf49   :  { %5471 = vmatpush3.bf16.msra.mxu0 %v5470_v56 }
 0xf4a   :  { %5472 = vmatprep.subr.bf16.mxu0 %v5956_v18 }
 0xf4d   :  { %5474 = vmatpush3.bf16.msra.mxu0 %v5473_v43  ;;  %v4331_v43 = vld [vmem:[%s7357_s10] ss:$0 sm:$0xff] }
 0xf4e   :  { %5475 = vmatprep.subr.bf16.mxu0 %v5956_v18 }
 0xf51   :  { %5477 = vmatpush3.bf16.msra.mxu0 %v5476_v26 }
 0xf52   :  { %5478 = vmatprep.subr.bf16.mxu0 %v5956_v18 }
 0xf55   :  { %5480 = vmatpush3.bf16.msra.mxu0 %v5479_v31 }
 0xf56   :  { %5481 = vmatprep.subr.bf16.mxu0 %v5956_v18 }
 0xf59   :  { %5483 = vmatpush3.bf16.msra.mxu0 %v5482_v55 }
 0xf5c   :  { %4399 = vmatmul.mubr.f32.vlgmr.msra.gmra.mrb[32].mxu0 %v6963_v28  ;;  %v4084_v28 = vld [vmem:[%s7355_s8 + $0x18] sm:$0xff] }
 0xf5d   :  { %v5488_v33 = vpack.c.bf16 %v4084_v28, %v4083_v63 }
 0xf5f   :  { %5489 = vmatpush3.bf16.msra.mxu1 %v5488_v33 }
 0xf60   :  { %5490 = vmatprep.subr.bf16.mxu1 %v5956_v18 }
 0xf63   :  { %5492 = vmatpush3.bf16.msra.mxu1 %v5491_v36 }
 0xf64   :  { %5493 = vmatprep.subr.bf16.mxu1 %v5956_v18 }
 0xf67   :  { %5495 = vmatpush3.bf16.msra.mxu1 %v5494_v3 }
 0xf68   :  { %5496 = vmatprep.subr.bf16.mxu1 %v5956_v18 }
 0xf6b   :  { %5498 = vmatpush3.bf16.msra.mxu1 %v5497_v16 }
 0xf6c   :  { %5499 = vmatprep.subr.bf16.mxu1 %v5956_v18 }
 0xf6f   :  { %5501 = vmatpush3.bf16.msra.mxu1 %v5500_v13 }
 0xf70   :  { %5502 = vmatprep.subr.bf16.mxu1 %v5956_v18 }
 0xf73   :  { %5504 = vmatpush3.bf16.msra.mxu1 %v5503_v49 }
 0xf74   :  { %5505 = vmatprep.subr.bf16.mxu1 %v5956_v18 }
 0xf77   :  { %5507 = vmatpush3.bf16.msra.mxu1 %v5506_v41 }
0x100f   :  { %v3981_v59 = vpop.f32.mrb[28].mxu0  ;;  %v4052_v46 = vpop.f32.mrb[28].mxu1 }
0x1010   :  { %v5520_v32 = vadd.f32 %v3981_v59, %v6946_v6  ;;  %v3983_v1 = vpop.f32.mrb[29].mxu0  ;;  %v4054_v12 = vpop.f32.mrb[29].mxu1  ;;  %v5534_v44 = vadd.f32 %v4052_v46, %v6957_v51 }
0x1011   :  { %v5521_v11 = vadd.f32 %v3983_v1, %v7003_v29  ;;  %v5535_v10 = vadd.f32 %v4054_v12, %v6952_v27 }
0x1012   :  { %v4328_v47 = vmul.f32 -1.442695, %v5520_v32 }
0x1013   :  { %v4329_v60 = vmul.f32 -1.442695, %v5521_v11  ;;  %v4330_v38 = vmul.f32 -1.442695, %v5535_v10 }
0x1014   :  { %5838 = vpow2.f32 %v4328_v47 }
0x1015   :  { %5840 = vpow2.f32 %v4329_v60 }
0x1016   :  { %5842 = vpow2.f32 %v4330_v38 }
0x1017   :  { %5844 = vtanh.f32 %v5534_v44 }
0x101e   :  { %v5839_v22 = vpop.eup %5838 }
0x101f   :  { %v5841_v18 = vpop.eup %5840  ;;  %v4060_v50 = vadd.f32 1.0, %v5839_v22 }
0x1020   :  { %v4066_v35 = vadd.f32 1.0, %v5841_v18  ;;  %v5843_v6 = vpop.eup %5842 }
0x1021   :  { %5846 = vrcp.f32 %v4060_v50  ;;  %v5845_v8 = vpop.eup %5844  ;;  %v4073_v7 = vadd.f32 1.0, %v5843_v6 }
0x1022   :  { %5848 = vrcp.f32 %v4066_v35 }
0x1023   :  { %5850 = vrcp.f32 %v4073_v7 }
0x102b   :  { %v5847_v29 = vpop.eup %5846 }
0x102c   :  { %v5849_v17 = vpop.eup %5848  ;;  %v4077_v9 = vmul.f32 %v5847_v29, %v5845_v8 }
0x102d   :  { %v4076_v2 = vmul.f32 %v5849_v17, %v7220_v37  ;;  %v5851_v21 = vpop.eup %5850 }
0x102f   :  { %v4078_v27 = vadd.f32 %v4077_v9, %v4076_v2  ;;  %v4179_v52 = vpop.f32.mrb[32].mxu0 }
0x1030   :  { %v4400_v51 = vpop.f32.mrb[33].mxu0 }
0x1031   :  { %5852 = vtanh.f32 %v4078_v27 }
0x103b   :  { %v5853_v56 = vpop.eup %5852 }
0x103c   :  { %v4080_v45 = vmul.f32 %v5853_v56, %v5851_v21 }
0x103e   :  { %4434 = vmatmul.mubr.f32.vlgmr.msra.gmra.mrb[30].mxu1 %v4080_v45 }
0x1111   :  { %v4249_v53 = vpop.f32.mrb[30].mxu1 }
0x1112   :  { %v4250_v34 = vadd.f32 %v4249_v53, %v4179_v52  ;;  %v4435_v23 = vpop.f32.mrb[31].mxu1 }
0x1114   :  { %v4260_v26 = vadd.f32 %v4331_v43, %v4250_v34 }
0x1116   :  { %4262 = vst.msk [vmem:[%s7358_s11] sm:$0xff] %vm4261_vm1, %v4260_v26 }
0x1117   :  { %4267 = vsyncpa [#allocation5], 1 }
0x1118   :  { %4268 = vsyncpa [#allocation7], 1 }
0x1119   :  { %4269 = vsyncpa [#allocation10], 1 }

</bundles_post_ra>
